<compile_context>
chip_gen: v7x
topology: tpu7x:2x2x1
jax: 0.10.0
libtpu: 0.0.40
codegen_flags: <defaults>
</compile_context>

<pallas_src>
import numpy as np

import jax
import jax.numpy as jnp
from jax.experimental import pallas as pl
from jax.experimental.pallas import tpu as pltpu


# ----------------------------------------------------------------------------
# Helpers
# ----------------------------------------------------------------------------
def _pick_b_tile(n, max_bt=32):
    """Images per grid step: the largest divisor of n that is <= max_bt.
    Bigger tiles amortize the ~0.35 us/step overhead and raise every matmul's
    M dim; 32 images keep the kernel's live VMEM well under 32 MiB."""
    for bt in range(min(n, max_bt), 0, -1):
        if n % bt == 0:
            return bt
    return 1


def _banded(w_np, wo, row_stride, n_rows):
    """Express a 3x3 'valid' conv as three banded matmuls (one per kh tap).

    w_np: (Cout, Cin, 3, 3) folded conv weights (PyTorch layout).
    Returns (3, n_rows, wo*Cout); row index = w_in * row_stride + ci,
    column index = w_out * Cout + co, so a lane-merged (B*H, W*Cin) activation
    row times this matrix gives a lane-merged (W_out*Cout) output row.
    """
    cout, cin = w_np.shape[0], w_np.shape[1]
    mats = np.zeros((3, n_rows, wo * cout), np.float32)
    for kh in range(3):
        for kw in range(3):
            tap = w_np[:, :, kh, kw].T                       # (Cin, Cout)
            for o in range(wo):
                r0 = (o + kw) * row_stride
                mats[kh, r0:r0 + cin, o * cout:(o + 1) * cout] = tap
    return mats


# ----------------------------------------------------------------------------
# Fused kernel: conv1..conv4 + BN/bias + SiLU + maxpool + fc1 + SiLU + fc2
# ----------------------------------------------------------------------------
def fused_forward_kernel(x_ref, m1_ref, b1_ref, m2_ref, b2_ref, m3_ref, b3_ref,
                         m4_ref, b4_ref, w5_ref, b5_ref, w6_ref, b6_ref, o_ref):
    B = x_ref.shape[0]

    def conv_silu(x3, h_out, m_ref, b_ref):
        # Banded 3x3 conv + (BN-folded) bias + SiLU, fully lane-dense.
        #   x3:    (B, h_in, Win*Cin) activations, lane index = w*Cin + ci
        #   m_ref: (3, Win*Cin, Wo*Cout) banded weights (one slab per kh tap)
        #   b_ref: (1, Wo*Cout) bias pre-tiled across Wo
        # returns (B*h_out, Wo*Cout) f32, lane index = w*Cout + co
        k = x3.shape[2]
        xb = x3.astype(jnp.bfloat16)
        acc = None
        for kh in range(3):
            rows = xb[:, kh:kh + h_out, :].reshape(B * h_out, k)
            part = jnp.dot(rows, m_ref[kh], preferred_element_type=jnp.float32)
            acc = part if acc is None else acc + part
        y = acc + b_ref[...]
        return y * jax.nn.sigmoid(y)                 # SiLU in f32 (v5e-safe)

    x = x_ref[...]                                            # (B, 28, 28) f32
    y = conv_silu(x, 26, m1_ref, b1_ref)                      # (B*26, 208)
    y = conv_silu(y.reshape(B, 26, 208), 24, m2_ref, b2_ref)  # (B*24, 384)

    # 2x2 / stride-2 max pool, applied AFTER SiLU (matching PyTorch op order).
    # Vertical pairs: regroup rows (b,h) -> ((b,h2), hp) and take the max.
    y = y.reshape(B * 12, 2, 384)
    y = jnp.maximum(y[:, 0, :], y[:, 1, :])                   # (B*12, 384)
    # Horizontal pairs: lane l = w*16 + c; max(l, l+16) puts the 2x2-pooled
    # value at lanes j*32 + c.  The stride-2 lane down-sample is folded into
    # conv3's banded weights (odd-w rows are zero), so no gather is needed.
    y = jnp.maximum(y[:, 0:368], y[:, 16:384])                # (B*12, 368)

    y = conv_silu(y.reshape(B, 12, 368), 10, m3_ref, b3_ref)  # (B*10, 160)
    y = conv_silu(y.reshape(B, 10, 160), 8, m4_ref, b4_ref)   # (B*8, 256)

    # fc1 over the NHWC flatten f[b, h*256 + w*32 + c]: contract per h-row
    # against the (8, 256, 128) row-permuted fc1 weight instead of doing an
    # in-kernel (B*8,256)->(B,2048) lane-merge relayout.
    y3 = y.reshape(B, 8, 256).astype(jnp.bfloat16)
    h1 = None
    for hh in range(8):
        part = jnp.dot(y3[:, hh, :], w5_ref[hh],
                       preferred_element_type=jnp.float32)
        h1 = part if h1 is None else h1 + part
    h1 = h1 + b5_ref[...]
    h1 = h1 * jax.nn.sigmoid(h1)                              # SiLU
    # TODO(synk): Dropout(p=0.9) is the identity here (eval/inference mode);
    # train-mode masking is not reproduced.
    out = jnp.dot(h1.astype(jnp.bfloat16), w6_ref[...],
                  preferred_element_type=jnp.float32) + b6_ref[...]
    o_ref[0] = out.astype(o_ref.dtype)


def cnn_forward(x_nchw, p):
    """x_nchw: (N, 1, 28, 28) f32 -> logits (N, 10) f32."""
    N = x_nchw.shape[0]
    x = x_nchw.reshape(N, 28, 28)          # NCHW with C==1 -> squeeze channel
    bt = _pick_b_tile(N)
    nt = N // bt
    out = pl.pallas_call(
        fused_forward_kernel,
        out_shape=jax.ShapeDtypeStruct((nt, bt, 10), jnp.float32),
        grid=(nt,),
        in_specs=[
            pl.BlockSpec((bt, 28, 28), lambda n: (n, 0, 0)),
            pl.BlockSpec((3, 28, 208), lambda n: (0, 0, 0)),
            pl.BlockSpec((1, 208), lambda n: (0, 0)),
            pl.BlockSpec((3, 208, 384), lambda n: (0, 0, 0)),
            pl.BlockSpec((1, 384), lambda n: (0, 0)),
            pl.BlockSpec((3, 368, 160), lambda n: (0, 0, 0)),
            pl.BlockSpec((1, 160), lambda n: (0, 0)),
            pl.BlockSpec((3, 160, 256), lambda n: (0, 0, 0)),
            pl.BlockSpec((1, 256), lambda n: (0, 0)),
            pl.BlockSpec((8, 256, 128), lambda n: (0, 0, 0)),
            pl.BlockSpec((1, 128), lambda n: (0, 0)),
            pl.BlockSpec((128, 10), lambda n: (0, 0)),
            pl.BlockSpec((1, 10), lambda n: (0, 0)),
        ],
        out_specs=pl.BlockSpec((1, bt, 10), lambda n: (n, 0, 0)),
        compiler_params=pltpu.CompilerParams(
            dimension_semantics=("parallel",),
            vmem_limit_bytes=32 * 1024 * 1024,   # v7x-safe (64 MiB physical)
        ),
    )(x, p["c1_m"], p["c1_b"], p["c2_m"], p["c2_b"], p["c3_m"], p["c3_b"],
      p["c4_m"], p["c4_b"], p["fc1_w"], p["fc1_b"], p["fc2_w"], p["fc2_b"])
    return out.reshape(N, 10)


forward = jax.jit(cnn_forward)


# ----------------------------------------------------------------------------
# Parameters: PyTorch-shaped init, BN folding, banded-matrix construction
# ----------------------------------------------------------------------------
def init_params(key):
    def uniform(k, shape, fan_in):
        bound = 1.0 / np.sqrt(np.float32(fan_in))
        return np.asarray(jax.random.uniform(k, shape, jnp.float32, -bound, bound))

    keys = jax.random.split(key, 12)
    p = {}
    eps = 1e-5
    # name, cin, cout, wo, row_stride, n_rows
    conv_defs = [("c1", 1, 8, 26, 1, 28),
                 ("c2", 8, 16, 24, 8, 208),
                 ("c3", 16, 16, 10, 32, 368),   # pool lane down-sample folded in
                 ("c4", 16, 32, 8, 16, 160)]
    for i, (name, cin, cout, wo, rs, nr) in enumerate(conv_defs):
        w_pt = uniform(keys[2 * i], (cout, cin, 3, 3), cin * 9)    # PyTorch layout
        b_pt = uniform(keys[2 * i + 1], (cout,), cin * 9)
        # BatchNorm2d eval-mode fold (untrained defaults: gamma=1, beta=0,
        # running_mean=0, running_var=1; trained stats fold the same way).
        gamma = np.ones(cout, np.float32)
        beta = np.zeros(cout, np.float32)
        r_mean = np.zeros(cout, np.float32)
        r_var = np.ones(cout, np.float32)
        scale = gamma / np.sqrt(r_var + eps)
        w_fold = w_pt * scale[:, None, None, None]
        b_fold = b_pt * scale + beta - r_mean * scale
        p[f"{name}_m"] = jnp.asarray(_banded(w_fold, wo, rs, nr), jnp.bfloat16)
        p[f"{name}_b"] = jnp.asarray(np.tile(b_fold, wo)[None, :], jnp.float32)

    # fc1: PyTorch (128, 2048) over NCHW-flat (c, h, w) columns.  Permute to
    # the kernel's (h, w, c) order and split the h axis -> (8, 256, 128).
    w1_pt = uniform(keys[8], (128, 2048), 2048)
    b1 = uniform(keys[9], (128,), 2048)
    w1 = w1_pt.reshape(128, 32, 8, 8).transpose(0, 2, 3, 1)        # (128, h, w, c)
    w1 = w1.reshape(128, 8, 256).transpose(1, 2, 0)                # (8, 256, 128)
    p["fc1_w"] = jnp.asarray(w1, jnp.bfloat16)
    p["fc1_b"] = jnp.asarray(b1[None, :], jnp.float32)

    w2_pt = uniform(keys[10], (10, 128), 128)
    b2 = uniform(keys[11], (10,), 128)
    p["fc2_w"] = jnp.asarray(w2_pt.T, jnp.bfloat16)                # (128, 10)
    p["fc2_b"] = jnp.asarray(b2[None, :], jnp.float32)
    return p


if __name__ == "__main__":
    key = jax.random.PRNGKey(0)
    k_x, k_p = jax.random.split(key)
    # MNIST-shaped input: batch=2, 1 channel, 28x28 (required so fc1 in=2048).
    x = jax.random.normal(k_x, (2, 1, 28, 28), jnp.float32)
    params = init_params(k_p)

    out = forward(x, params)
    out = jax.block_until_ready(out)
    assert out.shape == (2, 10), out.shape
    assert out.dtype == jnp.float32
    assert bool(jnp.all(jnp.isfinite(out)))
    print("KERNEL_OK")
</pallas_src>

<mosaic_0001>
module attributes {stable_mosaic.version = 11 : i64} {
  func.func @fused_forward_kernel(%arg0: i32, %arg1: memref<2x28x28xf32, #tpu.memory_space<vmem>>, %arg2: memref<3x28x208xbf16, #tpu.memory_space<vmem>>, %arg3: memref<1x208xf32, #tpu.memory_space<vmem>>, %arg4: memref<3x208x384xbf16, #tpu.memory_space<vmem>>, %arg5: memref<1x384xf32, #tpu.memory_space<vmem>>, %arg6: memref<3x368x160xbf16, #tpu.memory_space<vmem>>, %arg7: memref<1x160xf32, #tpu.memory_space<vmem>>, %arg8: memref<3x160x256xbf16, #tpu.memory_space<vmem>>, %arg9: memref<1x256xf32, #tpu.memory_space<vmem>>, %arg10: memref<8x256x128xbf16, #tpu.memory_space<vmem>>, %arg11: memref<1x128xf32, #tpu.memory_space<vmem>>, %arg12: memref<128x10xbf16, #tpu.memory_space<vmem>>, %arg13: memref<1x10xf32, #tpu.memory_space<vmem>>, %arg14: memref<1x2x10xf32, #tpu.memory_space<vmem>>) attributes {dimension_semantics = [#tpu.dimension_semantics<parallel>], iteration_bounds = array<i64: 1>, scalar_prefetch = 0 : i64, scratch_operands = 0 : i64, tpu.core_type = #tpu.core_type<tc>, window_params = [{transform_indices = @transform_0, window_bounds = array<i64: 2, 28, 28>}, {pipeline_mode = #tpu.pipeline_mode<synchronous>, transform_indices = @transform_1, window_bounds = array<i64: 3, 28, 208>}, {pipeline_mode = #tpu.pipeline_mode<synchronous>, transform_indices = @transform_2, window_bounds = array<i64: 1, 208>}, {pipeline_mode = #tpu.pipeline_mode<synchronous>, transform_indices = @transform_3, window_bounds = array<i64: 3, 208, 384>}, {pipeline_mode = #tpu.pipeline_mode<synchronous>, transform_indices = @transform_4, window_bounds = array<i64: 1, 384>}, {pipeline_mode = #tpu.pipeline_mode<synchronous>, transform_indices = @transform_5, window_bounds = array<i64: 3, 368, 160>}, {pipeline_mode = #tpu.pipeline_mode<synchronous>, transform_indices = @transform_6, window_bounds = array<i64: 1, 160>}, {pipeline_mode = #tpu.pipeline_mode<synchronous>, transform_indices = @transform_7, window_bounds = array<i64: 3, 160, 256>}, {pipeline_mode = #tpu.pipeline_mode<synchronous>, transform_indices = @transform_8, window_bounds = array<i64: 1, 256>}, {pipeline_mode = #tpu.pipeline_mode<synchronous>, transform_indices = @transform_9, window_bounds = array<i64: 8, 256, 128>}, {pipeline_mode = #tpu.pipeline_mode<synchronous>, transform_indices = @transform_10, window_bounds = array<i64: 1, 128>}, {pipeline_mode = #tpu.pipeline_mode<synchronous>, transform_indices = @transform_11, window_bounds = array<i64: 128, 10>}, {pipeline_mode = #tpu.pipeline_mode<synchronous>, transform_indices = @transform_12, window_bounds = array<i64: 1, 10>}, {transform_indices = @transform_13, window_bounds = array<i64: 1, 2, 10>}]} {
    %c0 = arith.constant 0 : index
    %c0_0 = arith.constant 0 : index
    %c0_1 = arith.constant 0 : index
    %0 = vector.load %arg1[%c0, %c0_0, %c0_1] : memref<2x28x28xf32, #tpu.memory_space<vmem>>, vector<2x28x28xf32>
    %1 = arith.truncf %0 : vector<2x28x28xf32> to vector<2x28x28xbf16>
    %2 = vector.extract_strided_slice %1 {offsets = [0, 0, 0], sizes = [2, 26, 28], strides = [1, 1, 1]} : vector<2x28x28xbf16> to vector<2x26x28xbf16>
    %3 = vector.shape_cast %2 : vector<2x26x28xbf16> to vector<52x28xbf16>
    %c0_2 = arith.constant 0 : index
    %c0_3 = arith.constant 0 : index
    %c0_4 = arith.constant 0 : index
    %4 = vector.load %arg2[%c0_2, %c0_3, %c0_4] : memref<3x28x208xbf16, #tpu.memory_space<vmem>>, vector<1x28x208xbf16>
    %5 = vector.shape_cast %4 : vector<1x28x208xbf16> to vector<28x208xbf16>
    %cst = arith.constant dense<0.000000e+00> : vector<52x208xf32>
    %6 = tpu.matmul %3, %5, %cst {dimension_numbers = #tpu.dot_dimension_numbers<[1], [0], [0], [1], [0, 0, 1, 1], [], []>} : vector<52x28xbf16>, vector<28x208xbf16>, vector<52x208xf32> -> vector<52x208xf32>
    %7 = vector.extract_strided_slice %1 {offsets = [0, 1, 0], sizes = [2, 26, 28], strides = [1, 1, 1]} : vector<2x28x28xbf16> to vector<2x26x28xbf16>
    %8 = vector.shape_cast %7 : vector<2x26x28xbf16> to vector<52x28xbf16>
    %c1 = arith.constant 1 : index
    %c0_5 = arith.constant 0 : index
    %c0_6 = arith.constant 0 : index
    %9 = vector.load %arg2[%c1, %c0_5, %c0_6] : memref<3x28x208xbf16, #tpu.memory_space<vmem>>, vector<1x28x208xbf16>
    %10 = vector.shape_cast %9 : vector<1x28x208xbf16> to vector<28x208xbf16>
    %cst_7 = arith.constant dense<0.000000e+00> : vector<52x208xf32>
    %11 = tpu.matmul %8, %10, %cst_7 {dimension_numbers = #tpu.dot_dimension_numbers<[1], [0], [0], [1], [0, 0, 1, 1], [], []>} : vector<52x28xbf16>, vector<28x208xbf16>, vector<52x208xf32> -> vector<52x208xf32>
    %12 = arith.addf %6, %11 : vector<52x208xf32>
    %13 = vector.extract_strided_slice %1 {offsets = [0, 2, 0], sizes = [2, 26, 28], strides = [1, 1, 1]} : vector<2x28x28xbf16> to vector<2x26x28xbf16>
    %14 = vector.shape_cast %13 : vector<2x26x28xbf16> to vector<52x28xbf16>
    %c2 = arith.constant 2 : index
    %c0_8 = arith.constant 0 : index
    %c0_9 = arith.constant 0 : index
    %15 = vector.load %arg2[%c2, %c0_8, %c0_9] : memref<3x28x208xbf16, #tpu.memory_space<vmem>>, vector<1x28x208xbf16>
    %16 = vector.shape_cast %15 : vector<1x28x208xbf16> to vector<28x208xbf16>
    %cst_10 = arith.constant dense<0.000000e+00> : vector<52x208xf32>
    %17 = tpu.matmul %14, %16, %cst_10 {dimension_numbers = #tpu.dot_dimension_numbers<[1], [0], [0], [1], [0, 0, 1, 1], [], []>} : vector<52x28xbf16>, vector<28x208xbf16>, vector<52x208xf32> -> vector<52x208xf32>
    %18 = arith.addf %12, %17 : vector<52x208xf32>
    %c0_11 = arith.constant 0 : index
    %c0_12 = arith.constant 0 : index
    %19 = vector.load %arg3[%c0_11, %c0_12] : memref<1x208xf32, #tpu.memory_space<vmem>>, vector<1x208xf32>
    %20 = vector.broadcast %19 : vector<1x208xf32> to vector<52x208xf32>
    %21 = arith.addf %18, %20 : vector<52x208xf32>
    %22 = arith.negf %21 : vector<52x208xf32>
    %23 = math.exp %22 : vector<52x208xf32>
    %cst_13 = arith.constant 1.000000e+00 : f32
    %24 = vector.broadcast %cst_13 : f32 to vector<52x208xf32>
    %25 = arith.addf %24, %23 : vector<52x208xf32>
    %26 = arith.divf %24, %25 : vector<52x208xf32>
    %27 = arith.mulf %21, %26 : vector<52x208xf32>
    %28 = vector.shape_cast %27 : vector<52x208xf32> to vector<2x26x208xf32>
    %29 = arith.truncf %28 : vector<2x26x208xf32> to vector<2x26x208xbf16>
    %30 = vector.extract_strided_slice %29 {offsets = [0, 0, 0], sizes = [2, 24, 208], strides = [1, 1, 1]} : vector<2x26x208xbf16> to vector<2x24x208xbf16>
    %31 = vector.shape_cast %30 : vector<2x24x208xbf16> to vector<48x208xbf16>
    %c0_14 = arith.constant 0 : index
    %c0_15 = arith.constant 0 : index
    %c0_16 = arith.constant 0 : index
    %32 = vector.load %arg4[%c0_14, %c0_15, %c0_16] : memref<3x208x384xbf16, #tpu.memory_space<vmem>>, vector<1x208x384xbf16>
    %33 = vector.shape_cast %32 : vector<1x208x384xbf16> to vector<208x384xbf16>
    %cst_17 = arith.constant dense<0.000000e+00> : vector<48x384xf32>
    %34 = tpu.matmul %31, %33, %cst_17 {dimension_numbers = #tpu.dot_dimension_numbers<[1], [0], [0], [1], [0, 0, 1, 1], [], []>} : vector<48x208xbf16>, vector<208x384xbf16>, vector<48x384xf32> -> vector<48x384xf32>
    %35 = vector.extract_strided_slice %29 {offsets = [0, 1, 0], sizes = [2, 24, 208], strides = [1, 1, 1]} : vector<2x26x208xbf16> to vector<2x24x208xbf16>
    %36 = vector.shape_cast %35 : vector<2x24x208xbf16> to vector<48x208xbf16>
    %c1_18 = arith.constant 1 : index
    %c0_19 = arith.constant 0 : index
    %c0_20 = arith.constant 0 : index
    %37 = vector.load %arg4[%c1_18, %c0_19, %c0_20] : memref<3x208x384xbf16, #tpu.memory_space<vmem>>, vector<1x208x384xbf16>
    %38 = vector.shape_cast %37 : vector<1x208x384xbf16> to vector<208x384xbf16>
    %cst_21 = arith.constant dense<0.000000e+00> : vector<48x384xf32>
    %39 = tpu.matmul %36, %38, %cst_21 {dimension_numbers = #tpu.dot_dimension_numbers<[1], [0], [0], [1], [0, 0, 1, 1], [], []>} : vector<48x208xbf16>, vector<208x384xbf16>, vector<48x384xf32> -> vector<48x384xf32>
    %40 = arith.addf %34, %39 : vector<48x384xf32>
    %41 = vector.extract_strided_slice %29 {offsets = [0, 2, 0], sizes = [2, 24, 208], strides = [1, 1, 1]} : vector<2x26x208xbf16> to vector<2x24x208xbf16>
    %42 = vector.shape_cast %41 : vector<2x24x208xbf16> to vector<48x208xbf16>
    %c2_22 = arith.constant 2 : index
    %c0_23 = arith.constant 0 : index
    %c0_24 = arith.constant 0 : index
    %43 = vector.load %arg4[%c2_22, %c0_23, %c0_24] : memref<3x208x384xbf16, #tpu.memory_space<vmem>>, vector<1x208x384xbf16>
    %44 = vector.shape_cast %43 : vector<1x208x384xbf16> to vector<208x384xbf16>
    %cst_25 = arith.constant dense<0.000000e+00> : vector<48x384xf32>
    %45 = tpu.matmul %42, %44, %cst_25 {dimension_numbers = #tpu.dot_dimension_numbers<[1], [0], [0], [1], [0, 0, 1, 1], [], []>} : vector<48x208xbf16>, vector<208x384xbf16>, vector<48x384xf32> -> vector<48x384xf32>
    %46 = arith.addf %40, %45 : vector<48x384xf32>
    %c0_26 = arith.constant 0 : index
    %c0_27 = arith.constant 0 : index
    %47 = vector.load %arg5[%c0_26, %c0_27] : memref<1x384xf32, #tpu.memory_space<vmem>>, vector<1x384xf32>
    %48 = vector.broadcast %47 : vector<1x384xf32> to vector<48x384xf32>
    %49 = arith.addf %46, %48 : vector<48x384xf32>
    %50 = arith.negf %49 : vector<48x384xf32>
    %51 = math.exp %50 : vector<48x384xf32>
    %cst_28 = arith.constant 1.000000e+00 : f32
    %52 = vector.broadcast %cst_28 : f32 to vector<48x384xf32>
    %53 = arith.addf %52, %51 : vector<48x384xf32>
    %54 = arith.divf %52, %53 : vector<48x384xf32>
    %55 = arith.mulf %49, %54 : vector<48x384xf32>
    %56 = vector.shape_cast %55 : vector<48x384xf32> to vector<24x2x384xf32>
    %57 = vector.extract_strided_slice %56 {offsets = [0, 0, 0], sizes = [24, 1, 384], strides = [1, 1, 1]} : vector<24x2x384xf32> to vector<24x1x384xf32>
    %58 = vector.shape_cast %57 : vector<24x1x384xf32> to vector<24x384xf32>
    %59 = vector.extract_strided_slice %56 {offsets = [0, 1, 0], sizes = [24, 1, 384], strides = [1, 1, 1]} : vector<24x2x384xf32> to vector<24x1x384xf32>
    %60 = vector.shape_cast %59 : vector<24x1x384xf32> to vector<24x384xf32>
    %61 = arith.maximumf %58, %60 : vector<24x384xf32>
    %62 = vector.extract_strided_slice %61 {offsets = [0, 0], sizes = [24, 368], strides = [1, 1]} : vector<24x384xf32> to vector<24x368xf32>
    %63 = vector.extract_strided_slice %61 {offsets = [0, 16], sizes = [24, 368], strides = [1, 1]} : vector<24x384xf32> to vector<24x368xf32>
    %64 = arith.maximumf %62, %63 : vector<24x368xf32>
    %65 = vector.shape_cast %64 : vector<24x368xf32> to vector<2x12x368xf32>
    %66 = arith.truncf %65 : vector<2x12x368xf32> to vector<2x12x368xbf16>
    %67 = vector.extract_strided_slice %66 {offsets = [0, 0, 0], sizes = [2, 10, 368], strides = [1, 1, 1]} : vector<2x12x368xbf16> to vector<2x10x368xbf16>
    %68 = vector.shape_cast %67 : vector<2x10x368xbf16> to vector<20x368xbf16>
    %c0_29 = arith.constant 0 : index
    %c0_30 = arith.constant 0 : index
    %c0_31 = arith.constant 0 : index
    %69 = vector.load %arg6[%c0_29, %c0_30, %c0_31] : memref<3x368x160xbf16, #tpu.memory_space<vmem>>, vector<1x368x160xbf16>
    %70 = vector.shape_cast %69 : vector<1x368x160xbf16> to vector<368x160xbf16>
    %cst_32 = arith.constant dense<0.000000e+00> : vector<20x160xf32>
    %71 = tpu.matmul %68, %70, %cst_32 {dimension_numbers = #tpu.dot_dimension_numbers<[1], [0], [0], [1], [0, 0, 1, 1], [], []>} : vector<20x368xbf16>, vector<368x160xbf16>, vector<20x160xf32> -> vector<20x160xf32>
    %72 = vector.extract_strided_slice %66 {offsets = [0, 1, 0], sizes = [2, 10, 368], strides = [1, 1, 1]} : vector<2x12x368xbf16> to vector<2x10x368xbf16>
    %73 = vector.shape_cast %72 : vector<2x10x368xbf16> to vector<20x368xbf16>
    %c1_33 = arith.constant 1 : index
    %c0_34 = arith.constant 0 : index
    %c0_35 = arith.constant 0 : index
    %74 = vector.load %arg6[%c1_33, %c0_34, %c0_35] : memref<3x368x160xbf16, #tpu.memory_space<vmem>>, vector<1x368x160xbf16>
    %75 = vector.shape_cast %74 : vector<1x368x160xbf16> to vector<368x160xbf16>
    %cst_36 = arith.constant dense<0.000000e+00> : vector<20x160xf32>
    %76 = tpu.matmul %73, %75, %cst_36 {dimension_numbers = #tpu.dot_dimension_numbers<[1], [0], [0], [1], [0, 0, 1, 1], [], []>} : vector<20x368xbf16>, vector<368x160xbf16>, vector<20x160xf32> -> vector<20x160xf32>
    %77 = arith.addf %71, %76 : vector<20x160xf32>
    %78 = vector.extract_strided_slice %66 {offsets = [0, 2, 0], sizes = [2, 10, 368], strides = [1, 1, 1]} : vector<2x12x368xbf16> to vector<2x10x368xbf16>
    %79 = vector.shape_cast %78 : vector<2x10x368xbf16> to vector<20x368xbf16>
    %c2_37 = arith.constant 2 : index
    %c0_38 = arith.constant 0 : index
    %c0_39 = arith.constant 0 : index
    %80 = vector.load %arg6[%c2_37, %c0_38, %c0_39] : memref<3x368x160xbf16, #tpu.memory_space<vmem>>, vector<1x368x160xbf16>
    %81 = vector.shape_cast %80 : vector<1x368x160xbf16> to vector<368x160xbf16>
    %cst_40 = arith.constant dense<0.000000e+00> : vector<20x160xf32>
    %82 = tpu.matmul %79, %81, %cst_40 {dimension_numbers = #tpu.dot_dimension_numbers<[1], [0], [0], [1], [0, 0, 1, 1], [], []>} : vector<20x368xbf16>, vector<368x160xbf16>, vector<20x160xf32> -> vector<20x160xf32>
    %83 = arith.addf %77, %82 : vector<20x160xf32>
    %c0_41 = arith.constant 0 : index
    %c0_42 = arith.constant 0 : index
    %84 = vector.load %arg7[%c0_41, %c0_42] : memref<1x160xf32, #tpu.memory_space<vmem>>, vector<1x160xf32>
    %85 = vector.broadcast %84 : vector<1x160xf32> to vector<20x160xf32>
    %86 = arith.addf %83, %85 : vector<20x160xf32>
    %87 = arith.negf %86 : vector<20x160xf32>
    %88 = math.exp %87 : vector<20x160xf32>
    %cst_43 = arith.constant 1.000000e+00 : f32
    %89 = vector.broadcast %cst_43 : f32 to vector<20x160xf32>
    %90 = arith.addf %89, %88 : vector<20x160xf32>
    %91 = arith.divf %89, %90 : vector<20x160xf32>
    %92 = arith.mulf %86, %91 : vector<20x160xf32>
    %93 = vector.shape_cast %92 : vector<20x160xf32> to vector<2x10x160xf32>
    %94 = arith.truncf %93 : vector<2x10x160xf32> to vector<2x10x160xbf16>
    %95 = vector.extract_strided_slice %94 {offsets = [0, 0, 0], sizes = [2, 8, 160], strides = [1, 1, 1]} : vector<2x10x160xbf16> to vector<2x8x160xbf16>
    %96 = vector.shape_cast %95 : vector<2x8x160xbf16> to vector<16x160xbf16>
    %c0_44 = arith.constant 0 : index
    %c0_45 = arith.constant 0 : index
    %c0_46 = arith.constant 0 : index
    %97 = vector.load %arg8[%c0_44, %c0_45, %c0_46] : memref<3x160x256xbf16, #tpu.memory_space<vmem>>, vector<1x160x256xbf16>
    %98 = vector.shape_cast %97 : vector<1x160x256xbf16> to vector<160x256xbf16>
    %cst_47 = arith.constant dense<0.000000e+00> : vector<16x256xf32>
    %99 = tpu.matmul %96, %98, %cst_47 {dimension_numbers = #tpu.dot_dimension_numbers<[1], [0], [0], [1], [0, 0, 1, 1], [], []>} : vector<16x160xbf16>, vector<160x256xbf16>, vector<16x256xf32> -> vector<16x256xf32>
    %100 = vector.extract_strided_slice %94 {offsets = [0, 1, 0], sizes = [2, 8, 160], strides = [1, 1, 1]} : vector<2x10x160xbf16> to vector<2x8x160xbf16>
    %101 = vector.shape_cast %100 : vector<2x8x160xbf16> to vector<16x160xbf16>
    %c1_48 = arith.constant 1 : index
    %c0_49 = arith.constant 0 : index
    %c0_50 = arith.constant 0 : index
    %102 = vector.load %arg8[%c1_48, %c0_49, %c0_50] : memref<3x160x256xbf16, #tpu.memory_space<vmem>>, vector<1x160x256xbf16>
    %103 = vector.shape_cast %102 : vector<1x160x256xbf16> to vector<160x256xbf16>
    %cst_51 = arith.constant dense<0.000000e+00> : vector<16x256xf32>
    %104 = tpu.matmul %101, %103, %cst_51 {dimension_numbers = #tpu.dot_dimension_numbers<[1], [0], [0], [1], [0, 0, 1, 1], [], []>} : vector<16x160xbf16>, vector<160x256xbf16>, vector<16x256xf32> -> vector<16x256xf32>
    %105 = arith.addf %99, %104 : vector<16x256xf32>
    %106 = vector.extract_strided_slice %94 {offsets = [0, 2, 0], sizes = [2, 8, 160], strides = [1, 1, 1]} : vector<2x10x160xbf16> to vector<2x8x160xbf16>
    %107 = vector.shape_cast %106 : vector<2x8x160xbf16> to vector<16x160xbf16>
    %c2_52 = arith.constant 2 : index
    %c0_53 = arith.constant 0 : index
    %c0_54 = arith.constant 0 : index
    %108 = vector.load %arg8[%c2_52, %c0_53, %c0_54] : memref<3x160x256xbf16, #tpu.memory_space<vmem>>, vector<1x160x256xbf16>
    %109 = vector.shape_cast %108 : vector<1x160x256xbf16> to vector<160x256xbf16>
    %cst_55 = arith.constant dense<0.000000e+00> : vector<16x256xf32>
    %110 = tpu.matmul %107, %109, %cst_55 {dimension_numbers = #tpu.dot_dimension_numbers<[1], [0], [0], [1], [0, 0, 1, 1], [], []>} : vector<16x160xbf16>, vector<160x256xbf16>, vector<16x256xf32> -> vector<16x256xf32>
    %111 = arith.addf %105, %110 : vector<16x256xf32>
    %c0_56 = arith.constant 0 : index
    %c0_57 = arith.constant 0 : index
    %112 = vector.load %arg9[%c0_56, %c0_57] : memref<1x256xf32, #tpu.memory_space<vmem>>, vector<1x256xf32>
    %113 = vector.broadcast %112 : vector<1x256xf32> to vector<16x256xf32>
    %114 = arith.addf %111, %113 : vector<16x256xf32>
    %115 = arith.negf %114 : vector<16x256xf32>
    %116 = math.exp %115 : vector<16x256xf32>
    %cst_58 = arith.constant 1.000000e+00 : f32
    %117 = vector.broadcast %cst_58 : f32 to vector<16x256xf32>
    %118 = arith.addf %117, %116 : vector<16x256xf32>
    %119 = arith.divf %117, %118 : vector<16x256xf32>
    %120 = arith.mulf %114, %119 : vector<16x256xf32>
    %121 = vector.shape_cast %120 : vector<16x256xf32> to vector<2x8x256xf32>
    %122 = arith.truncf %121 : vector<2x8x256xf32> to vector<2x8x256xbf16>
    %123 = vector.extract_strided_slice %122 {offsets = [0, 0, 0], sizes = [2, 1, 256], strides = [1, 1, 1]} : vector<2x8x256xbf16> to vector<2x1x256xbf16>
    %124 = vector.shape_cast %123 : vector<2x1x256xbf16> to vector<2x256xbf16>
    %c0_59 = arith.constant 0 : index
    %c0_60 = arith.constant 0 : index
    %c0_61 = arith.constant 0 : index
    %125 = vector.load %arg10[%c0_59, %c0_60, %c0_61] : memref<8x256x128xbf16, #tpu.memory_space<vmem>>, vector<1x256x128xbf16>
    %126 = vector.shape_cast %125 : vector<1x256x128xbf16> to vector<256x128xbf16>
    %cst_62 = arith.constant dense<0.000000e+00> : vector<2x128xf32>
    %127 = tpu.matmul %124, %126, %cst_62 {dimension_numbers = #tpu.dot_dimension_numbers<[1], [0], [0], [1], [0, 0, 1, 1], [], []>} : vector<2x256xbf16>, vector<256x128xbf16>, vector<2x128xf32> -> vector<2x128xf32>
    %128 = vector.extract_strided_slice %122 {offsets = [0, 1, 0], sizes = [2, 1, 256], strides = [1, 1, 1]} : vector<2x8x256xbf16> to vector<2x1x256xbf16>
    %129 = vector.shape_cast %128 : vector<2x1x256xbf16> to vector<2x256xbf16>
    %c1_63 = arith.constant 1 : index
    %c0_64 = arith.constant 0 : index
    %c0_65 = arith.constant 0 : index
    %130 = vector.load %arg10[%c1_63, %c0_64, %c0_65] : memref<8x256x128xbf16, #tpu.memory_space<vmem>>, vector<1x256x128xbf16>
    %131 = vector.shape_cast %130 : vector<1x256x128xbf16> to vector<256x128xbf16>
    %cst_66 = arith.constant dense<0.000000e+00> : vector<2x128xf32>
    %132 = tpu.matmul %129, %131, %cst_66 {dimension_numbers = #tpu.dot_dimension_numbers<[1], [0], [0], [1], [0, 0, 1, 1], [], []>} : vector<2x256xbf16>, vector<256x128xbf16>, vector<2x128xf32> -> vector<2x128xf32>
    %133 = arith.addf %127, %132 : vector<2x128xf32>
    %134 = vector.extract_strided_slice %122 {offsets = [0, 2, 0], sizes = [2, 1, 256], strides = [1, 1, 1]} : vector<2x8x256xbf16> to vector<2x1x256xbf16>
    %135 = vector.shape_cast %134 : vector<2x1x256xbf16> to vector<2x256xbf16>
    %c2_67 = arith.constant 2 : index
    %c0_68 = arith.constant 0 : index
    %c0_69 = arith.constant 0 : index
    %136 = vector.load %arg10[%c2_67, %c0_68, %c0_69] : memref<8x256x128xbf16, #tpu.memory_space<vmem>>, vector<1x256x128xbf16>
    %137 = vector.shape_cast %136 : vector<1x256x128xbf16> to vector<256x128xbf16>
    %cst_70 = arith.constant dense<0.000000e+00> : vector<2x128xf32>
    %138 = tpu.matmul %135, %137, %cst_70 {dimension_numbers = #tpu.dot_dimension_numbers<[1], [0], [0], [1], [0, 0, 1, 1], [], []>} : vector<2x256xbf16>, vector<256x128xbf16>, vector<2x128xf32> -> vector<2x128xf32>
    %139 = arith.addf %133, %138 : vector<2x128xf32>
    %140 = vector.extract_strided_slice %122 {offsets = [0, 3, 0], sizes = [2, 1, 256], strides = [1, 1, 1]} : vector<2x8x256xbf16> to vector<2x1x256xbf16>
    %141 = vector.shape_cast %140 : vector<2x1x256xbf16> to vector<2x256xbf16>
    %c3 = arith.constant 3 : index
    %c0_71 = arith.constant 0 : index
    %c0_72 = arith.constant 0 : index
    %142 = vector.load %arg10[%c3, %c0_71, %c0_72] : memref<8x256x128xbf16, #tpu.memory_space<vmem>>, vector<1x256x128xbf16>
    %143 = vector.shape_cast %142 : vector<1x256x128xbf16> to vector<256x128xbf16>
    %cst_73 = arith.constant dense<0.000000e+00> : vector<2x128xf32>
    %144 = tpu.matmul %141, %143, %cst_73 {dimension_numbers = #tpu.dot_dimension_numbers<[1], [0], [0], [1], [0, 0, 1, 1], [], []>} : vector<2x256xbf16>, vector<256x128xbf16>, vector<2x128xf32> -> vector<2x128xf32>
    %145 = arith.addf %139, %144 : vector<2x128xf32>
    %146 = vector.extract_strided_slice %122 {offsets = [0, 4, 0], sizes = [2, 1, 256], strides = [1, 1, 1]} : vector<2x8x256xbf16> to vector<2x1x256xbf16>
    %147 = vector.shape_cast %146 : vector<2x1x256xbf16> to vector<2x256xbf16>
    %c4 = arith.constant 4 : index
    %c0_74 = arith.constant 0 : index
    %c0_75 = arith.constant 0 : index
    %148 = vector.load %arg10[%c4, %c0_74, %c0_75] : memref<8x256x128xbf16, #tpu.memory_space<vmem>>, vector<1x256x128xbf16>
    %149 = vector.shape_cast %148 : vector<1x256x128xbf16> to vector<256x128xbf16>
    %cst_76 = arith.constant dense<0.000000e+00> : vector<2x128xf32>
    %150 = tpu.matmul %147, %149, %cst_76 {dimension_numbers = #tpu.dot_dimension_numbers<[1], [0], [0], [1], [0, 0, 1, 1], [], []>} : vector<2x256xbf16>, vector<256x128xbf16>, vector<2x128xf32> -> vector<2x128xf32>
    %151 = arith.addf %145, %150 : vector<2x128xf32>
    %152 = vector.extract_strided_slice %122 {offsets = [0, 5, 0], sizes = [2, 1, 256], strides = [1, 1, 1]} : vector<2x8x256xbf16> to vector<2x1x256xbf16>
    %153 = vector.shape_cast %152 : vector<2x1x256xbf16> to vector<2x256xbf16>
    %c5 = arith.constant 5 : index
    %c0_77 = arith.constant 0 : index
    %c0_78 = arith.constant 0 : index
    %154 = vector.load %arg10[%c5, %c0_77, %c0_78] : memref<8x256x128xbf16, #tpu.memory_space<vmem>>, vector<1x256x128xbf16>
    %155 = vector.shape_cast %154 : vector<1x256x128xbf16> to vector<256x128xbf16>
    %cst_79 = arith.constant dense<0.000000e+00> : vector<2x128xf32>
    %156 = tpu.matmul %153, %155, %cst_79 {dimension_numbers = #tpu.dot_dimension_numbers<[1], [0], [0], [1], [0, 0, 1, 1], [], []>} : vector<2x256xbf16>, vector<256x128xbf16>, vector<2x128xf32> -> vector<2x128xf32>
    %157 = arith.addf %151, %156 : vector<2x128xf32>
    %158 = vector.extract_strided_slice %122 {offsets = [0, 6, 0], sizes = [2, 1, 256], strides = [1, 1, 1]} : vector<2x8x256xbf16> to vector<2x1x256xbf16>
    %159 = vector.shape_cast %158 : vector<2x1x256xbf16> to vector<2x256xbf16>
    %c6 = arith.constant 6 : index
    %c0_80 = arith.constant 0 : index
    %c0_81 = arith.constant 0 : index
    %160 = vector.load %arg10[%c6, %c0_80, %c0_81] : memref<8x256x128xbf16, #tpu.memory_space<vmem>>, vector<1x256x128xbf16>
    %161 = vector.shape_cast %160 : vector<1x256x128xbf16> to vector<256x128xbf16>
    %cst_82 = arith.constant dense<0.000000e+00> : vector<2x128xf32>
    %162 = tpu.matmul %159, %161, %cst_82 {dimension_numbers = #tpu.dot_dimension_numbers<[1], [0], [0], [1], [0, 0, 1, 1], [], []>} : vector<2x256xbf16>, vector<256x128xbf16>, vector<2x128xf32> -> vector<2x128xf32>
    %163 = arith.addf %157, %162 : vector<2x128xf32>
    %164 = vector.extract_strided_slice %122 {offsets = [0, 7, 0], sizes = [2, 1, 256], strides = [1, 1, 1]} : vector<2x8x256xbf16> to vector<2x1x256xbf16>
    %165 = vector.shape_cast %164 : vector<2x1x256xbf16> to vector<2x256xbf16>
    %c7 = arith.constant 7 : index
    %c0_83 = arith.constant 0 : index
    %c0_84 = arith.constant 0 : index
    %166 = vector.load %arg10[%c7, %c0_83, %c0_84] : memref<8x256x128xbf16, #tpu.memory_space<vmem>>, vector<1x256x128xbf16>
    %167 = vector.shape_cast %166 : vector<1x256x128xbf16> to vector<256x128xbf16>
    %cst_85 = arith.constant dense<0.000000e+00> : vector<2x128xf32>
    %168 = tpu.matmul %165, %167, %cst_85 {dimension_numbers = #tpu.dot_dimension_numbers<[1], [0], [0], [1], [0, 0, 1, 1], [], []>} : vector<2x256xbf16>, vector<256x128xbf16>, vector<2x128xf32> -> vector<2x128xf32>
    %169 = arith.addf %163, %168 : vector<2x128xf32>
    %c0_86 = arith.constant 0 : index
    %c0_87 = arith.constant 0 : index
    %170 = vector.load %arg11[%c0_86, %c0_87] : memref<1x128xf32, #tpu.memory_space<vmem>>, vector<1x128xf32>
    %171 = vector.broadcast %170 : vector<1x128xf32> to vector<2x128xf32>
    %172 = arith.addf %169, %171 : vector<2x128xf32>
    %173 = arith.negf %172 : vector<2x128xf32>
    %174 = math.exp %173 : vector<2x128xf32>
    %cst_88 = arith.constant 1.000000e+00 : f32
    %175 = vector.broadcast %cst_88 : f32 to vector<2x128xf32>
    %176 = arith.addf %175, %174 : vector<2x128xf32>
    %177 = arith.divf %175, %176 : vector<2x128xf32>
    %178 = arith.mulf %172, %177 : vector<2x128xf32>
    %179 = arith.truncf %178 : vector<2x128xf32> to vector<2x128xbf16>
    %c0_89 = arith.constant 0 : index
    %c0_90 = arith.constant 0 : index
    %180 = vector.load %arg12[%c0_89, %c0_90] : memref<128x10xbf16, #tpu.memory_space<vmem>>, vector<128x10xbf16>
    %cst_91 = arith.constant dense<0.000000e+00> : vector<2x10xf32>
    %181 = tpu.matmul %179, %180, %cst_91 {dimension_numbers = #tpu.dot_dimension_numbers<[1], [0], [0], [1], [0, 0, 1, 1], [], []>} : vector<2x128xbf16>, vector<128x10xbf16>, vector<2x10xf32> -> vector<2x10xf32>
    %c0_92 = arith.constant 0 : index
    %c0_93 = arith.constant 0 : index
    %182 = vector.load %arg13[%c0_92, %c0_93] : memref<1x10xf32, #tpu.memory_space<vmem>>, vector<1x10xf32>
    %183 = vector.broadcast %182 : vector<1x10xf32> to vector<2x10xf32>
    %184 = arith.addf %181, %183 : vector<2x10xf32>
    %c0_94 = arith.constant 0 : index
    %c0_95 = arith.constant 0 : index
    %c0_96 = arith.constant 0 : index
    %185 = vector.load %arg14[%c0_94, %c0_95, %c0_96] : memref<1x2x10xf32, #tpu.memory_space<vmem>>, vector<1x2x10xf32>
    %186 = vector.shape_cast %185 : vector<1x2x10xf32> to vector<2x10xf32>
    %187 = vector.shape_cast %184 : vector<2x10xf32> to vector<1x2x10xf32>
    tpu.vector_store %arg14[%c0_94, %c0_95, %c0_96], %187 {strides = array<i32>} : memref<1x2x10xf32, #tpu.memory_space<vmem>>, vector<1x2x10xf32>,
    return
  }
  func.func @transform_0(%arg0: i32) -> (i32, i32, i32) {
    %c0_i32 = arith.constant 0 : i32
    %c0_i32_0 = arith.constant 0 : i32
    %c0_i32_1 = arith.constant 0 : i32
    return %arg0, %c0_i32, %c0_i32_0 : i32, i32, i32
  }
  func.func @transform_1(%arg0: i32) -> (i32, i32, i32) {
    %c0_i32 = arith.constant 0 : i32
    %c0_i32_0 = arith.constant 0 : i32
    %c0_i32_1 = arith.constant 0 : i32
    %c0_i32_2 = arith.constant 0 : i32
    return %c0_i32, %c0_i32_0, %c0_i32_1 : i32, i32, i32
  }
  func.func @transform_2(%arg0: i32) -> (i32, i32) {
    %c0_i32 = arith.constant 0 : i32
    %c0_i32_0 = arith.constant 0 : i32
    %c0_i32_1 = arith.constant 0 : i32
    return %c0_i32, %c0_i32_0 : i32, i32
  }
  func.func @transform_3(%arg0: i32) -> (i32, i32, i32) {
    %c0_i32 = arith.constant 0 : i32
    %c0_i32_0 = arith.constant 0 : i32
    %c0_i32_1 = arith.constant 0 : i32
    %c0_i32_2 = arith.constant 0 : i32
    return %c0_i32, %c0_i32_0, %c0_i32_1 : i32, i32, i32
  }
  func.func @transform_4(%arg0: i32) -> (i32, i32) {
    %c0_i32 = arith.constant 0 : i32
    %c0_i32_0 = arith.constant 0 : i32
    %c0_i32_1 = arith.constant 0 : i32
    return %c0_i32, %c0_i32_0 : i32, i32
  }
  func.func @transform_5(%arg0: i32) -> (i32, i32, i32) {
    %c0_i32 = arith.constant 0 : i32
    %c0_i32_0 = arith.constant 0 : i32
    %c0_i32_1 = arith.constant 0 : i32
    %c0_i32_2 = arith.constant 0 : i32
    return %c0_i32, %c0_i32_0, %c0_i32_1 : i32, i32, i32
  }
  func.func @transform_6(%arg0: i32) -> (i32, i32) {
    %c0_i32 = arith.constant 0 : i32
    %c0_i32_0 = arith.constant 0 : i32
    %c0_i32_1 = arith.constant 0 : i32
    return %c0_i32, %c0_i32_0 : i32, i32
  }
  func.func @transform_7(%arg0: i32) -> (i32, i32, i32) {
    %c0_i32 = arith.constant 0 : i32
    %c0_i32_0 = arith.constant 0 : i32
    %c0_i32_1 = arith.constant 0 : i32
    %c0_i32_2 = arith.constant 0 : i32
    return %c0_i32, %c0_i32_0, %c0_i32_1 : i32, i32, i32
  }
  func.func @transform_8(%arg0: i32) -> (i32, i32) {
    %c0_i32 = arith.constant 0 : i32
    %c0_i32_0 = arith.constant 0 : i32
    %c0_i32_1 = arith.constant 0 : i32
    return %c0_i32, %c0_i32_0 : i32, i32
  }
  func.func @transform_9(%arg0: i32) -> (i32, i32, i32) {
    %c0_i32 = arith.constant 0 : i32
    %c0_i32_0 = arith.constant 0 : i32
    %c0_i32_1 = arith.constant 0 : i32
    %c0_i32_2 = arith.constant 0 : i32
    return %c0_i32, %c0_i32_0, %c0_i32_1 : i32, i32, i32
  }
  func.func @transform_10(%arg0: i32) -> (i32, i32) {
    %c0_i32 = arith.constant 0 : i32
    %c0_i32_0 = arith.constant 0 : i32
    %c0_i32_1 = arith.constant 0 : i32
    return %c0_i32, %c0_i32_0 : i32, i32
  }
  func.func @transform_11(%arg0: i32) -> (i32, i32) {
    %c0_i32 = arith.constant 0 : i32
    %c0_i32_0 = arith.constant 0 : i32
    %c0_i32_1 = arith.constant 0 : i32
    return %c0_i32, %c0_i32_0 : i32, i32
  }
  func.func @transform_12(%arg0: i32) -> (i32, i32) {
    %c0_i32 = arith.constant 0 : i32
    %c0_i32_0 = arith.constant 0 : i32
    %c0_i32_1 = arith.constant 0 : i32
    return %c0_i32, %c0_i32_0 : i32, i32
  }
  func.func @transform_13(%arg0: i32) -> (i32, i32, i32) {
    %c0_i32 = arith.constant 0 : i32
    %c0_i32_0 = arith.constant 0 : i32
    %c0_i32_1 = arith.constant 0 : i32
    return %arg0, %c0_i32, %c0_i32_0 : i32, i32, i32
  }
}

</mosaic_0001>

<bundles_post_ra>
// kernel: cnn_forward.1
= control target key start
LH: loop header
LB: loop body
LE: loop exit
PB: predicated region body
PF: predicated region fallthrough
CT: control target
= control target key end

     0   :  { %18 = vsyncpa [#allocation3], 0  ;;  %s13904_s0 = inlined_call_operand.vmem [shape: f32[2,28,28], index: 0, kind: input, shape index: {}]   ;;  %s13905_s1 = inlined_call_operand.vmem [shape: bf16[3,28,208], index: 1, kind: input, shape index: {}]   ;;  %s13906_s2 = inlined_call_operand.vmem [shape: f32[1,208], index: 2, kind: input, shape index: {}]   ;;  %s13907_s3 = inlined_call_operand.vmem [shape: bf16[3,208,384], index: 3, kind: input, shape index: {}]   ;;  %s13908_s4 = inlined_call_operand.vmem [shape: f32[1,384], index: 4, kind: input, shape index: {}]   ;;  %s13909_s5 = inlined_call_operand.vmem [shape: bf16[3,368,160], index: 5, kind: input, shape index: {}]   ;;  %s13910_s6 = inlined_call_operand.vmem [shape: f32[1,160], index: 6, kind: input, shape index: {}]   ;;  %s13911_s7 = inlined_call_operand.hbm [shape: bf16[3,160,256], index: 7, kind: input, shape index: {}]   ;;  %s13912_s8 = inlined_call_operand.vmem [shape: f32[1,256], index: 8, kind: input, shape index: {}]   ;;  %s13913_s9 = inlined_call_operand.vmem [shape: bf16[8,256,128], index: 9, kind: input, shape index: {}]   ;;  %s13914_s10 = inlined_call_operand.vmem [shape: f32[1,128], index: 10, kind: input, shape index: {}]   ;;  %s13915_s11 = inlined_call_operand.vmem [shape: bf16[128,10], index: 11, kind: input, shape index: {}]   ;;  %s13916_s12 = inlined_call_operand.vmem [shape: f32[1,10], index: 12, kind: input, shape index: {}]   ;;  %s13917_s13 = inlined_call_operand.hbm [shape: f32[1,2,10], index: 13, kind: output, shape index: {}]  }
   0x1   :  { %19 = vsyncpa [#allocation4], 0  ;;  %s10524_s25 = smov [#allocation2]   ;;  %s10476_s29 = scalar_lea.hbm %s13911_s7, 7680 }
   0x2   :  { %s39_s26 = sshll.u32 %s10524_s25, 4  ;;  %p10477_p0 = scmp.ne.s32.totalorder %s13911_s7, %s10476_s29  ;;  %s40_s26 = int_to_ptr.vmem [resolvable:$true] %s39_s26 }
   0x3   :  { %p10480_p1 = scmp.lt.u32.totalorder %s10476_s29, %s13911_s7 }
   0x5   :  { %p10482_p2 = pnand %p10480_p1, %p10477_p0 }
   0x7   :  { %10485 = shalt.err (!%p10482_p2)
}
   0x8   :  { %s10486_s17 = scalar_lea.vmem %s40_s26, 7680  ;;  %p10491_p4 = scmp.lt.s32.totalorder %s40_s26, %s40_s26 }
   0x9   :  { %p10487_p3 = scmp.ne.s32.totalorder %s40_s26, %s10486_s17  ;;  %p10492_p5 = scmp.lt.s32.totalorder %s10486_s17, %s10486_s17 }
   0xb   :  { %p10493_p6 = por %p10492_p5, %p10491_p4 }
   0xd   :  { %p10494_p7 = pnand %p10493_p6, %p10487_p3 }
   0xf   :  { %10497 = shalt.err (!%p10494_p7)
}
  0x10   :  { %s10525_s18 = smov 128   ;;  %s10526_s19 = smov 8  }
  0x11   :  { %45 = dma.hbm_to_vmem [thread:$0]  %s13911_s7, 7680, %s40_s26, [#allocation3], %s10525_s18, %s10525_s18, %s10526_s19  }
  0x12   :  { %10520 = dma.done.wait [#allocation3], 7680  }
  0x13   :  { %10521 = vsyncadd [#allocation3], 4294959616  ;;  %v13918_v0 = vmov 0   ;;  %vm272_vm0 = vsmask.f32 256  ;;  %v80_v3 = vlaneseq  ;;  %vm695_vm8 = vcmask 1045504  }
  0x14   :  { %1003 = vmatprep.mubr.bf16.mxu0 %v13918_v0  ;;  %734 = vmatprep.mubr.bf16.mxu1 %v13918_v0  ;;  %vm273_vm1 = vsmask.f32 1284  ;;  %vm275_vm3 = vsmask.f32 2312  ;;  %vm277_vm5 = vsmask.f32 3340 }
  0x15   :  { %vm274_vm2 = vmor %vm272_vm0, %vm273_vm1  ;;  %v10528_v1 = vmov 1966171168   ;;  %vm279_vm7 = vsmask.f32 4368  ;;  %v9697_v4 = vld [vmem:[%s13905_s1 + $0x4] ss:$8 sps:$4 sm:$0xff]  }
  0x16   :  { %vm276_vm4 = vmor %vm274_vm2, %vm275_vm3  ;;  %v78_v2 = vunpack.c.l.s4 %v10528_v1  ;;  %v9699_v5 = vld [vmem:[%s13905_s1] ss:$8 sps:$4 sm:$0xff]   ;;  %v10624_v7 = vshrl.u32 %v80_v3, 7  ;;  %971 = vmatprep.subr.bf16.mxu0 %v9697_v4  ;;  %v9700_v8 = vld [vmem:[%s13905_s1 + $0x14] ss:$8 sps:$4 sm:$0x3f]  }
  0x17   :  { %vm278_vm6 = vmor %vm276_vm4, %vm277_vm5  ;;  %v9702_v9 = vld [vmem:[%s13905_s1 + $0x10] ss:$8 sps:$4 sm:$0x3f]   ;;  %972 = vmatpush1.bf16.msra.mxu0 %v9699_v5  ;;  %v9703_v11 = vld [vmem:[%s13905_s1 + $0x24] ss:$8 sps:$4 sm:$0xff]   ;;  %vm682_vm15 = vcmask 228352  }
  0x18   :  { %v79_v6 = vunpack.c.0.s8 %v78_v2  ;;  %vm10632_vm9 = vmor %vm278_vm6, %vm279_vm7  ;;  %vm281_vm10 = vsmask.f32 5396  ;;  %8311 = vmatprep.subr.msk.bf16.mxu0 %vm695_vm8, %v9700_v8  ;;  %v966_v12 = vsel %vm695_vm8, %v9702_v9, 0  ;;  %v9705_v13 = vld [vmem:[%s13905_s1 + $0x20] ss:$8 sps:$4 sm:$0xff]   ;;  %702 = vmatprep.subr.bf16.mxu1 %v9703_v11  ;;  %v62_v23 = vld [vmem:[%s13904_s0 + $0x10] sm:$0xff] }
  0x19   :  { %v9708_v14 = vld [vmem:[%s13905_s1 + $0x44] ss:$8 sps:$4 sm:$0xff]   ;;  %703 = vmatpush1.bf16.msra.mxu1 %v9705_v13  ;;  %v9709_v20 = vld [vmem:[%s13905_s1 + $0x34] ss:$8 sps:$4 sm:$0x3f]   ;;  %vm10665_vm11 = vmor %vm10632_vm9, %vm281_vm10  ;;  %vm2170_vm1 = vcmask 654336  }
  0x1a   :  { %v60_v15 = vld [vmem:[%s13904_s0] sm:$0xff]  ;;  %v10651_v16 = vsub.s32 %v79_v6, %v10624_v7  ;;  %v61_v17 = vld [vmem:[%s13904_s0 + $0x8] sm:$0xff]  ;;  %v9711_v21 = vld [vmem:[%s13905_s1 + $0x30] ss:$8 sps:$4 sm:$0x3f]   ;;  %8299 = vmatprep.subr.msk.bf16.mxu1 %vm695_vm8, %v9709_v20  ;;  %vm2646_vm5 = vcmask 1042432  }
  0x1b   :  { %974 = vmatpush1.bf16.msra.mxu0 %v966_v12  ;;  %v68_v18 = vpack.c.bf16 %v61_v17, %v60_v15  ;;  %v8261_v19 = vpack.c.bf16 %v61_v17, %v61_v17  ;;  %v63_v24 = vld [vmem:[%s13904_s0 + $0x18] sm:$0xf]  ;;  %vm283_vm12 = vsmask.f32 6424  ;;  %v64_v25 = vld [vmem:[%s13904_s0 + $0x20] sm:$0xff]  ;;  %v697_v28 = vsel %vm695_vm8, %v9711_v21, 0 }
  0x1c   :  { %1245 = vmatprep.subr.bf16.mxu0 %v9708_v14  ;;  %v69_v29 = vpack.c.bf16 %v63_v24, %v62_v23  ;;  %v65_v30 = vld [vmem:[%s13904_s0 + $0x28] sm:$0xff]  ;;  %vm285_vm13 = vsmask.f32 7452  ;;  %v8262_v32 = vpack.c.bf16 %v63_v24, %v63_v24  ;;  %vm284_vm14 = vmor %vm10665_vm11, %vm283_vm12  ;;  %vm1817_vm2 = vsmask.f32 3328  ;;  %s10533_s30 = smov [#allocation5]  }
  0x1d   :  { %v83_v26 = vrot.slane %v68_v18, %v10651_v16  ;;  %v90_v27 = vrot.slane %v8261_v19, %v10651_v16  ;;  %705 = vmatpush1.bf16.msra.mxu1 %v697_v28  ;;  %v70_v31 = vpack.c.bf16 %v65_v30, %v64_v25  ;;  %v8263_v33 = vpack.c.bf16 %v65_v30, %v65_v30  ;;  %vm10721_vm0 = vmor %vm284_vm14, %vm285_vm13  ;;  %v9706_v9 = vld [vmem:[%s13905_s1 + $0x40] ss:$8 sps:$4 sm:$0xff]   ;;  %v9712_v19 = vld [vmem:[%s13905_s1 + $0x54] ss:$8 sps:$4 sm:$0x3f]  }
  0x1e   :  { %v10693_v38 = vrot.slane %v69_v29, %v10651_v16  ;;  %v10696_v39 = vrot.slane %v8262_v32, %v10651_v16  ;;  %vm1818_vm3 = vsmask.f32 7440  ;;  %vm2647_vm6 = vcmask 1046532  }
  0x1f   :  { %v91_v34 = vcombine.high %v83_v26, %v83_v26  ;;  %v92_v35 = vcombine.high %v90_v27, %v90_v27  ;;  %v99_v36 = vrot.slane %v83_v26, %v10651_v16  ;;  %v10687_v37 = vrot.slane %v90_v27, %v10651_v16  ;;  %vm11337_vm4 = vmor %vm1817_vm2, %vm1818_vm3 }
  0x20   :  { %v10699_v40 = vrot.slane %v70_v31, %v10651_v16  ;;  %v10702_v41 = vrot.slane %v8263_v33, %v10651_v16  ;;  %v10718_v46 = vrot.slane %v10693_v38, %v10651_v16  ;;  %v140_v30 = vcombine.high %v10693_v38, %v10693_v38  ;;  %vm11395_vm7 = vmor %vm2646_vm5, %vm2647_vm6 }
  0x21   :  { %v10705_v42 = vrot.slane %v91_v34, %v10651_v16  ;;  %v10708_v43 = vrot.slane %v92_v35, %v10651_v16  ;;  %v10710_v44 = vcombine.high %v99_v36, %v99_v36  ;;  %v10714_v45 = vcombine.high %v10687_v37, %v10687_v37 }
  0x22   :  { %v288_v48 = vshrl.u32 %v99_v36, 16  ;;  %v317_v49 = vshll.u32 %v10687_v37, 16  ;;  %v320_v50 = vshrl.u32 %v10687_v37, 16  ;;  %v349_v25 = vshll.u32 %v10718_v46, 16 }
  0x23   :  { %v773_v51 = vcombine.low %v99_v36, %v10705_v42  ;;  %v8304_v52 = vcombine.high %v99_v36, %v10705_v42  ;;  %v775_v53 = vcombine.low %v10687_v37, %v10708_v43  ;;  %v8305_v54 = vcombine.high %v10687_v37, %v10708_v43 }
  0x24   :  { %v10735_v55 = vcombine.high %v10705_v42, %v10705_v42  ;;  %v10739_v56 = vcombine.high %v10708_v43, %v10708_v43  ;;  %v293_v57 = vshll.u32 %v10705_v42, 16  ;;  %v296_v58 = vshrl.u32 %v10705_v42, 16 }
  0x25   :  { %v783_v59 = vrot.slane %v773_v51, %v10651_v16  ;;  %v790_v60 = vrot.slane %v8304_v52, %v10651_v16  ;;  %v797_v61 = vrot.slane %v775_v53, %v10651_v16  ;;  %v804_v62 = vrot.slane %v8305_v54, %v10651_v16 }
  0x26   :  { %v295_v63 = vsel %vm10721_vm0, %v288_v48, %v293_v57  ;;  %v301_v1 = vshll.u32 %v10710_v44, 16  ;;  %v304_v2 = vshrl.u32 %v10710_v44, 16  ;;  %v309_v3 = vshll.u32 %v10735_v55, 16 }
  0x27   :  { %v805_v4 = vcombine.low %v783_v59, %v790_v60  ;;  %v806_v5 = vcombine.low %v797_v61, %v804_v62  ;;  %v312_v6 = vshrl.u32 %v10735_v55, 16  ;;  %v325_v8 = vshll.u32 %v10708_v43, 16 }
  0x28   :  { %v303_v10 = vsel %vm10721_vm0, %v296_v58, %v301_v1  ;;  %v311_v11 = vsel %vm10721_vm0, %v304_v2, %v309_v3  ;;  %v328_v12 = vshrl.u32 %v10708_v43, 16  ;;  %v333_v13 = vshll.u32 %v10714_v45, 16 }
  0x29   :  { %v813_v14 = vrot.slane %v805_v4, %v10651_v16  ;;  %v820_v15 = vrot.slane %v806_v5, %v10651_v16  ;;  %v319_v17 = vsel %vm10721_vm0, %v312_v6, %v317_v49  ;;  %v327_v18 = vsel %vm10721_vm0, %v320_v50, %v325_v8 }
  0x2a   :  { %v335_v20 = vsel %vm10721_vm0, %v328_v12, %v333_v13  ;;  %v336_v21 = vshrl.u32 %v10714_v45, 16  ;;  %v341_v22 = vshll.u32 %v10739_v56, 16  ;;  %v344_v23 = vshrl.u32 %v10739_v56, 16 }
  0x2b   :  { %v821_v24 = vcombine.low %v813_v14, %v820_v15  ;;  %v502_v26 = vcombine.low %v295_v63, %v303_v10  ;;  %v503_v27 = vcombine.low %v311_v11, %v319_v17  ;;  %v504_v29 = vcombine.low %v327_v18, %v335_v20 }
  0x2c   :  { %v343_v28 = vsel %vm10721_vm0, %v336_v21, %v341_v22  ;;  %v10784_v31 = vrot.slane %v10696_v39, %v10651_v16  ;;  %v351_v32 = vsel %vm10721_vm0, %v344_v23, %v349_v25  ;;  %v179_v35 = vcombine.high %v10699_v40, %v10699_v40  ;;  %v66_v25 = vld [vmem:[%s13904_s0 + $0x30] sm:$0xff] }
  0x2d   :  { %8312 = vmatmul.mubr.msk.bf16.vlgmr.msra.gmra.mrb[0].mxu0 %vm682_vm15, %v821_v24  ;;  %v512_v33 = vrot.slane %v502_v26, %v10651_v16  ;;  %v519_v34 = vrot.slane %v503_v27, %v10651_v16  ;;  %v505_v36 = vcombine.low %v343_v28, %v351_v32  ;;  %v526_v38 = vrot.slane %v504_v29, %v10651_v16  ;;  %v10861_v26 = vld [vmem:[%s13904_s0 + $0x38] sm:$0xf] }
  0x2e   :  { %1246 = vmatpush1.bf16.msra.mxu0 %v9706_v9  ;;  %1013 = vmatprep.mubr.bf16.mxu0 %v13918_v0  ;;  %v10796_v48 = vrot.slane %v140_v30, %v10651_v16  ;;  %v352_v49 = vshrl.u32 %v10718_v46, 16  ;;  %v180_v51 = vcombine.high %v10702_v41, %v10702_v41  ;;  %v10803_v52 = vrot.slane %v10699_v40, %v10651_v16 }
  0x2f   :  { %v534_v50 = vcombine.low %v512_v33, %v519_v34  ;;  %v10806_v53 = vrot.slane %v179_v35, %v10651_v16  ;;  %8327 = vmatprep.subr.msk.bf16.mxu0 %vm695_vm8, %v9712_v19  ;;  %v533_v54 = vrot.slane %v505_v36, %v10651_v16  ;;  %v10816_v59 = vcombine.high %v10718_v46, %v10718_v46  ;;  %v9714_v36 = vld [vmem:[%s13905_s1 + $0x50] ss:$8 sps:$4 sm:$0x3f]  }
  0x30   :  { %v822_v57 = vcombine.low %v10718_v46, %v10796_v48  ;;  %v8306_v58 = vcombine.high %v10718_v46, %v10796_v48  ;;  %v209_v60 = vcombine.high %v10803_v52, %v10803_v52  ;;  %v824_v61 = vcombine.low %v10784_v31, %v10803_v52 }
  0x31   :  { %v542_v40 = vrot.slane %v534_v50, %v10651_v16  ;;  %v10825_v62 = vcombine.high %v10796_v48, %v10796_v48  ;;  %v535_v63 = vcombine.low %v526_v38, %v533_v54  ;;  %v10831_v3 = vcombine.high %v10806_v53, %v10806_v53 }
  0x32   :  { %v832_v1 = vrot.slane %v822_v57, %v10651_v16  ;;  %v839_v2 = vrot.slane %v8306_v58, %v10651_v16  ;;  %v825_v4 = vcombine.low %v10806_v53, %v209_v60  ;;  %v846_v5 = vrot.slane %v824_v61, %v10651_v16 }
  0x33   :  { %v256_v6 = vcombine.high %v10696_v39, %v10696_v39  ;;  %v357_v8 = vshll.u32 %v10796_v48, 16  ;;  %v549_v9 = vrot.slane %v535_v63, %v10651_v16  ;;  %v360_v11 = vshrl.u32 %v10796_v48, 16 }
  0x34   :  { %v854_v10 = vcombine.low %v832_v1, %v839_v2  ;;  %v365_v12 = vshll.u32 %v10816_v59, 16  ;;  %v853_v13 = vrot.slane %v825_v4, %v10651_v16  ;;  %v368_v17 = vshrl.u32 %v10816_v59, 16 }
  0x35   :  { %v10843_v14 = vrot.slane %v256_v6, %v10651_v16  ;;  %v359_v15 = vsel %vm10721_vm0, %v352_v49, %v357_v8  ;;  %v550_v39 = vcombine.low %v542_v40, %v549_v9  ;;  %v373_v20 = vshll.u32 %v10825_v62, 16 }
  0x36   :  { %v862_v18 = vrot.slane %v854_v10, %v10651_v16  ;;  %v367_v19 = vsel %vm10721_vm0, %v360_v11, %v365_v12  ;;  %v855_v21 = vcombine.low %v846_v5, %v853_v13  ;;  %v376_v22 = vshrl.u32 %v10825_v62, 16 }
  0x37   :  { %v381_v23 = vshll.u32 %v10784_v31, 16  ;;  %v384_v24 = vshrl.u32 %v10784_v31, 16  ;;  %8300 = vmatmul.mubr.msk.bf16.vlgmr.msra.gmra.mrb[0].mxu1 %vm682_vm15, %v550_v39  ;;  %v375_v27 = vsel %vm10721_vm0, %v368_v17, %v373_v20  ;;  %v389_v28 = vshll.u32 %v10843_v14, 16 }
  0x38   :  { %v393_v29 = vshrl.u32 %v10803_v52, 16  ;;  %v398_v30 = vshll.u32 %v10806_v53, 16  ;;  %v869_v32 = vrot.slane %v855_v21, %v10651_v16  ;;  %744 = vmatprep.mubr.bf16.mxu1 %v13918_v0  ;;  %v401_v34 = vshrl.u32 %v10806_v53, 16 }
  0x39   :  { %v383_v33 = vsel %vm10721_vm0, %v376_v22, %v381_v23  ;;  %v406_v35 = vshll.u32 %v209_v60, 16  ;;  %v391_v38 = vsel %vm10721_vm0, %v384_v24, %v389_v28  ;;  %v409_v50 = vshrl.u32 %v209_v60, 16 }
  0x3a   :  { %v400_v49 = vsel %vm10721_vm0, %v393_v29, %v398_v30  ;;  %v414_v54 = vshll.u32 %v10831_v3, 16  ;;  %v870_v57 = vcombine.low %v862_v18, %v869_v32  ;;  %v551_v40 = vcombine.low %v359_v15, %v367_v19 }
  0x3b   :  { %v408_v58 = vsel %vm10721_vm0, %v401_v34, %v406_v35  ;;  %v552_v61 = vcombine.low %v375_v27, %v383_v33  ;;  %v553_v1 = vcombine.low %v391_v38, %v400_v49  ;;  %v71_v2 = vpack.c.bf16 %v10861_v26, %v66_v25 }
  0x3c   :  { %v416_v63 = vsel %vm10721_vm0, %v409_v50, %v414_v54  ;;  %v10889_v4 = vrot.slane %v10702_v41, %v10651_v16  ;;  %8313 = vmatmul.mubr.msk.bf16.gmra.mrb[4].mxu0 %vm682_vm15, %v870_v57  ;;  %v561_v5 = vrot.slane %v551_v40, %v10651_v16  ;;  %v10898_v8 = vrot.slane %v180_v51, %v10651_v16 }
  0x3d   :  { %v554_v60 = vcombine.low %v408_v58, %v416_v63  ;;  %v568_v6 = vrot.slane %v552_v61, %v10651_v16  ;;  %v575_v9 = vrot.slane %v553_v1, %v10651_v16  ;;  %1023 = vmatprep.mubr.bf16.mxu0 %v13918_v0  ;;  %v220_v11 = vrot.slane %v71_v2, %v10651_v16 }
  0x3e   :  { %v210_v10 = vcombine.high %v10889_v4, %v10889_v4  ;;  %v871_v12 = vcombine.low %v10831_v3, %v10889_v4  ;;  %v212_v41 = vcombine.high %v10898_v8, %v10898_v8  ;;  %v1240_v51 = vsel %vm695_vm8, %v9714_v36, 0 }
  0x3f   :  { %v582_v13 = vrot.slane %v554_v60, %v10651_v16  ;;  %v583_v15 = vcombine.low %v561_v5, %v568_v6  ;;  %v228_v17 = vcombine.high %v220_v11, %v220_v11  ;;  %v10912_v39 = vrot.slane %v220_v11, %v10651_v16  ;;  %1248 = vmatpush1.bf16.msra.mxu0 %v1240_v51 }
  0x40   :  { %v872_v18 = vcombine.low %v10898_v8, %v210_v10  ;;  %v881_v19 = vrot.slane %v871_v12, %v10651_v16  ;;  %v417_v22 = vshrl.u32 %v10831_v3, 16  ;;  %v422_v23 = vshll.u32 %v10889_v4, 16  ;;  %2589 = vmatprep.subr.bf16.mxu0 %v13918_v0 }
  0x41   :  { %v584_v20 = vcombine.low %v575_v9, %v582_v13  ;;  %v591_v21 = vrot.slane %v583_v15, %v10651_v16  ;;  %v10921_v24 = vrot.slane %v228_v17, %v10651_v16  ;;  %v250_v25 = vcombine.high %v10912_v39, %v10912_v39 }
  0x42   :  { %v873_v27 = vcombine.low %v212_v41, %v10912_v39  ;;  %v888_v28 = vrot.slane %v872_v18, %v10651_v16  ;;  %v424_v30 = vsel %vm10721_vm0, %v417_v22, %v422_v23  ;;  %v425_v3 = vshrl.u32 %v10889_v4, 16 }
  0x43   :  { %v598_v29 = vrot.slane %v584_v20, %v10651_v16  ;;  %v430_v32 = vshll.u32 %v10898_v8, 16  ;;  %v874_v33 = vcombine.low %v10921_v24, %v250_v25  ;;  %v10936_v36 = vcombine.high %v10921_v24, %v10921_v24 }
  0x44   :  { %v895_v34 = vrot.slane %v873_v27, %v10651_v16  ;;  %v903_v35 = vcombine.low %v881_v19, %v888_v28  ;;  %v433_v50 = vshrl.u32 %v10898_v8, 16  ;;  %v438_v54 = vshll.u32 %v210_v10, 16 }
  0x45   :  { %v599_v38 = vcombine.low %v591_v21, %v598_v29  ;;  %v432_v49 = vsel %vm10721_vm0, %v425_v3, %v430_v32  ;;  %v902_v57 = vrot.slane %v874_v33, %v10651_v16  ;;  %v441_v40 = vshrl.u32 %v210_v10, 16 }
  0x46   :  { %v911_v58 = vrot.slane %v903_v35, %v10651_v16  ;;  %v446_v61 = vshll.u32 %v212_v41, 16  ;;  %v440_v63 = vsel %vm10721_vm0, %v433_v50, %v438_v54  ;;  %v449_v1 = vshrl.u32 %v212_v41, 16 }
  0x47   :  { %8301 = vmatmul.mubr.msk.bf16.gmra.mrb[4].mxu1 %vm682_vm15, %v599_v38  ;;  %v454_v2 = vshll.u32 %v10912_v39, 16  ;;  %v457_v60 = vshrl.u32 %v10912_v39, 16  ;;  %v904_v5 = vcombine.low %v895_v34, %v902_v57  ;;  %v462_v9 = vshll.u32 %v10921_v24, 16 }
  0x48   :  { %754 = vmatprep.mubr.bf16.mxu1 %v13918_v0  ;;  %v448_v6 = vsel %vm10721_vm0, %v441_v40, %v446_v61  ;;  %v465_v10 = vshrl.u32 %v10921_v24, 16  ;;  %v470_v12 = vshll.u32 %v250_v25, 16  ;;  %v473_v13 = vshrl.u32 %v250_v25, 16 }
  0x49   :  { %v456_v11 = vsel %vm10721_vm0, %v449_v1, %v454_v2  ;;  %v478_v15 = vshll.u32 %v10936_v36, 16  ;;  %v918_v41 = vrot.slane %v904_v5, %v10651_v16  ;;  %v464_v51 = vsel %vm10721_vm0, %v457_v60, %v462_v9 }
  0x4a   :  { %v600_v17 = vcombine.low %v424_v30, %v432_v49  ;;  %v601_v18 = vcombine.low %v440_v63, %v448_v6  ;;  %v472_v19 = vsel %vm10721_vm0, %v465_v10, %v470_v12  ;;  %v602_v21 = vcombine.low %v456_v11, %v464_v51 }
  0x4b   :  { %v480_v20 = vsel %vm10721_vm0, %v473_v13, %v478_v15  ;;  %v8264_v22 = vpack.c.bf16 %v10861_v26, %v10861_v26  ;;  %v919_v23 = vcombine.low %v911_v58, %v918_v41  ;;  %v481_v3 = vshrl.u32 %v10936_v36, 16 }
  0x4c   :  { %v603_v25 = vcombine.low %v472_v19, %v480_v20  ;;  %v610_v27 = vrot.slane %v600_v17, %v10651_v16  ;;  %v617_v28 = vrot.slane %v601_v18, %v10651_v16  ;;  %v624_v29 = vrot.slane %v602_v21, %v10651_v16 }
  0x4d   :  { %v227_v30 = vrot.slane %v8264_v22, %v10651_v16  ;;  %v1047_v32 = vcombine.low %v10705_v42, %v10710_v44  ;;  %8314 = vmatmul.mubr.msk.bf16.gmra.mrb[8].mxu0 %vm682_vm15, %v919_v23  ;;  %v1048_v34 = vcombine.low %v10735_v55, %v10687_v37  ;;  %v1049_v35 = vcombine.low %v10708_v43, %v10714_v45 }
  0x4e   :  { %v631_v33 = vrot.slane %v603_v25, %v10651_v16  ;;  %v632_v26 = vcombine.low %v610_v27, %v617_v28  ;;  %1033 = vmatprep.mubr.bf16.mxu0 %v13918_v0  ;;  %v1050_v42 = vcombine.low %v10739_v56, %v10718_v46  ;;  %v1096_v61 = vcombine.low %v10796_v48, %v10816_v59 }
  0x4f   :  { %v10980_v38 = vrot.slane %v227_v30, %v10651_v16  ;;  %v264_v49 = vcombine.high %v227_v30, %v227_v30  ;;  %v1057_v44 = vrot.slane %v1047_v32, %v10651_v16  ;;  %v1064_v57 = vrot.slane %v1048_v34, %v10651_v16  ;;  %v9720_v34 = vld [vmem:[%s13907_s3 + $0x13c] ss:$12 sps:$4 sm:$0xff]  }
  0x50   :  { %v633_v50 = vcombine.low %v624_v29, %v631_v33  ;;  %v640_v54 = vrot.slane %v632_v26, %v10651_v16  ;;  %v1071_v37 = vrot.slane %v1049_v35, %v10651_v16  ;;  %v1078_v56 = vrot.slane %v1050_v42, %v10651_v16  ;;  %v9715_v33 = vld [vmem:[%s13907_s3 + $0x8] ss:$12 sps:$4 sm:$0xff]   ;;  %v9716_v26 = vld [vmem:[%s13907_s3 + $0x20] ss:$12 sps:$4 sm:$0xff]   ;;  %v9721_v35 = vld [vmem:[%s13907_s3 + $0x50] ss:$12 sps:$4 sm:$0xff]   ;;  %2180 = vmatprep.subr.bf16.mxu1 %v9720_v34 }
  0x51   :  { %v920_v43 = vcombine.low %v10936_v36, %v10980_v38  ;;  %v271_v45 = vrot.slane %v264_v49, %v10651_v16  ;;  %v486_v55 = vshll.u32 %v10980_v38, 16  ;;  %v489_v58 = vshrl.u32 %v10980_v38, 16  ;;  %v9724_v49 = vld [vmem:[%s13907_s3 + $0x154] ss:$12 sps:$4 sm:$0xff]  }
  0x52   :  { %v647_v46 = vrot.slane %v633_v50, %v10651_v16  ;;  %v1079_v40 = vcombine.low %v1057_v44, %v1064_v57  ;;  %v1097_v2 = vcombine.low %v10825_v62, %v10784_v31  ;;  %v1080_v5 = vcombine.low %v1071_v37, %v1078_v56  ;;  %v9725_v42 = vld [vmem:[%s13907_s3 + $0x68] ss:$12 sps:$4 sm:$0xff]   ;;  %v9722_v44 = vld [vmem:[%s13907_s3 + $0x150] ss:$12 sps:$4 sm:$0xff]   ;;  %v9728_v50 = vld [vmem:[%s13907_s3 + $0x16c] ss:$12 sps:$4 sm:$0xff]  }
  0x53   :  { %v927_v63 = vrot.slane %v920_v43, %v10651_v16  ;;  %v488_v1 = vsel %vm10721_vm0, %v481_v3, %v486_v55  ;;  %v494_v36 = vshll.u32 %v271_v45, 16  ;;  %v1098_v6 = vcombine.low %v10843_v14, %v10806_v53  ;;  %v9726_v57 = vld [vmem:[%s13907_s3 + $0x168] ss:$12 sps:$4 sm:$0xff]   ;;  %v9732_v37 = vld [vmem:[%s13907_s3 + $0x184] ss:$12 sps:$4 sm:$0xff]  }
  0x54   :  { %v648_v60 = vcombine.low %v640_v54, %v647_v46  ;;  %v8320_v48 = vcombine.high %v10803_v52, %v10806_v53  ;;  %v1087_v11 = vrot.slane %v1079_v40, %v10651_v16  ;;  %v1094_v31 = vrot.slane %v1080_v5, %v10651_v16  ;;  %v9729_v54 = vld [vmem:[%s13907_s3 + $0x80] ss:$12 sps:$4 sm:$0xff]   ;;  %v9733_v43 = vld [vmem:[%s13907_s3 + $0x98] ss:$12 sps:$4 sm:$0xff]   ;;  %v9736_v55 = vld [vmem:[%s13907_s3 + $0x19c] ss:$12 sps:$4 sm:$0xff]  }
  0x55   :  { %v934_v9 = vrot.slane %v927_v63, %v10651_v16  ;;  %v496_v10 = vsel %vm10721_vm0, %v489_v58, %v494_v36  ;;  %v1106_v62 = vrot.slane %v1096_v61, %v10651_v16  ;;  %v1113_v14 = vrot.slane %v1097_v2, %v10651_v16  ;;  %v9737_v58 = vld [vmem:[%s13907_s3 + $0xb0] ss:$12 sps:$4 sm:$0xff]   ;;  %v9734_v46 = vld [vmem:[%s13907_s3 + $0x198] ss:$12 sps:$4 sm:$0xff]   ;;  %v9740_v56 = vld [vmem:[%s13907_s3 + $0x1b4] ss:$12 sps:$4 sm:$0xff]  }
  0x56   :  { %8302 = vmatmul.mubr.msk.bf16.gmra.mrb[8].mxu1 %vm682_vm15, %v648_v60  ;;  %v649_v59 = vcombine.low %v488_v1, %v496_v10  ;;  %v1120_v47 = vrot.slane %v1098_v6, %v10651_v16  ;;  %v1127_v12 = vrot.slane %v8320_v48, %v10651_v16  ;;  %v1095_v13 = vcombine.low %v1087_v11, %v1094_v31  ;;  %v9741_v40 = vld [vmem:[%s13907_s3 + $0xc8] ss:$12 sps:$4 sm:$0xff]   ;;  %v9738_v61 = vld [vmem:[%s13907_s3 + $0x1b0] ss:$12 sps:$4 sm:$0xff]   ;;  %v9744_v63 = vld [vmem:[%s13907_s3 + $0x1cc] ss:$12 sps:$4 sm:$0xff]  }
  0x57   :  { %8315 = vmatmul.mubr.msk.bf16.gmra.mrb[12].mxu0 %vm682_vm15, %v934_v9  ;;  %764 = vmatprep.mubr.bf16.mxu1 %v13918_v0  ;;  %v1145_v15 = vcombine.low %v10889_v4, %v10898_v8  ;;  %v8321_v41 = vcombine.high %v10889_v4, %v10898_v8  ;;  %v1128_v51 = vcombine.low %v1106_v62, %v1113_v14  ;;  %v9745_v1 = vld [vmem:[%s13907_s3 + $0xe0] ss:$12 sps:$4 sm:$0xff]   ;;  %v9742_v36 = vld [vmem:[%s13907_s3 + $0x1c8] ss:$12 sps:$4 sm:$0xff]   ;;  %v9748_v2 = vld [vmem:[%s13907_s3 + $0x1e4] ss:$12 sps:$4 sm:$0xff]  }
  0x58   :  { %v656_v52 = vrot.slane %v649_v59, %v10651_v16  ;;  %1277 = vmatprep.mubr.bf16.mxu0 %v13918_v0  ;;  %v1129_v17 = vcombine.low %v1120_v47, %v1127_v12  ;;  %v1147_v18 = vcombine.low %v10912_v39, %v10921_v24  ;;  %v8322_v19 = vcombine.high %v10912_v39, %v10921_v24  ;;  %v9749_v60 = vld [vmem:[%s13907_s3 + $0xf8] ss:$12 sps:$4 sm:$0xff]   ;;  %v9746_v5 = vld [vmem:[%s13907_s3 + $0x1e0] ss:$12 sps:$4 sm:$0xff]   ;;  %v9752_v6 = vld [vmem:[%s13907_s3 + $0x1fc] ss:$12 sps:$4 sm:$0xff]  }
  0x59   :  { %v1155_v20 = vrot.slane %v1145_v15, %v10651_v16  ;;  %v1162_v21 = vrot.slane %v8321_v41, %v10651_v16  ;;  %v1136_v22 = vrot.slane %v1128_v51, %v10651_v16  ;;  %v1194_v30 = vcombine.low %v10980_v38, %v271_v45  ;;  %v9718_v38 = vld [vmem:[%s13907_s3 + $0x138] ss:$12 sps:$4 sm:$0xff]   ;;  %v9730_v45 = vld [vmem:[%s13907_s3 + $0x180] ss:$12 sps:$4 sm:$0xff]   ;;  %v9753_v9 = vld [vmem:[%s13907_s3 + $0x110] ss:$12 sps:$4 sm:$0xff]  }
  0x5a   :  { %v663_v53 = vrot.slane %v656_v52, %v10651_v16  ;;  %v1143_v4 = vrot.slane %v1129_v17, %v10651_v16  ;;  %v1169_v8 = vrot.slane %v1147_v18, %v10651_v16  ;;  %v1176_v23 = vrot.slane %v8322_v19, %v10651_v16  ;;  %2181 = vmatpush1.bf16.msra.mxu1 %v9718_v38  ;;  %v9750_v10 = vld [vmem:[%s13907_s3 + $0x1f8] ss:$12 sps:$4 sm:$0xff]   ;;  %v9756_v48 = vld [vmem:[%s13907_s3 + $0x214] ss:$12 sps:$4 sm:$0xff]   ;;  %v9754_v11 = vld [vmem:[%s13907_s3 + $0x210] ss:$12 sps:$4 sm:$0xff]  }
  0x5b   :  { %v1177_v39 = vcombine.low %v1155_v20, %v1162_v21  ;;  %v1201_v3 = vrot.slane %v1194_v30, %v10651_v16  ;;  %2182 = vmatprep.subr.bf16.mxu1 %v9724_v49  ;;  %v9757_v59 = vld [vmem:[%s13907_s3 + $0x128] ss:$12 sps:$4 sm:$0xff]   ;;  %v9760_v31 = vld [vmem:[%s13907_s3 + $0x22c] ss:$12 sps:$4 sm:$0xff]   ;;  %v9764_v14 = vld [vmem:[%s13907_s3 + $0x244] ss:$12 sps:$4 sm:$0xff]  }
  0x5c   :  { %v1144_v25 = vcombine.low %v1136_v22, %v1143_v4  ;;  %v1178_v24 = vcombine.low %v1169_v8, %v1176_v23  ;;  %v9758_v62 = vld [vmem:[%s13907_s3 + $0x228] ss:$12 sps:$4 sm:$0xff]   ;;  %v9762_v47 = vld [vmem:[%s13907_s3 + $0x240] ss:$12 sps:$4 sm:$0xff]   ;;  %v9766_v52 = vld [vmem:[%s13907_s3 + $0x258] ss:$12 sps:$4 sm:$0xff]  }
  0x5d   :  { %v1185_v27 = vrot.slane %v1177_v39, %v10651_v16  ;;  %v1208_v32 = vrot.slane %v1201_v3, %v10651_v16  ;;  %v9768_v12 = vld [vmem:[%s13907_s3 + $0x25c] ss:$12 sps:$4 sm:$0xff]   ;;  %vm3703_vm8 = vcmask 916480   ;;  %vm4446_vm9 = vcmask 1041409  }
  0x5e   :  { %8303 = vmatmul.mubr.msk.bf16.gmra.mrb[12].mxu1 %vm682_vm15, %v663_v53  ;;  %v1192_v28 = vrot.slane %v1178_v24, %v10651_v16  ;;  %v9717_v16 = vld [vmem:[%s13907_s3 + $0x38] ss:$12 sps:$4 sm:$0xff]   ;;  %v11186_v24 = vsub.s32 0, %v10624_v7  ;;  %vm4449_vm10 = vcmask 1042434   ;;  %vm4452_vm11 = vcmask 1043459  }
  0x5f   :  { %8328 = vmatmul.mubr.msk.bf16.vlgmr.msra.gmra.mrb[0].mxu0 %vm682_vm15, %v1095_v13  ;;  %2183 = vmatpush1.bf16.msra.mxu1 %v9722_v44  ;;  %vm4455_vm12 = vcmask 1044484   ;;  %vm4458_vm13 = vcmask 1045509   ;;  %vm4461_vm14 = vcmask 1046534   ;;  %vm6246_vm0 = vcmask 261120  }
  0x60   :  { %1287 = vmatprep.mubr.bf16.mxu0 %v13918_v0  ;;  %v1193_v29 = vcombine.low %v1185_v27, %v1192_v28  ;;  %2590 = vmatpush1.bf16.msra.mxu0 %v9715_v33  ;;  %13976 = vst [vmem:[#allocation8_spill] sm:$0xff] %v11186_v24  ;;  %v1330_v27 = vld [vmem:[%s13906_s2] sm:$0x3]  ;;  %v11192_v28 = vsub.s32 1, %v10624_v7  ;;  %vm8244_vm2 = vcmask 74752  }
  0x61   :  { %2591 = vmatprep.subr.bf16.mxu0 %v13918_v0  ;;  %2184 = vmatprep.subr.bf16.mxu1 %v9728_v50  ;;  %v11195_v30 = vrot.slane %v1330_v27, %v11186_v24 }
  0x62   :  { %13977 = vst [vmem:[#allocation9_spill] sm:$0xff] %v11192_v28 }
  0x63   :  { %2185 = vmatpush1.bf16.msra.mxu1 %v9726_v57 }
  0x64   :  { %2592 = vmatpush1.bf16.msra.mxu0 %v9716_v26  ;;  %2186 = vmatprep.subr.bf16.mxu1 %v9732_v37  ;;  %v11200_v26 = vrot.slane %v1330_v27, %v11192_v28 }
  0x65   :  { %2593 = vmatprep.subr.bf16.mxu0 %v13918_v0 }
  0x67   :  { %8329 = vmatmul.mubr.msk.bf16.gmra.mrb[4].mxu0 %vm682_vm15, %v1144_v25  ;;  %2187 = vmatpush1.bf16.msra.mxu1 %v9730_v45 }
  0x68   :  { %1297 = vmatprep.mubr.bf16.mxu0 %v13918_v0  ;;  %2594 = vmatpush1.bf16.msra.mxu0 %v9717_v16 }
  0x69   :  { %2595 = vmatprep.subr.bf16.mxu0 %v13918_v0  ;;  %2188 = vmatprep.subr.bf16.mxu1 %v9736_v55 }
  0x6b   :  { %2189 = vmatpush1.bf16.msra.mxu1 %v9734_v46 }
  0x6c   :  { %2596 = vmatpush1.bf16.msra.mxu0 %v9721_v35  ;;  %2190 = vmatprep.subr.bf16.mxu1 %v9740_v56 }
  0x6d   :  { %2597 = vmatprep.subr.bf16.mxu0 %v13918_v0 }
  0x6f   :  { %8330 = vmatmul.mubr.msk.bf16.gmra.mrb[8].mxu0 %vm682_vm15, %v1193_v29  ;;  %2191 = vmatpush1.bf16.msra.mxu1 %v9738_v61 }
  0x70   :  { %1307 = vmatprep.mubr.bf16.mxu0 %v13918_v0  ;;  %2598 = vmatpush1.bf16.msra.mxu0 %v9725_v42 }
  0x71   :  { %2599 = vmatprep.subr.bf16.mxu0 %v13918_v0  ;;  %2192 = vmatprep.subr.bf16.mxu1 %v9744_v63 }
  0x73   :  { %2193 = vmatpush1.bf16.msra.mxu1 %v9742_v36 }
  0x74   :  { %2600 = vmatpush1.bf16.msra.mxu0 %v9729_v54  ;;  %2194 = vmatprep.subr.bf16.mxu1 %v9748_v2 }
  0x75   :  { %2601 = vmatprep.subr.bf16.mxu0 %v13918_v0 }
  0x77   :  { %8331 = vmatmul.mubr.msk.bf16.gmra.mrb[16].mxu0 %vm682_vm15, %v1208_v32  ;;  %2195 = vmatpush1.bf16.msra.mxu1 %v9746_v5  ;;  %vm4464_vm15 = vcmask 1047559  }
  0x78   :  { %2602 = vmatpush1.bf16.msra.mxu0 %v9733_v43  ;;  %2196 = vmatprep.subr.bf16.mxu1 %v9752_v6 }
  0x79   :  { %2603 = vmatprep.subr.bf16.mxu0 %v13918_v0 }
  0x7b   :  { %2197 = vmatpush1.bf16.msra.mxu1 %v9750_v10 }
  0x7c   :  { %2604 = vmatpush1.bf16.msra.mxu0 %v9737_v58  ;;  %2198 = vmatprep.subr.bf16.mxu1 %v9756_v48 }
  0x7d   :  { %2605 = vmatprep.subr.bf16.mxu0 %v13918_v0 }
  0x7f   :  { %2199 = vmatpush1.bf16.msra.mxu1 %v9754_v11 }
  0x80   :  { %2606 = vmatpush1.bf16.msra.mxu0 %v9741_v40  ;;  %2200 = vmatprep.subr.bf16.mxu1 %v9760_v31 }
  0x81   :  { %2607 = vmatprep.subr.bf16.mxu0 %v13918_v0 }
  0x83   :  { %2201 = vmatpush1.bf16.msra.mxu1 %v9758_v62 }
  0x84   :  { %2608 = vmatpush1.bf16.msra.mxu0 %v9745_v1  ;;  %2202 = vmatprep.subr.bf16.mxu1 %v9764_v14 }
  0x85   :  { %2609 = vmatprep.subr.bf16.mxu0 %v13918_v0 }
  0x87   :  { %2203 = vmatpush1.bf16.msra.mxu1 %v9762_v47 }
  0x88   :  { %2610 = vmatpush1.bf16.msra.mxu0 %v9749_v60  ;;  %2204 = vmatprep.subr.bf16.mxu1 %v9768_v12 }
  0x89   :  { %2611 = vmatprep.subr.bf16.mxu0 %v13918_v0 }
  0x8b   :  { %2205 = vmatpush1.bf16.msra.mxu1 %v9766_v52 }
  0x8c   :  { %2612 = vmatpush1.bf16.msra.mxu0 %v9753_v9  ;;  %2243 = vmatprep.subr.bf16.mxu1 %v13918_v0 }
  0x8d   :  { %2613 = vmatprep.subr.bf16.mxu0 %v13918_v0 }
  0x90   :  { %2614 = vmatpush1.bf16.msra.mxu0 %v9757_v59 }
  0x91   :  { %3023 = vmatprep.subr.bf16.mxu0 %v13918_v0 }
 0x10a   :  { %v736_v53 = vpop.f32.mrb[0].mxu1 }
 0x10b   :  { %v738_v13 = vpop.f32.mrb[1].mxu1 }
 0x10c   :  { %v740_v15 = vpop.f32.mrb[2].mxu1 }
 0x10d   :  { %v742_v41 = vpop.f32.mrb[3].mxu1 }
 0x11a   :  { %v746_v51 = vpop.f32.mrb[4].mxu1 }
 0x11b   :  { %v748_v17 = vpop.f32.mrb[5].mxu1 }
 0x11c   :  { %v750_v18 = vpop.f32.mrb[6].mxu1 }
 0x11d   :  { %v752_v19 = vpop.f32.mrb[7].mxu1 }
 0x129   :  { %v756_v20 = vpop.f32.mrb[8].mxu1 }
 0x12a   :  { %v1035_v21 = vpop.f32.mrb[12].mxu0  ;;  %v11179_v22 = vpop.f32.mrb[9].mxu1 }
 0x12b   :  { %v1037_v4 = vpop.f32.mrb[13].mxu0  ;;  %v11181_v8 = vpop.f32.mrb[10].mxu1 }
 0x12c   :  { %v1039_v23 = vpop.f32.mrb[14].mxu0  ;;  %v11183_v25 = vpop.f32.mrb[11].mxu1 }
 0x12d   :  { %v1040_v39 = vpop.f32.mrb[15].mxu0 }
 0x131   :  { %v766_v29 = vpop.f32.mrb[12].mxu1 }
 0x132   :  { %v11197_v3 = vadd.f32 %v1035_v21, %v766_v29  ;;  %v768_v32 = vpop.f32.mrb[13].mxu1  ;;  %v1279_v33 = vpop.f32.mrb[0].mxu0 }
 0x133   :  { %v11202_v16 = vadd.f32 %v1037_v4, %v768_v32  ;;  %v9556_v34 = vadd.f32 %v1279_v33, %v736_v53  ;;  %v1281_v35 = vpop.f32.mrb[1].mxu0  ;;  %v770_v38 = vpop.f32.mrb[14].mxu1 }
 0x134   :  { %v9557_v49 = vadd.f32 %v1281_v35, %v738_v13  ;;  %v1283_v42 = vpop.f32.mrb[2].mxu0  ;;  %v771_v44 = vpop.f32.mrb[15].mxu1  ;;  %v10529_v35 = vmov 1983009808  }
 0x135   :  { %v11205_v50 = vadd.f32 %v9556_v34, %v11195_v30  ;;  %v9558_v54 = vadd.f32 %v1283_v42, %v740_v15  ;;  %v1285_v57 = vpop.f32.mrb[3].mxu0  ;;  %v1471_v38 = vunpack.c.l.s4 %v10529_v35 }
 0x136   :  { %v11208_v37 = vadd.f32 %v9557_v49, %v11200_v26  ;;  %v9559_v43 = vadd.f32 %v1285_v57, %v742_v41 }
 0x137   :  { %v8332_v45 = vmul.f32 -1.442695, %v11205_v50  ;;  %v11212_v55 = vadd.f32 %v9558_v54, %v11195_v30 }
 0x138   :  { %v8333_v58 = vmul.f32 -1.442695, %v11208_v37  ;;  %v11216_v46 = vadd.f32 %v9559_v43, %v11200_v26 }
 0x139   :  { %10304 = vpow2.f32 %v8332_v45  ;;  %v8334_v56 = vmul.f32 -1.442695, %v11212_v55 }
 0x13a   :  { %10306 = vpow2.f32 %v8333_v58  ;;  %v8335_v40 = vmul.f32 -1.442695, %v11216_v46  ;;  %v1289_v61 = vpop.f32.mrb[4].mxu0 }
 0x13b   :  { %10308 = vpow2.f32 %v8334_v56  ;;  %v9560_v63 = vadd.f32 %v1289_v61, %v746_v51  ;;  %v1291_v1 = vpop.f32.mrb[5].mxu0 }
 0x13c   :  { %10310 = vpow2.f32 %v8335_v40  ;;  %v9561_v36 = vadd.f32 %v1291_v1, %v748_v17  ;;  %v1293_v2 = vpop.f32.mrb[6].mxu0 }
 0x13d   :  { %v11221_v60 = vadd.f32 %v9560_v63, %v11195_v30  ;;  %v9562_v5 = vadd.f32 %v1293_v2, %v750_v18  ;;  %v1295_v6 = vpop.f32.mrb[7].mxu0 }
 0x13e   :  { %v11224_v9 = vadd.f32 %v9561_v36, %v11200_v26  ;;  %v9563_v10 = vadd.f32 %v1295_v6, %v752_v19  ;;  %v1472_v36 = vunpack.c.0.s8 %v1471_v38 }
 0x13f   :  { %v8336_v48 = vmul.f32 -1.442695, %v11221_v60  ;;  %v11228_v59 = vadd.f32 %v9562_v5, %v11195_v30 }
 0x140   :  { %v8337_v11 = vmul.f32 -1.442695, %v11224_v9  ;;  %v11232_v31 = vadd.f32 %v9563_v10, %v11200_v26 }
 0x141   :  { %10312 = vpow2.f32 %v8336_v48  ;;  %v8338_v62 = vmul.f32 -1.442695, %v11228_v59 }
 0x142   :  { %10314 = vpow2.f32 %v8337_v11  ;;  %v8339_v14 = vmul.f32 -1.442695, %v11232_v31  ;;  %v1299_v47 = vpop.f32.mrb[8].mxu0 }
 0x143   :  { %v10305_v12 = vpop.eup %10304  ;;  %10316 = vpow2.f32 %v8338_v62  ;;  %v9564_v52 = vadd.f32 %v1299_v47, %v756_v20  ;;  %v1301_v53 = vpop.f32.mrb[9].mxu0 }
 0x144   :  { %v10307_v13 = vpop.eup %10306  ;;  %v1398_v15 = vadd.f32 1.0, %v10305_v12  ;;  %10318 = vpow2.f32 %v8339_v14  ;;  %v9565_v41 = vadd.f32 %v1301_v53, %v11179_v22  ;;  %v1303_v51 = vpop.f32.mrb[10].mxu0  ;;  %v11268_v14 = vsub.s32 %v1472_v36, %v10624_v7 }
 0x145   :  { %v10309_v17 = vpop.eup %10308  ;;  %v1399_v18 = vadd.f32 1.0, %v10307_v13  ;;  %v11238_v19 = vadd.f32 %v9564_v52, %v11195_v30  ;;  %v9566_v21 = vadd.f32 %v1303_v51, %v11181_v8  ;;  %v1305_v4 = vpop.f32.mrb[11].mxu0 }
 0x146   :  { %v10311_v23 = vpop.eup %10310  ;;  %10320 = vrcp.f32 %v1398_v15  ;;  %v1400_v39 = vadd.f32 1.0, %v10309_v17  ;;  %v11242_v20 = vadd.f32 %v9565_v41, %v11200_v26  ;;  %v9567_v27 = vadd.f32 %v1305_v4, %v11183_v25  ;;  %13978 = vst [vmem:[#allocation10_spill] sm:$0xff] %v11268_v14 }
 0x147   :  { %10322 = vrcp.f32 %v1399_v18  ;;  %v1401_v29 = vadd.f32 1.0, %v10311_v23  ;;  %v8340_v22 = vmul.f32 -1.442695, %v11238_v19  ;;  %v11247_v32 = vadd.f32 %v9566_v21, %v11195_v30 }
 0x148   :  { %10324 = vrcp.f32 %v1400_v39  ;;  %v8341_v33 = vmul.f32 -1.442695, %v11242_v20  ;;  %v11251_v8 = vadd.f32 %v9567_v27, %v11200_v26 }
 0x149   :  { %10326 = vrcp.f32 %v1401_v29  ;;  %v8342_v34 = vmul.f32 -1.442695, %v11247_v32 }
 0x14a   :  { %10328 = vpow2.f32 %v8340_v22  ;;  %v8343_v25 = vmul.f32 -1.442695, %v11251_v8  ;;  %v1309_v49 = vpop.f32.mrb[16].mxu0 }
 0x14b   :  { %v10313_v42 = vpop.eup %10312  ;;  %10330 = vpow2.f32 %v8341_v33  ;;  %v1328_v44 = vadd.f32 %v1309_v49, %v11197_v3  ;;  %v1311_v54 = vpop.f32.mrb[17].mxu0 }
 0x14c   :  { %v10315_v57 = vpop.eup %10314  ;;  %v1402_v43 = vadd.f32 1.0, %v10313_v42  ;;  %10332 = vpow2.f32 %v8342_v34  ;;  %v1329_v45 = vadd.f32 %v1311_v54, %v11202_v16  ;;  %v1313_v58 = vpop.f32.mrb[18].mxu0 }
 0x14d   :  { %v10317_v56 = vpop.eup %10316  ;;  %v1403_v40 = vadd.f32 1.0, %v10315_v57  ;;  %10334 = vpow2.f32 %v8343_v25  ;;  %v11258_v61 = vadd.f32 %v11195_v30, %v1328_v44  ;;  %v1314_v63 = vpop.f32.mrb[19].mxu0 }
 0x14e   :  { %v10319_v1 = vpop.eup %10318  ;;  %10336 = vrcp.f32 %v1402_v43  ;;  %v1404_v2 = vadd.f32 1.0, %v10317_v56  ;;  %v11261_v3 = vadd.f32 %v11200_v26, %v1329_v45 }
 0x14f   :  { %10338 = vrcp.f32 %v1403_v40  ;;  %v1405_v5 = vadd.f32 1.0, %v10319_v1  ;;  %v8344_v6 = vmul.f32 -1.442695, %v11258_v61 }
 0x150   :  { %v10321_v16 = vpop.eup %10320  ;;  %10340 = vrcp.f32 %v1404_v2  ;;  %v8345_v10 = vmul.f32 -1.442695, %v11261_v3 }
 0x151   :  { %v10323_v48 = vpop.eup %10322  ;;  %v1440_v30 = vmul.f32 %v10321_v16, %v11205_v50  ;;  %10342 = vrcp.f32 %v1405_v5 }
 0x152   :  { %v10325_v11 = vpop.eup %10324  ;;  %v1441_v62 = vmul.f32 %v10323_v48, %v11208_v37  ;;  %10344 = vpow2.f32 %v8344_v6 }
 0x153   :  { %v10327_v26 = vpop.eup %10326  ;;  %v1442_v47 = vmul.f32 %v10325_v11, %v11212_v55  ;;  %10346 = vpow2.f32 %v8345_v10 }
 0x154   :  { %v10329_v12 = vpop.eup %10328  ;;  %v1468_v52 = vcombine.low %v1440_v30, %v1441_v62  ;;  %v1469_v53 = vcombine.high %v1440_v30, %v1441_v62  ;;  %v1443_v13 = vmul.f32 %v10327_v26, %v11216_v46 }
 0x155   :  { %v10331_v15 = vpop.eup %10330  ;;  %v1406_v41 = vadd.f32 1.0, %v10329_v12 }
 0x156   :  { %v10333_v50 = vpop.eup %10332  ;;  %v1476_v51 = vrot.slane %v1468_v52, %v11268_v14  ;;  %v1483_v37 = vrot.slane %v1469_v53, %v11268_v14  ;;  %v1486_v17 = vcombine.low %v1442_v47, %v1443_v13  ;;  %v1487_v18 = vcombine.high %v1442_v47, %v1443_v13 }
 0x157   :  { %v10335_v21 = vpop.eup %10334  ;;  %10348 = vrcp.f32 %v1406_v41  ;;  %v1407_v4 = vadd.f32 1.0, %v10331_v15  ;;  %v1408_v23 = vadd.f32 1.0, %v10333_v50 }
 0x158   :  { %v10337_v55 = vpop.eup %10336  ;;  %v1484_v39 = vcombine.high %v1476_v51, %v1476_v51  ;;  %v1485_v27 = vcombine.high %v1483_v37, %v1483_v37  ;;  %v1494_v29 = vrot.slane %v1486_v17, %v11268_v14  ;;  %v1501_v46 = vrot.slane %v1487_v18, %v11268_v14 }
 0x159   :  { %v10339_v22 = vpop.eup %10338  ;;  %v1444_v33 = vmul.f32 %v10337_v55, %v11221_v60  ;;  %10350 = vrcp.f32 %v1407_v4  ;;  %v1409_v34 = vadd.f32 1.0, %v10335_v21 }
 0x15a   :  { %v10341_v35 = vpop.eup %10340  ;;  %v1585_v38 = vcombine.low %v1476_v51, %v1484_v39  ;;  %v1586_v25 = vcombine.low %v1483_v37, %v1485_v27  ;;  %v1502_v49 = vcombine.high %v1494_v29, %v1494_v29  ;;  %v1503_v42 = vcombine.high %v1501_v46, %v1501_v46 }
 0x15b   :  { %v10343_v44 = vpop.eup %10342  ;;  %v1445_v54 = vmul.f32 %v10339_v22, %v11224_v9  ;;  %v1446_v57 = vmul.f32 %v10341_v35, %v11228_v59  ;;  %10352 = vrcp.f32 %v1408_v23 }
 0x15c   :  { %v10345_v43 = vpop.eup %10344  ;;  %v1603_v45 = vcombine.low %v1494_v29, %v1502_v49  ;;  %v1604_v58 = vcombine.low %v1501_v46, %v1503_v42  ;;  %v1447_v56 = vmul.f32 %v10343_v44, %v11232_v31  ;;  %10354 = vrcp.f32 %v1409_v34 }
 0x15d   :  { %v10347_v60 = vpop.eup %10346  ;;  %v1504_v40 = vcombine.low %v1444_v33, %v1445_v54  ;;  %v1505_v63 = vcombine.high %v1444_v33, %v1445_v54  ;;  %v1410_v1 = vadd.f32 1.0, %v10345_v43  ;;  %v1593_v36 = vrot.slane %v1585_v38, %v11268_v14 }
 0x15e   :  { %v1522_v2 = vcombine.low %v1446_v57, %v1447_v56  ;;  %v1523_v5 = vcombine.high %v1446_v57, %v1447_v56  ;;  %v1411_v6 = vadd.f32 1.0, %v10347_v60  ;;  %v1600_v9 = vrot.slane %v1586_v25, %v11268_v14 }
 0x15f   :  { %v1512_v59 = vrot.slane %v1504_v40, %v11268_v14  ;;  %v1519_v16 = vrot.slane %v1505_v63, %v11268_v14  ;;  %10356 = vrcp.f32 %v1410_v1  ;;  %v1611_v31 = vrot.slane %v1603_v45, %v11268_v14 }
 0x160   :  { %v1530_v10 = vrot.slane %v1522_v2, %v11268_v14  ;;  %v1537_v48 = vrot.slane %v1523_v5, %v11268_v14  ;;  %10358 = vrcp.f32 %v1411_v6  ;;  %v1601_v30 = vcombine.low %v1593_v36, %v1600_v9 }
 0x161   :  { %v10349_v11 = vpop.eup %10348  ;;  %v1520_v62 = vcombine.high %v1512_v59, %v1512_v59  ;;  %v1521_v26 = vcombine.high %v1519_v16, %v1519_v16  ;;  %v1602_v47 = vcombine.high %v1593_v36, %v1600_v9  ;;  %v1618_v12 = vrot.slane %v1604_v58, %v11268_v14  ;;  %v9765_v58 = vld [vmem:[%s13907_s3 + $0x290] ss:$12 sps:$4 sm:$0xff]  }
 0x162   :  { %v1538_v52 = vcombine.high %v1530_v10, %v1530_v10  ;;  %v1539_v53 = vcombine.high %v1537_v48, %v1537_v48  ;;  %v1645_v13 = vrot.slane %v1530_v10, %v11268_v14  ;;  %v1448_v15 = vmul.f32 %v10349_v11, %v11238_v19  ;;  %v9761_v19 = vld [vmem:[%s13907_s3 + $0x278] ss:$12 sps:$4 sm:$0xff]  }
 0x163   :  { %v10351_v41 = vpop.eup %10350  ;;  %v1621_v50 = vcombine.low %v1512_v59, %v1520_v62  ;;  %v1622_v51 = vcombine.low %v1519_v16, %v1521_v26  ;;  %v1619_v37 = vcombine.low %v1611_v31, %v1618_v12  ;;  %v1620_v17 = vcombine.high %v1611_v31, %v1618_v12 }
 0x164   :  { %v1646_v18 = vcombine.high %v1645_v13, %v1645_v13  ;;  %v1647_v21 = vcombine.low %v1538_v52, %v1537_v48  ;;  %v1449_v4 = vmul.f32 %v10351_v41, %v11242_v20  ;;  %v11291_v23 = vpack.c.bf16 %v1602_v47, %v1601_v30 }
 0x165   :  { %v10353_v55 = vpop.eup %10352  ;;  %v11293_v39 = vpack.c.bf16 %v1620_v17, %v1602_v47  ;;  %v11295_v27 = vpack.c.bf16 %v1620_v17, %v1619_v37  ;;  %v11297_v29 = vpack.c.bf16 %v1619_v37, %v1601_v30  ;;  %v1629_v46 = vrot.slane %v1621_v50, %v11268_v14 }
 0x166   :  { %v10355_v22 = vpop.eup %10354  ;;  %v1655_v20 = vrot.slane %v1647_v21, %v11268_v14  ;;  %v11304_v33 = vpack.c.bf16 %v1646_v18, %v1645_v13  ;;  %v1540_v34 = vcombine.low %v1448_v15, %v1449_v4  ;;  %v1541_v35 = vcombine.high %v1448_v15, %v1449_v4 }
 0x167   :  { %v1450_v38 = vmul.f32 %v10353_v55, %v11247_v32  ;;  %v1451_v25 = vmul.f32 %v10355_v22, %v11251_v8  ;;  %8501 = vmatprep.mubr.msk.bf16.mxu0 %vm2170_vm1, %v11293_v39  ;;  %v1636_v49 = vrot.slane %v1622_v51, %v11268_v14  ;;  %v1821_v42 = vshrl.u32 %v11291_v23, 16 }
 0x168   :  { %v1548_v44 = vrot.slane %v1540_v34, %v11268_v14  ;;  %v1555_v54 = vrot.slane %v1541_v35, %v11268_v14  ;;  %2622 = vmatmul.mubr.bf16.vlgmr.msra.gmra.mrb[20].mxu0 %v11297_v29  ;;  %v1824_v57 = vshll.u32 %v11291_v23, 16  ;;  %v1830_v43 = vshll.u32 %v11295_v27, 16 }
 0x169   :  { %v10357_v32 = vpop.eup %10356  ;;  %v1558_v45 = vcombine.low %v1450_v38, %v1451_v25  ;;  %v1559_v8 = vcombine.high %v1450_v38, %v1451_v25  ;;  %3024 = vmatpush1.bf16.msra.mxu0 %v9761_v19  ;;  %v1637_v56 = vcombine.low %v1629_v46, %v1636_v49  ;;  %v1638_v60 = vcombine.high %v1629_v46, %v1636_v49 }
 0x16a   :  { %v10359_v40 = vpop.eup %10358  ;;  %v1556_v63 = vcombine.high %v1548_v44, %v1548_v44  ;;  %v1557_v1 = vcombine.high %v1555_v54, %v1555_v54  ;;  %v1648_v36 = vcombine.low %v1539_v53, %v1548_v44  ;;  %v1452_v2 = vmul.f32 %v10357_v32, %v11258_v61  ;;  %3025 = vmatprep.subr.bf16.mxu0 %v13918_v0  ;;  %v9769_v61 = vld [vmem:[%s13907_s3 + $0x2a8] ss:$12 sps:$4 sm:$0xff]  }
 0x16b   :  { %v1566_v5 = vrot.slane %v1558_v45, %v11268_v14  ;;  %v1573_v6 = vrot.slane %v1559_v8, %v11268_v14  ;;  %v1453_v9 = vmul.f32 %v10359_v40, %v11261_v3  ;;  %v11325_v59 = vpack.c.bf16 %v1638_v60, %v1637_v56 }
 0x16c   :  { %v1662_v16 = vrot.slane %v1648_v36, %v11268_v14  ;;  %v1665_v31 = vcombine.low %v1556_v63, %v1555_v54  ;;  %v1823_v10 = vrot.slane %v1821_v42, 4  ;;  %v1826_v48 = vrot.slane %v1824_v57, 5 }
 0x16d   :  { %v1574_v30 = vcombine.high %v1566_v5, %v1566_v5  ;;  %v1575_v11 = vcombine.high %v1573_v6, %v1573_v6  ;;  %v1666_v62 = vcombine.low %v1557_v1, %v1566_v5  ;;  %v1576_v26 = vcombine.low %v1452_v2, %v1453_v9  ;;  %3026 = vmatpush1.bf16.msra.mxu0 %v9765_v58 }
 0x16e   :  { %v1673_v47 = vrot.slane %v1665_v31, %v11268_v14  ;;  %3027 = vmatprep.subr.bf16.mxu0 %v13918_v0  ;;  %v1664_v3 = vcombine.high %v1655_v20, %v1662_v16  ;;  %v1827_v12 = vor.u32 %v1826_v48, %v1823_v10  ;;  %v1832_v52 = vrot.slane %v1830_v43, 5 }
 0x16f   :  { %v1680_v53 = vrot.slane %v1666_v62, %v11268_v14  ;;  %v1683_v13 = vcombine.low %v1574_v30, %v1573_v6  ;;  %v1583_v15 = vrot.slane %v1576_v26, %v11268_v14  ;;  %v13979_v41 = vmov 0 }
 0x170   :  { %v13980_v41 = vsel %vm11337_vm4, 4294967295, %v13979_v41  ;;  %v1834_v50 = vshrl.u32 %v11295_v27, 16  ;;  %v11342_v51 = vpack.c.bf16 %v1664_v3, %v1638_v60  ;;  %v1828_v37 = vrot.slane %v1827_v12, 4 }
 0x171   :  { %13981 = vst [vmem:[#allocation11_spill] sm:$0xff] %v13980_v41  ;;  %v1840_v17 = vshll.u32 %v11325_v59, 16  ;;  %v11345_v18 = vcombine.low %v1655_v20, %v1662_v16  ;;  %v1681_v21 = vcombine.low %v1673_v47, %v1680_v53  ;;  %v1682_v4 = vcombine.high %v1673_v47, %v1680_v53  ;;  %3028 = vmatpush1.bf16.msra.mxu0 %v9769_v61  ;;  %v9770_v20 = vld [vmem:[%s13907_s3 + $0x2c0] ss:$12 sps:$4 sm:$0xff]   ;;  %v9774_v61 = vld [vmem:[%s13907_s3 + $0x2f0] ss:$12 sps:$4 sm:$0xff]  }
 0x172   :  { %v1691_v55 = vrot.slane %v1683_v13, %v11268_v14  ;;  %v1584_v19 = vcombine.high %v1583_v15, %v1583_v15  ;;  %v1684_v46 = vcombine.low %v1575_v11, %v1583_v15  ;;  %8502 = vmatprep.mubr.msk.bf16.mxu0 %vm2170_vm1, %v11342_v51  ;;  %3029 = vmatprep.subr.bf16.mxu0 %v13918_v0  ;;  %v1836_v34 = vrot.slane %v1834_v50, 4  ;;  %v9771_v11 = vld [vmem:[%s13907_s3 + $0x140] ss:$12 sps:$4 sm:$0xff]  }
 0x173   :  { %v1833_v22 = vsel %vm11337_vm4, %v1828_v37, %v1832_v52  ;;  %v1842_v35 = vrot.slane %v1840_v17, 5  ;;  %v11356_v38 = vpack.c.bf16 %v1682_v4, %v1681_v21  ;;  %v11360_v49 = vpack.c.bf16 %v1664_v3, %v11345_v18 }
 0x174   :  { %v1707_v25 = vrot.slane %v1584_v19, %v11268_v14  ;;  %v11363_v42 = vpack.c.bf16 %v11345_v18, %v1637_v56  ;;  %v1698_v44 = vrot.slane %v1684_v46, %v11268_v14  ;;  %v1837_v54 = vor.u32 %v1836_v34, %v1832_v52  ;;  %v9772_v56 = vld [vmem:[%s13907_s3 + $0x2d8] ss:$12 sps:$4 sm:$0xff]  }
 0x175   :  { %v1844_v57 = vshrl.u32 %v11325_v59, 16  ;;  %v1850_v43 = vshll.u32 %v11304_v33, 16  ;;  %v1855_v32 = vshrl.u32 %v11360_v49, 16  ;;  %v1858_v45 = vshll.u32 %v11360_v49, 16  ;;  %3030 = vmatpush1.bf16.msra.mxu0 %v9770_v20 }
 0x176   :  { %2630 = vmatmul.mubr.bf16.gmra.mrb[24].mxu0 %v11363_v42  ;;  %v1864_v8 = vshll.u32 %v11356_v38, 16  ;;  %v1708_v58 = vcombine.high %v1707_v25, %v1707_v25  ;;  %v1838_v60 = vrot.slane %v1837_v54, 4  ;;  %v1700_v1 = vcombine.high %v1691_v55, %v1698_v44  ;;  %3031 = vmatprep.subr.bf16.mxu0 %v13918_v0 }
 0x177   :  { %v1846_v40 = vrot.slane %v1844_v57, 4  ;;  %v1852_v63 = vrot.slane %v1850_v43, 5  ;;  %v1857_v36 = vrot.slane %v1855_v32, 4  ;;  %v1860_v2 = vrot.slane %v1858_v45, 5 }
 0x178   :  { %v11376_v5 = vrot.slane %v1864_v8, 5  ;;  %v1730_v6 = vpack.c.bf16 %v1682_v4, %v1664_v3  ;;  %v1843_v9 = vsel %vm11337_vm4, %v1838_v60, %v1842_v35  ;;  %v1732_v31 = vpack.c.bf16 %v1708_v58, %v1700_v1 }
 0x179   :  { %v1847_v16 = vor.u32 %v1846_v40, %v1842_v35  ;;  %v11380_v10 = vpack.c.bf16 %v1708_v58, %v1707_v25  ;;  %v11382_v48 = vcombine.low %v1833_v22, %v1843_v9  ;;  %v11384_v30 = vcombine.high %v1833_v22, %v1843_v9  ;;  %3032 = vmatpush1.bf16.msra.mxu0 %v9772_v56  ;;  %v9775_v58 = vld [vmem:[%s13907_s3 + $0x170] ss:$12 sps:$4 sm:$0xff]  }
 0x17a   :  { %v1861_v62 = vor.u32 %v1860_v2, %v1857_v36  ;;  %v1750_v26 = vunpack.c.h.b16 %v1730_v6  ;;  %v1752_v3 = vunpack.c.l.b16 %v1732_v31  ;;  %v1699_v12 = vcombine.low %v1691_v55, %v1698_v44  ;;  %3033 = vmatprep.subr.bf16.mxu0 %v13918_v0  ;;  %v9773_v55 = vld [vmem:[%s13907_s3 + $0x158] ss:$12 sps:$4 sm:$0xff]   ;;  %v9778_v6 = vld [vmem:[%s13907_s3 + $0x320] ss:$12 sps:$4 sm:$0xff]  }
 0x17b   :  { %v1848_v47 = vrot.slane %v1847_v16, 4  ;;  %v1729_v52 = vpack.c.bf16 %v1681_v21, %v11345_v18  ;;  %v13982_v53 = vmov 0  ;;  %8451 = vmatprep.mubr.msk.bf16.mxu1 %vm2170_vm1, %v11384_v30  ;;  %v8504_v15 = vrot.slane %v11291_v23, 9 }
 0x17c   :  { %v13983_v53 = vsel %vm11395_vm7, 4294967295, %v13982_v53  ;;  %v1862_v13 = vrot.slane %v1861_v62, 4  ;;  %v2651_v50 = vrot.slane %v11295_v27, 5  ;;  %v2654_v37 = vrot.slane %v11325_v59, 5  ;;  %2213 = vmatmul.mubr.bf16.vlgmr.msra.gmra.mrb[16].mxu1 %v11382_v48  ;;  %v9777_v62 = vld [vmem:[%s13907_s3 + $0x188] ss:$12 sps:$4 sm:$0xff]  }
 0x17d   :  { %13984 = vst [vmem:[#allocation12_spill] sm:$0xff] %v13983_v53  ;;  %v1853_v17 = vsel %vm11337_vm4, %v1848_v47, %v1852_v63  ;;  %v11408_v18 = vpack.c.b16 %v1752_v3, %v1750_v26  ;;  %v1731_v21 = vpack.c.bf16 %v1707_v25, %v1699_v12  ;;  %v1749_v4 = vunpack.c.h.b16 %v1729_v52  ;;  %2244 = vmatpush1.bf16.msra.mxu1 %v9771_v11  ;;  %v9776_v25 = vld [vmem:[%s13907_s3 + $0x308] ss:$12 sps:$4 sm:$0xff]  }
 0x17e   :  { %v1867_v23 = vsel %vm11337_vm4, %v1862_v13, %v11376_v5  ;;  %v9341_v27 = vpack.c.bf16 %v1700_v1, %v1699_v12  ;;  %v2652_v59 = vsel %vm11395_vm7, %v8504_v15, %v2651_v50  ;;  %v2653_v19 = vrot.slane %v2651_v50, 4  ;;  %2245 = vmatprep.subr.bf16.mxu1 %v13918_v0  ;;  %3034 = vmatpush1.bf16.msra.mxu0 %v9774_v61  ;;  %v9780_v13 = vld [vmem:[%s13907_s3 + $0x338] ss:$12 sps:$4 sm:$0xff]  }
 0x17f   :  { %v11419_v46 = vcombine.high %v1853_v17, %v1867_v23  ;;  %v11421_v22 = vcombine.low %v1853_v17, %v1867_v23  ;;  %v1751_v34 = vunpack.c.l.b16 %v1731_v21  ;;  %v1868_v35 = vshrl.u32 %v11356_v38, 16  ;;  %8503 = vmatprep.mubr.msk.bf16.mxu0 %vm2170_vm1, %v11408_v18  ;;  %3035 = vmatprep.subr.bf16.mxu0 %v13918_v0  ;;  %v9781_v23 = vld [vmem:[%s13907_s3 + $0x1b8] ss:$12 sps:$4 sm:$0xff]  }
 0x180   :  { %v1878_v20 = vshrl.u32 %v9341_v27, 16  ;;  %v2655_v44 = vsel %vm11395_vm7, %v2653_v19, %v2654_v37  ;;  %v1874_v54 = vshll.u32 %v9341_v27, 16  ;;  %v1884_v57 = vshll.u32 %v11380_v10, 16  ;;  %v9785_v19 = vld [vmem:[%s13907_s3 + $0x1e8] ss:$12 sps:$4 sm:$0xff]  }
 0x181   :  { %8452 = vmatprep.mubr.msk.bf16.mxu1 %vm2170_vm1, %v11419_v46  ;;  %v11435_v43 = vpack.c.b16 %v1751_v34, %v1749_v4  ;;  %v11437_v32 = vcombine.low %v2652_v59, %v2655_v44  ;;  %v11439_v45 = vcombine.high %v2652_v59, %v2655_v44  ;;  %v1870_v8 = vrot.slane %v1868_v35, 4  ;;  %2246 = vmatpush1.bf16.msra.mxu1 %v9773_v55  ;;  %v9779_v4 = vld [vmem:[%s13907_s3 + $0x1a0] ss:$12 sps:$4 sm:$0xff]   ;;  %v9782_v55 = vld [vmem:[%s13907_s3 + $0x350] ss:$12 sps:$4 sm:$0xff]  }
 0x182   :  { %v1876_v60 = vrot.slane %v1874_v54, 5  ;;  %v1880_v56 = vrot.slane %v1878_v20, 4  ;;  %v2656_v40 = vrot.slane %v2654_v37, 4  ;;  %2247 = vmatprep.subr.bf16.mxu1 %v13918_v0  ;;  %v2657_v1 = vrot.slane %v11304_v33, 5  ;;  %3036 = vmatpush1.bf16.msra.mxu0 %v9776_v25  ;;  %v9783_v59 = vld [vmem:[%s13907_s3 + $0x1d0] ss:$12 sps:$4 sm:$0xff]  }
 0x183   :  { %2638 = vmatmul.mubr.bf16.gmra.mrb[28].mxu0 %v11435_v43  ;;  %v1871_v63 = vor.u32 %v1870_v8, %v11376_v5  ;;  %v8505_v36 = vrot.slane %v11360_v49, 9  ;;  %v2661_v2 = vrot.slane %v11356_v38, 5  ;;  %v1886_v16 = vrot.slane %v1884_v57, 5  ;;  %3037 = vmatprep.subr.bf16.mxu0 %v13918_v0  ;;  %v9788_v34 = vld [vmem:[%s13907_s3 + $0x398] ss:$12 sps:$4 sm:$0xff]  }
 0x184   :  { %8606 = vmatprep.mubr.msk.bf16.mxu0 %vm2170_vm1, %v11439_v45  ;;  %v1881_v9 = vor.u32 %v1880_v56, %v1876_v60  ;;  %v2664_v31 = vrot.slane %v9341_v27, 5  ;;  %v2667_v11 = vrot.slane %v11380_v10, 5  ;;  %2223 = vmatmul.mubr.bf16.gmra.mrb[20].mxu1 %v11421_v22  ;;  %v2658_v38 = vsel %vm11395_vm7, %v2656_v40, %v2657_v1  ;;  %v9784_v27 = vld [vmem:[%s13907_s3 + $0x368] ss:$12 sps:$4 sm:$0xff]   ;;  %v9787_v35 = vld [vmem:[%s13907_s3 + $0x200] ss:$12 sps:$4 sm:$0xff]  }
 0x185   :  { %v1872_v33 = vrot.slane %v1871_v63, 4  ;;  %v2662_v49 = vsel %vm11395_vm7, %v8505_v36, %v2661_v2  ;;  %v2663_v5 = vrot.slane %v2661_v2, 4  ;;  %2248 = vmatpush1.bf16.msra.mxu1 %v9775_v58  ;;  %v9789_v20 = vld [vmem:[%s13907_s3 + $0x218] ss:$12 sps:$4 sm:$0xff]   ;;  %v9790_v25 = vld [vmem:[%s13907_s3 + $0x230] ss:$12 sps:$4 sm:$0xff]  }
 0x186   :  { %v1882_v26 = vrot.slane %v1881_v9, 4  ;;  %v11465_v61 = vcombine.high %v2658_v38, %v2662_v49  ;;  %v11467_v10 = vcombine.low %v2658_v38, %v2662_v49  ;;  %v2666_v47 = vrot.slane %v2664_v31, 4  ;;  %2249 = vmatprep.subr.bf16.mxu1 %v13918_v0  ;;  %3038 = vmatpush1.bf16.msra.mxu0 %v9778_v6  ;;  %v9791_v44 = vld [vmem:[%s13907_s3 + $0x248] ss:$12 sps:$4 sm:$0xff]   ;;  %v9792_v54 = vld [vmem:[%s13907_s3 + $0x260] ss:$12 sps:$4 sm:$0xff]  }
 0x187   :  { %v1877_v3 = vsel %vm11337_vm4, %v1872_v33, %v1876_v60  ;;  %v2665_v12 = vsel %vm11395_vm7, %v2663_v5, %v2664_v31  ;;  %3039 = vmatprep.subr.bf16.mxu0 %v13918_v0  ;;  %v9795_v57 = vld [vmem:[%s13907_s3 + $0x4] ss:$12 sps:$4 sm:$0xff]   ;;  %v9793_v8 = vld [vmem:[%s13907_s3] ss:$12 sps:$4 sm:$0xff]   ;;  %v9798_v58 = vld [vmem:[%s13907_s3 + $0x1c] ss:$12 sps:$4 sm:$0xff]  }
 0x188   :  { %v1887_v52 = vsel %vm11337_vm4, %v1882_v26, %v1886_v16  ;;  %v2668_v15 = vsel %vm11395_vm7, %v2666_v47, %v2667_v11  ;;  %v9796_v60 = vld [vmem:[%s13907_s3 + $0x18] ss:$12 sps:$4 sm:$0xff]   ;;  %v9801_v56 = vld [vmem:[%s13907_s3 + $0x34] ss:$12 sps:$4 sm:$0xff]   ;;  %v9799_v40 = vld [vmem:[%s13907_s3 + $0x30] ss:$12 sps:$4 sm:$0xff]  }
 0x189   :  { %v11481_v50 = vcombine.high %v1877_v3, %v1887_v52  ;;  %v11483_v37 = vcombine.low %v1877_v3, %v1887_v52  ;;  %v11486_v17 = vcombine.high %v2665_v12, %v2668_v15  ;;  %v11488_v21 = vcombine.low %v2665_v12, %v2668_v15  ;;  %2250 = vmatpush1.bf16.msra.mxu1 %v9777_v62  ;;  %v9807_v63 = vld [vmem:[%s13907_s3 + $0x64] ss:$12 sps:$4 sm:$0xff]   ;;  %v9805_v1 = vld [vmem:[%s13907_s3 + $0x60] ss:$12 sps:$4 sm:$0xff]   ;;  %v9822_v11 = vld [vmem:[%s13907_s3 + $0xdc] ss:$12 sps:$4 sm:$0xff]  }
 0x18a   :  { %2251 = vmatprep.subr.bf16.mxu1 %v13918_v0  ;;  %3040 = vmatpush1.bf16.msra.mxu0 %v9780_v13  ;;  %v9808_v36 = vld [vmem:[%s13907_s3 + $0x78] ss:$12 sps:$4 sm:$0xff]   ;;  %v9813_v2 = vld [vmem:[%s13907_s3 + $0x94] ss:$12 sps:$4 sm:$0xff]   ;;  %v9811_v6 = vld [vmem:[%s13907_s3 + $0x90] ss:$12 sps:$4 sm:$0xff]  }
 0x18b   :  { %8453 = vmatprep.mubr.msk.bf16.mxu1 %vm2170_vm1, %v11481_v50  ;;  %3041 = vmatprep.subr.bf16.mxu0 %v13918_v0  ;;  %v9816_v9 = vld [vmem:[%s13907_s3 + $0xac] ss:$12 sps:$4 sm:$0xff]   ;;  %v9819_v16 = vld [vmem:[%s13907_s3 + $0xc4] ss:$12 sps:$4 sm:$0xff]   ;;  %v9825_v38 = vld [vmem:[%s13907_s3 + $0xf4] ss:$12 sps:$4 sm:$0xff]  }
 0x18c   :  { %2233 = vmatmul.mubr.bf16.gmra.mrb[24].mxu1 %v11483_v37  ;;  %v9817_v31 = vld [vmem:[%s13907_s3 + $0xc0] ss:$12 sps:$4 sm:$0xff]   ;;  %v9820_v33 = vld [vmem:[%s13907_s3 + $0xd8] ss:$12 sps:$4 sm:$0xff]   ;;  %v9823_v49 = vld [vmem:[%s13907_s3 + $0xf0] ss:$12 sps:$4 sm:$0xff]  }
 0x18d   :  { %2252 = vmatpush1.bf16.msra.mxu1 %v9779_v4  ;;  %8454 = vmatprep.mubr.msk.bf16.mxu1 %vm2170_vm1, %v11384_v30  ;;  %v9786_v30 = vld [vmem:[%s13907_s3 + $0x380] ss:$12 sps:$4 sm:$0xff]   ;;  %v9826_v62 = vld [vmem:[%s13907_s3 + $0x108] ss:$12 sps:$4 sm:$0xff]   ;;  %v9831_v26 = vld [vmem:[%s13907_s3 + $0x124] ss:$12 sps:$4 sm:$0xff]  }
 0x18e   :  { %2253 = vmatprep.subr.bf16.mxu1 %v13918_v0  ;;  %3042 = vmatpush1.bf16.msra.mxu0 %v9782_v55  ;;  %v9828_v5 = vld [vmem:[%s13907_s3 + $0x10c] ss:$12 sps:$4 sm:$0xff]   ;;  %v9834_v3 = vld [vmem:[%s13907_s3 + $0x274] ss:$12 sps:$4 sm:$0xff]   ;;  %v9832_v12 = vld [vmem:[%s13907_s3 + $0x270] ss:$12 sps:$4 sm:$0xff]  }
 0x18f   :  { %3043 = vmatprep.subr.bf16.mxu0 %v13918_v0  ;;  %v9829_v47 = vld [vmem:[%s13907_s3 + $0x120] ss:$12 sps:$4 sm:$0xff]   ;;  %v9835_v13 = vld [vmem:[%s13907_s3 + $0x288] ss:$12 sps:$4 sm:$0xff]   ;;  %v9840_v15 = vld [vmem:[%s13907_s3 + $0x2a4] ss:$12 sps:$4 sm:$0xff]  }
 0x190   :  { %v9837_v52 = vld [vmem:[%s13907_s3 + $0x28c] ss:$12 sps:$4 sm:$0xff]   ;;  %v9844_v4 = vld [vmem:[%s13907_s3 + $0x2d0] ss:$12 sps:$4 sm:$0xff]  }
 0x191   :  { %2254 = vmatpush1.bf16.msra.mxu1 %v9781_v23  ;;  %v9852_v55 = vld [vmem:[%s13907_s3 + $0x304] ss:$12 sps:$4 sm:$0xff]   ;;  %v9850_v23 = vld [vmem:[%s13907_s3 + $0x300] ss:$12 sps:$4 sm:$0xff]  }
 0x192   :  { %2255 = vmatprep.subr.bf16.mxu1 %v13918_v0  ;;  %3044 = vmatpush1.bf16.msra.mxu0 %v9784_v27  ;;  %v9858_v27 = vld [vmem:[%s13907_s3 + $0x334] ss:$12 sps:$4 sm:$0xff]  }
 0x193   :  { %3045 = vmatprep.subr.bf16.mxu0 %v13918_v0 }
 0x195   :  { %2256 = vmatpush1.bf16.msra.mxu1 %v9783_v59  ;;  %v9856_v59 = vld [vmem:[%s13907_s3 + $0x330] ss:$12 sps:$4 sm:$0xff]  }
 0x196   :  { %2257 = vmatprep.subr.bf16.mxu1 %v13918_v0  ;;  %3046 = vmatpush1.bf16.msra.mxu0 %v9786_v30  ;;  %v9861_v30 = vld [vmem:[%s13907_s3 + $0x34c] ss:$12 sps:$4 sm:$0xff]  }
 0x197   :  { %3047 = vmatprep.subr.bf16.mxu0 %v13918_v0 }
 0x199   :  { %2258 = vmatpush1.bf16.msra.mxu1 %v9785_v19  ;;  %v9859_v19 = vld [vmem:[%s13907_s3 + $0x348] ss:$12 sps:$4 sm:$0xff]  }
 0x19a   :  { %2259 = vmatprep.subr.bf16.mxu1 %v13918_v0  ;;  %3048 = vmatpush1.bf16.msra.mxu0 %v9788_v34  ;;  %v9864_v34 = vld [vmem:[%s13907_s3 + $0x364] ss:$12 sps:$4 sm:$0xff]  }
 0x19d   :  { %2260 = vmatpush1.bf16.msra.mxu1 %v9787_v35  ;;  %3056 = vmatmul.mubr.bf16.vlgmr.msra.gmra.mrb[32].mxu0 %v11437_v32  ;;  %v9862_v35 = vld [vmem:[%s13907_s3 + $0x360] ss:$12 sps:$4 sm:$0xff]  }
 0x19e   :  { %2261 = vmatprep.subr.bf16.mxu1 %v13918_v0  ;;  %8607 = vmatprep.mubr.msk.bf16.mxu0 %vm2170_vm1, %v11465_v61 }
 0x1a1   :  { %2262 = vmatpush1.bf16.msra.mxu1 %v9789_v20  ;;  %v9867_v20 = vld [vmem:[%s13907_s3 + $0x37c] ss:$12 sps:$4 sm:$0xff]  }
 0x1a2   :  { %2263 = vmatprep.subr.bf16.mxu1 %v13918_v0 }
 0x1a5   :  { %2264 = vmatpush1.bf16.msra.mxu1 %v9790_v25  ;;  %3064 = vmatmul.mubr.bf16.gmra.mrb[36].mxu0 %v11467_v10  ;;  %v9865_v25 = vld [vmem:[%s13907_s3 + $0x378] ss:$12 sps:$4 sm:$0xff]  }
 0x1a6   :  { %2265 = vmatprep.subr.bf16.mxu1 %v13918_v0  ;;  %8608 = vmatprep.mubr.msk.bf16.mxu0 %vm2170_vm1, %v11486_v17 }
 0x1a9   :  { %2266 = vmatpush1.bf16.msra.mxu1 %v9791_v44  ;;  %v9870_v44 = vld [vmem:[%s13907_s3 + $0x394] ss:$12 sps:$4 sm:$0xff]  }
 0x1aa   :  { %2267 = vmatprep.subr.bf16.mxu1 %v13918_v0 }
 0x1ad   :  { %2268 = vmatpush1.bf16.msra.mxu1 %v9792_v54  ;;  %3072 = vmatmul.mubr.bf16.gmra.mrb[40].mxu0 %v11488_v21  ;;  %v9868_v54 = vld [vmem:[%s13907_s3 + $0x390] ss:$12 sps:$4 sm:$0xff]  }
 0x1ae   :  { %2526 = vmatprep.subr.bf16.mxu1 %v9795_v57 }
 0x1b0   :  { %2276 = vmatmul.mubr.bf16.vlgmr.msra.gmra.mrb[28].mxu1 %v11382_v48  ;;  %v9804_v48 = vld [vmem:[%s13907_s3 + $0x4c] ss:$12 sps:$4 sm:$0xff]  }
 0x1b1   :  { %8455 = vmatprep.mubr.msk.bf16.mxu1 %vm2170_vm1, %v11419_v46  ;;  %2527 = vmatpush1.bf16.msra.mxu1 %v9793_v8  ;;  %v9802_v46 = vld [vmem:[%s13907_s3 + $0x48] ss:$12 sps:$4 sm:$0xff]  }
 0x1b2   :  { %2528 = vmatprep.subr.bf16.mxu1 %v9798_v58 }
 0x1b5   :  { %2529 = vmatpush1.bf16.msra.mxu1 %v9796_v60 }
 0x1b6   :  { %2530 = vmatprep.subr.bf16.mxu1 %v9801_v56 }
 0x1b8   :  { %2284 = vmatmul.mubr.bf16.gmra.mrb[32].mxu1 %v11421_v22  ;;  %v9810_v22 = vld [vmem:[%s13907_s3 + $0x7c] ss:$12 sps:$4 sm:$0xff]  }
 0x1b9   :  { %8456 = vmatprep.mubr.msk.bf16.mxu1 %vm2170_vm1, %v11481_v50  ;;  %2531 = vmatpush1.bf16.msra.mxu1 %v9799_v40  ;;  %v9838_v50 = vld [vmem:[%s13907_s3 + $0x2a0] ss:$12 sps:$4 sm:$0xff]  }
 0x1ba   :  { %2532 = vmatprep.subr.bf16.mxu1 %v9804_v48 }
 0x1bd   :  { %2533 = vmatpush1.bf16.msra.mxu1 %v9802_v46 }
 0x1be   :  { %2534 = vmatprep.subr.bf16.mxu1 %v9807_v63 }
 0x1c0   :  { %2292 = vmatmul.mubr.bf16.gmra.mrb[36].mxu1 %v11483_v37  ;;  %v9846_v37 = vld [vmem:[%s13907_s3 + $0x2d4] ss:$12 sps:$4 sm:$0xff]  }
 0x1c1   :  { %2535 = vmatpush1.bf16.msra.mxu1 %v9805_v1  ;;  %8498 = vmatprep.mubr.msk.bf16.mxu1 %vm2170_vm1, %v11293_v39  ;;  %v9814_v39 = vld [vmem:[%s13907_s3 + $0xa8] ss:$12 sps:$4 sm:$0xff]  }
 0x1c2   :  { %2536 = vmatprep.subr.bf16.mxu1 %v9810_v22 }
 0x1c5   :  { %2537 = vmatpush1.bf16.msra.mxu1 %v9808_v36 }
 0x1c6   :  { %2538 = vmatprep.subr.bf16.mxu1 %v9813_v2 }
 0x1c9   :  { %2539 = vmatpush1.bf16.msra.mxu1 %v9811_v6 }
 0x1ca   :  { %2540 = vmatprep.subr.bf16.mxu1 %v9816_v9 }
 0x1cd   :  { %2541 = vmatpush1.bf16.msra.mxu1 %v9814_v39 }
 0x1ce   :  { %2542 = vmatprep.subr.bf16.mxu1 %v9819_v16 }
 0x1d1   :  { %2543 = vmatpush1.bf16.msra.mxu1 %v9817_v31 }
 0x1d2   :  { %2544 = vmatprep.subr.bf16.mxu1 %v9822_v11 }
 0x1d5   :  { %2545 = vmatpush1.bf16.msra.mxu1 %v9820_v33 }
 0x1d6   :  { %2546 = vmatprep.subr.bf16.mxu1 %v9825_v38 }
 0x1d9   :  { %2547 = vmatpush1.bf16.msra.mxu1 %v9823_v49 }
 0x1da   :  { %2548 = vmatprep.subr.bf16.mxu1 %v9828_v5 }
 0x1dd   :  { %2549 = vmatpush1.bf16.msra.mxu1 %v9826_v62 }
 0x1de   :  { %2550 = vmatprep.subr.bf16.mxu1 %v9831_v26 }
 0x1e1   :  { %2551 = vmatpush1.bf16.msra.mxu1 %v9829_v47 }
 0x1e2   :  { %2960 = vmatprep.subr.bf16.mxu1 %v9834_v3 }
 0x1e4   :  { %2559 = vmatmul.mubr.bf16.vlgmr.msra.gmra.mrb[16].mxu1 %v11297_v29  ;;  %v9843_v29 = vld [vmem:[%s13907_s3 + $0x2bc] ss:$12 sps:$4 sm:$0xff]  }
 0x1e5   :  { %8499 = vmatprep.mubr.msk.bf16.mxu1 %vm2170_vm1, %v11342_v51  ;;  %2961 = vmatpush1.bf16.msra.mxu1 %v9832_v12  ;;  %v9841_v51 = vld [vmem:[%s13907_s3 + $0x2b8] ss:$12 sps:$4 sm:$0xff]  }
 0x1e6   :  { %2962 = vmatprep.subr.bf16.mxu1 %v9837_v52 }
 0x1e9   :  { %2963 = vmatpush1.bf16.msra.mxu1 %v9835_v13 }
 0x1ea   :  { %2964 = vmatprep.subr.bf16.mxu1 %v9840_v15 }
 0x1ec   :  { %2569 = vmatmul.mubr.bf16.gmra.mrb[20].mxu1 %v11363_v42  ;;  %v9849_v42 = vld [vmem:[%s13907_s3 + $0x2ec] ss:$12 sps:$4 sm:$0xff]  }
 0x1ed   :  { %8500 = vmatprep.mubr.msk.bf16.mxu1 %vm2170_vm1, %v11408_v18  ;;  %2965 = vmatpush1.bf16.msra.mxu1 %v9838_v50  ;;  %v9847_v18 = vld [vmem:[%s13907_s3 + $0x2e8] ss:$12 sps:$4 sm:$0xff]  }
 0x1ee   :  { %2966 = vmatprep.subr.bf16.mxu1 %v9843_v29 }
 0x1f1   :  { %2967 = vmatpush1.bf16.msra.mxu1 %v9841_v51 }
 0x1f2   :  { %2968 = vmatprep.subr.bf16.mxu1 %v9846_v37 }
 0x1f4   :  { %2579 = vmatmul.mubr.bf16.gmra.mrb[24].mxu1 %v11435_v43  ;;  %v9855_v43 = vld [vmem:[%s13907_s3 + $0x31c] ss:$12 sps:$4 sm:$0xff]  }
 0x1f5   :  { %2969 = vmatpush1.bf16.msra.mxu1 %v9844_v4  ;;  %8603 = vmatprep.mubr.msk.bf16.mxu1 %vm2170_vm1, %v11439_v45  ;;  %v9853_v45 = vld [vmem:[%s13907_s3 + $0x318] ss:$12 sps:$4 sm:$0xff]   ;;  %s8252_s3 = sshll.u32 %s10533_s30, 4  ;;  %s8253_s3 = int_to_ptr.vmem [resolvable:$true] %s8252_s3 }
 0x1f6   :  { %2970 = vmatprep.subr.bf16.mxu1 %v9849_v42  ;;  %p10503_p9 = scmp.lt.s32.totalorder %s8253_s3, %s8253_s3 }
 0x1f9   :  { %2971 = vmatpush1.bf16.msra.mxu1 %v9847_v18 }
 0x1fa   :  { %2972 = vmatprep.subr.bf16.mxu1 %v9852_v55 }
 0x1fd   :  { %2973 = vmatpush1.bf16.msra.mxu1 %v9850_v23 }
 0x1fe   :  { %2974 = vmatprep.subr.bf16.mxu1 %v9855_v43 }
 0x201   :  { %2975 = vmatpush1.bf16.msra.mxu1 %v9853_v45 }
 0x202   :  { %2976 = vmatprep.subr.bf16.mxu1 %v9858_v27 }
 0x205   :  { %2977 = vmatpush1.bf16.msra.mxu1 %v9856_v59  ;;  %v9871_v59 = vld [vmem:[%s13909_s5 + $0x170] ss:$8 sps:$4 sm:$0xff]  }
 0x206   :  { %2978 = vmatprep.subr.bf16.mxu1 %v9861_v30  ;;  %v9873_v30 = vld [vmem:[%s13909_s5 + $0x174] ss:$8 sps:$4 sm:$0xff]  }
 0x207   :  { %4800 = vmatprep.subr.bf16.mxu0 %v9873_v30 }
 0x208   :  { %4801 = vmatpush1.bf16.msra.mxu0 %v9871_v59 }
 0x209   :  { %2979 = vmatpush1.bf16.msra.mxu1 %v9859_v19  ;;  %v9876_v19 = vld [vmem:[%s13909_s5 + $0x184] ss:$8 sps:$4 sm:$0xff]  }
 0x20a   :  { %2980 = vmatprep.subr.bf16.mxu1 %v9864_v34  ;;  %v9874_v34 = vld [vmem:[%s13909_s5 + $0x180] ss:$8 sps:$4 sm:$0xff]   ;;  %4802 = vmatprep.subr.bf16.mxu0 %v9876_v19 }
 0x20c   :  { %4803 = vmatpush1.bf16.msra.mxu0 %v9874_v34 }
 0x20d   :  { %2981 = vmatpush1.bf16.msra.mxu1 %v9862_v35  ;;  %v9879_v35 = vld [vmem:[%s13909_s5 + $0x194] ss:$8 sps:$4 sm:$0xff]  }
 0x20e   :  { %2982 = vmatprep.subr.bf16.mxu1 %v9867_v20  ;;  %v9877_v20 = vld [vmem:[%s13909_s5 + $0x190] ss:$8 sps:$4 sm:$0xff]   ;;  %4804 = vmatprep.subr.bf16.mxu0 %v9879_v35 }
 0x210   :  { %4805 = vmatpush1.bf16.msra.mxu0 %v9877_v20 }
 0x211   :  { %2983 = vmatpush1.bf16.msra.mxu1 %v9865_v25  ;;  %v9882_v25 = vld [vmem:[%s13909_s5 + $0x1a4] ss:$8 sps:$4 sm:$0xff]  }
 0x212   :  { %2984 = vmatprep.subr.bf16.mxu1 %v9870_v44  ;;  %v9880_v44 = vld [vmem:[%s13909_s5 + $0x1a0] ss:$8 sps:$4 sm:$0xff]   ;;  %4806 = vmatprep.subr.bf16.mxu0 %v9882_v25 }
 0x214   :  { %4807 = vmatpush1.bf16.msra.mxu0 %v9880_v44 }
 0x215   :  { %2985 = vmatpush1.bf16.msra.mxu1 %v9868_v54  ;;  %v9885_v54 = vld [vmem:[%s13909_s5 + $0x1b4] ss:$8 sps:$4 sm:$0xff]  }
 0x216   :  { %4808 = vmatprep.subr.bf16.mxu0 %v9885_v54 }
 0x218   :  { %2993 = vmatmul.mubr.bf16.vlgmr.msra.gmra.mrb[16].mxu1 %v11437_v32 }
 0x219   :  { %8604 = vmatprep.mubr.msk.bf16.mxu1 %vm2170_vm1, %v11465_v61 }
 0x220   :  { %3003 = vmatmul.mubr.bf16.gmra.mrb[20].mxu1 %v11467_v10 }
 0x221   :  { %8605 = vmatprep.mubr.msk.bf16.mxu1 %vm2170_vm1, %v11486_v17  ;;  %vm10532_vm1 = vmmov 0  }
 0x228   :  { %3013 = vmatmul.mubr.bf16.gmra.mrb[24].mxu1 %v11488_v21 }
 0x23b   :  { %v2623_v57 = vpop.f32.mrb[20].mxu0 }
 0x23c   :  { %v2625_v8 = vpop.f32.mrb[21].mxu0 }
 0x23d   :  { %v2626_v58 = vpop.f32.mrb[22].mxu0  ;;  %v9888_v8 = vld [vmem:[%s13909_s5 + $0x1c4] ss:$8 sps:$4 sm:$0xff]  }
 0x23e   :  { %v2628_v60 = vpop.f32.mrb[23].mxu0 }
 0x23f   :  { %v9891_v60 = vld [vmem:[%s13909_s5 + $0x1d4] ss:$8 sps:$4 sm:$0xff]  }
 0x249   :  { %v2631_v56 = vpop.f32.mrb[24].mxu0 }
 0x24a   :  { %v2633_v40 = vpop.f32.mrb[25].mxu0 }
 0x24b   :  { %v2634_v48 = vpop.f32.mrb[26].mxu0  ;;  %v9889_v40 = vld [vmem:[%s13909_s5 + $0x1d0] ss:$8 sps:$4 sm:$0xff]  }
 0x24c   :  { %v2636_v46 = vpop.f32.mrb[27].mxu0 }
 0x256   :  { %v2639_v63 = vpop.f32.mrb[28].mxu0 }
 0x257   :  { %v2641_v32 = vpop.f32.mrb[29].mxu0 }
 0x258   :  { %v2642_v1 = vpop.f32.mrb[30].mxu0 }
 0x259   :  { %v2644_v22 = vpop.f32.mrb[31].mxu0 }
 0x270   :  { %v3057_v61 = vpop.f32.mrb[32].mxu0 }
 0x271   :  { %v3059_v36 = vpop.f32.mrb[33].mxu0 }
 0x272   :  { %v3060_v10 = vpop.f32.mrb[34].mxu0 }
 0x273   :  { %v3062_v2 = vpop.f32.mrb[35].mxu0 }
 0x278   :  { %v3065_v6 = vpop.f32.mrb[36].mxu0 }
 0x279   :  { %v3067_v17 = vpop.f32.mrb[37].mxu0 }
 0x27a   :  { %v3068_v9 = vpop.f32.mrb[38].mxu0 }
 0x27b   :  { %v3070_v21 = vpop.f32.mrb[39].mxu0 }
 0x280   :  { %v3073_v39 = vpop.f32.mrb[40].mxu0 }
 0x281   :  { %v3075_v16 = vpop.f32.mrb[41].mxu0 }
 0x282   :  { %v3076_v11 = vpop.f32.mrb[42].mxu0 }
 0x283   :  { %v2277_v31 = vpop.f32.mrb[28].mxu1  ;;  %v3078_v49 = vpop.f32.mrb[43].mxu0 }
 0x284   :  { %v2624_v33 = vadd.f32 %v2623_v57, %v2277_v31  ;;  %v2279_v38 = vpop.f32.mrb[29].mxu1  ;;  %v9883_v57 = vld [vmem:[%s13909_s5 + $0x1b0] ss:$8 sps:$4 sm:$0xff]  }
 0x285   :  { %v2280_v5 = vpop.f32.mrb[30].mxu1  ;;  %4809 = vmatpush1.bf16.msra.mxu0 %v9883_v57 }
 0x286   :  { %v3082_v62 = vadd.f32 %v3057_v61, %v2624_v33  ;;  %v2627_v26 = vadd.f32 %v2626_v58, %v2280_v5  ;;  %v2282_v47 = vpop.f32.mrb[31].mxu1  ;;  %v9886_v58 = vld [vmem:[%s13909_s5 + $0x1c0] ss:$8 sps:$4 sm:$0xff]   ;;  %4810 = vmatprep.subr.bf16.mxu0 %v9888_v8 }
 0x288   :  { %v3085_v3 = vadd.f32 %v3060_v10, %v2627_v26 }
 0x289   :  { %4811 = vmatpush1.bf16.msra.mxu0 %v9886_v58 }
 0x28a   :  { %4812 = vmatprep.subr.bf16.mxu0 %v9891_v60 }
 0x28b   :  { %v2285_v12 = vpop.f32.mrb[32].mxu1 }
 0x28c   :  { %v2632_v52 = vadd.f32 %v2631_v56, %v2285_v12  ;;  %v2287_v13 = vpop.f32.mrb[33].mxu1  ;;  %v11775_v56 = vsub.s32 2, %v10624_v7 }
 0x28d   :  { %v2288_v15 = vpop.f32.mrb[34].mxu1  ;;  %4813 = vmatpush1.bf16.msra.mxu0 %v9889_v40 }
 0x28e   :  { %v3088_v50 = vadd.f32 %v3065_v6, %v2632_v52  ;;  %v2635_v29 = vadd.f32 %v2634_v48, %v2288_v15  ;;  %v2290_v51 = vpop.f32.mrb[35].mxu1  ;;  %13985 = vst [vmem:[#allocation13_spill] sm:$0xff] %v11775_v56  ;;  %v3098_v48 = vld [vmem:[%s13908_s4] sm:$0x7]  ;;  %s10530_s4 = smov 112  }
 0x28f   :  { %v3111_v46 = vrot.slane %v3098_v48, %v11775_v56  ;;  %v11803_v16 = vrot.slane %v3098_v48, %v11186_v24  ;;  %v11806_v31 = vrot.slane %v3098_v48, %v11192_v28 }
 0x290   :  { %v3091_v37 = vadd.f32 %v3068_v9, %v2635_v29 }
 0x291   :  { %v11789_v22 = vadd.f32 %v3111_v46, %v3088_v50 }
 0x292   :  { %v11791_v61 = vadd.f32 %v3111_v46, %v3091_v37 }
 0x293   :  { %v2293_v4 = vpop.f32.mrb[36].mxu1  ;;  %v8617_v2 = vmul.f32 -1.442695, %v11789_v22 }
 0x294   :  { %v2640_v42 = vadd.f32 %v2639_v63, %v2293_v4  ;;  %v2295_v18 = vpop.f32.mrb[37].mxu1  ;;  %v11784_v63 = vadd.f32 %v3111_v46, %v3082_v62  ;;  %v8620_v6 = vmul.f32 -1.442695, %v11791_v61 }
 0x295   :  { %v2296_v55 = vpop.f32.mrb[38].mxu1 }
 0x296   :  { %v3094_v23 = vadd.f32 %v3073_v39, %v2640_v42  ;;  %v2643_v43 = vadd.f32 %v2642_v1, %v2296_v55  ;;  %v2298_v45 = vpop.f32.mrb[39].mxu1  ;;  %v8611_v32 = vmul.f32 -1.442695, %v11784_v63  ;;  %v11787_v1 = vadd.f32 %v3111_v46, %v3085_v3 }
 0x298   :  { %v3097_v27 = vadd.f32 %v3076_v11, %v2643_v43  ;;  %10360 = vpow2.f32 %v8611_v32  ;;  %v11793_v36 = vadd.f32 %v3111_v46, %v3094_v23  ;;  %v8614_v10 = vmul.f32 -1.442695, %v11787_v1 }
 0x29a   :  { %v8623_v17 = vmul.f32 -1.442695, %v11793_v36  ;;  %10362 = vpow2.f32 %v8614_v10  ;;  %v11799_v9 = vadd.f32 %v3111_v46, %v3097_v27 }
 0x29b   :  { %10364 = vpow2.f32 %v8617_v2 }
 0x29c   :  { %10366 = vpow2.f32 %v8620_v6  ;;  %v8626_v21 = vmul.f32 -1.442695, %v11799_v9 }
 0x29d   :  { %10368 = vpow2.f32 %v8623_v17 }
 0x29e   :  { %10370 = vpow2.f32 %v8626_v21 }
 0x2a2   :  { %v10361_v39 = vpop.eup %10360 }
 0x2a3   :  { %v3189_v11 = vadd.f32 1.0, %v10361_v39 }
 0x2a4   :  { %v10363_v5 = vpop.eup %10362 }
 0x2a5   :  { %v10365_v47 = vpop.eup %10364  ;;  %10372 = vrcp.f32 %v3189_v11  ;;  %v3192_v51 = vadd.f32 1.0, %v10363_v5 }
 0x2a6   :  { %v10367_v13 = vpop.eup %10366  ;;  %v3195_v4 = vadd.f32 1.0, %v10365_v47 }
 0x2a7   :  { %v10369_v29 = vpop.eup %10368  ;;  %v3198_v18 = vadd.f32 1.0, %v10367_v13 }
 0x2a8   :  { %v3201_v55 = vadd.f32 1.0, %v10369_v29  ;;  %v10371_v27 = vpop.eup %10370 }
 0x2a9   :  { %v3204_v44 = vadd.f32 1.0, %v10371_v27 }
 0x2af   :  { %v10373_v57 = vpop.eup %10372 }
 0x2eb   :  { %v2994_v33 = vpop.f32.mrb[16].mxu1 }
 0x2ec   :  { %v11809_v38 = vadd.f32 %v11803_v16, %v2994_v33  ;;  %v2996_v49 = vpop.f32.mrb[17].mxu1 }
 0x2ed   :  { %v11812_v62 = vadd.f32 %v11806_v31, %v2996_v49  ;;  %v2998_v26 = vpop.f32.mrb[18].mxu1 }
 0x2ee   :  { %v8609_v3 = vmul.f32 -1.442695, %v11809_v38  ;;  %v11816_v12 = vadd.f32 %v11803_v16, %v2998_v26  ;;  %v3000_v52 = vpop.f32.mrb[19].mxu1 }
 0x2ef   :  { %v8610_v15 = vmul.f32 -1.442695, %v11812_v62  ;;  %v11820_v50 = vadd.f32 %v11806_v31, %v3000_v52 }
 0x2f0   :  { %10374 = vpow2.f32 %v8609_v3  ;;  %v8612_v37 = vmul.f32 -1.442695, %v11816_v12 }
 0x2f1   :  { %10376 = vpow2.f32 %v8610_v15  ;;  %v8613_v42 = vmul.f32 -1.442695, %v11820_v50 }
 0x2f2   :  { %10378 = vpow2.f32 %v8612_v37 }
 0x2f3   :  { %10380 = vpow2.f32 %v8613_v42  ;;  %v3004_v23 = vpop.f32.mrb[20].mxu1 }
 0x2f4   :  { %10382 = vrcp.f32 %v3192_v51  ;;  %v11825_v43 = vadd.f32 %v11803_v16, %v3004_v23  ;;  %v3006_v45 = vpop.f32.mrb[21].mxu1 }
 0x2f5   :  { %10384 = vrcp.f32 %v3195_v4  ;;  %v11828_v59 = vadd.f32 %v11806_v31, %v3006_v45  ;;  %v3008_v30 = vpop.f32.mrb[22].mxu1 }
 0x2f6   :  { %10386 = vrcp.f32 %v3198_v18  ;;  %v8615_v19 = vmul.f32 -1.442695, %v11825_v43  ;;  %v11832_v34 = vadd.f32 %v11803_v16, %v3008_v30  ;;  %v3010_v35 = vpop.f32.mrb[23].mxu1 }
 0x2f7   :  { %10388 = vrcp.f32 %v3201_v55  ;;  %v8616_v20 = vmul.f32 -1.442695, %v11828_v59  ;;  %v11836_v25 = vadd.f32 %v11806_v31, %v3010_v35 }
 0x2f8   :  { %10390 = vpow2.f32 %v8615_v19  ;;  %v8618_v54 = vmul.f32 -1.442695, %v11832_v34 }
 0x2f9   :  { %10392 = vpow2.f32 %v8616_v20  ;;  %v8619_v8 = vmul.f32 -1.442695, %v11836_v25 }
 0x2fa   :  { %v10375_v58 = vpop.eup %10374  ;;  %10394 = vpow2.f32 %v8618_v54 }
 0x2fb   :  { %v10377_v60 = vpop.eup %10376  ;;  %v3187_v40 = vadd.f32 1.0, %v10375_v58  ;;  %10396 = vpow2.f32 %v8619_v8  ;;  %v3014_v48 = vpop.f32.mrb[24].mxu1 }
 0x2fc   :  { %v10379_v46 = vpop.eup %10378  ;;  %10398 = vrcp.f32 %v3204_v44  ;;  %v3188_v32 = vadd.f32 1.0, %v10377_v60  ;;  %v11841_v10 = vadd.f32 %v11803_v16, %v3014_v48  ;;  %v3016_v2 = vpop.f32.mrb[25].mxu1 }
 0x2fd   :  { %v10381_v6 = vpop.eup %10380  ;;  %10400 = vrcp.f32 %v3187_v40  ;;  %v3190_v17 = vadd.f32 1.0, %v10379_v46  ;;  %v11844_v21 = vadd.f32 %v11806_v31, %v3016_v2  ;;  %v3018_v39 = vpop.f32.mrb[26].mxu1 }
 0x2fe   :  { %v10383_v11 = vpop.eup %10382  ;;  %10402 = vrcp.f32 %v3188_v32  ;;  %v3191_v33 = vadd.f32 1.0, %v10381_v6  ;;  %v8621_v49 = vmul.f32 -1.442695, %v11841_v10  ;;  %v11848_v5 = vadd.f32 %v11803_v16, %v3018_v39  ;;  %v3020_v26 = vpop.f32.mrb[27].mxu1 }
 0x2ff   :  { %v10385_v47 = vpop.eup %10384  ;;  %10404 = vrcp.f32 %v3190_v17  ;;  %v8622_v3 = vmul.f32 -1.442695, %v11844_v21  ;;  %v11852_v52 = vadd.f32 %v11806_v31, %v3020_v26  ;;  %v3243_v16 = vmul.f32 %v10373_v57, %v11784_v63 }
 0x300   :  { %v10387_v13 = vpop.eup %10386  ;;  %10406 = vrcp.f32 %v3191_v33  ;;  %v8624_v15 = vmul.f32 -1.442695, %v11848_v5  ;;  %v3246_v4 = vmul.f32 %v10383_v11, %v11787_v1  ;;  %v3249_v18 = vmul.f32 %v10385_v47, %v11789_v22 }
 0x301   :  { %v10389_v29 = vpop.eup %10388  ;;  %10408 = vpow2.f32 %v8621_v49  ;;  %v8625_v51 = vmul.f32 -1.442695, %v11852_v52  ;;  %v3252_v23 = vmul.f32 %v10387_v13, %v11791_v61  ;;  %v3279_v35 = vcombine.high %v3243_v16, %v3243_v16 }
 0x302   :  { %v10391_v37 = vpop.eup %10390  ;;  %10410 = vpow2.f32 %v8622_v3  ;;  %v3314_v20 = vcombine.high %v3246_v4, %v3246_v4  ;;  %v3349_v44 = vcombine.high %v3249_v18, %v3249_v18  ;;  %v11861_v57 = vmul.f32 %v10389_v29, %v11793_v36 }
 0x303   :  { %v10393_v42 = vpop.eup %10392  ;;  %v3193_v55 = vadd.f32 1.0, %v10391_v37  ;;  %10412 = vpow2.f32 %v8624_v15  ;;  %v3384_v22 = vcombine.high %v3252_v23, %v3252_v23  ;;  %v11866_v60 = vrot.slane %v3243_v16, %v11268_v14 }
 0x304   :  { %v10395_v31 = vpop.eup %10394  ;;  %v3194_v45 = vadd.f32 1.0, %v10393_v42  ;;  %10414 = vpow2.f32 %v8625_v51  ;;  %v3335_v40 = vrot.slane %v3246_v4, %v11268_v14  ;;  %v11870_v46 = vrot.slane %v3249_v18, %v11268_v14 }
 0x305   :  { %v10397_v27 = vpop.eup %10396  ;;  %10416 = vrcp.f32 %v3193_v55  ;;  %v3196_v30 = vadd.f32 1.0, %v10395_v31  ;;  %v3307_v36 = vrot.slane %v3279_v35, %v11268_v14  ;;  %v3342_v2 = vrot.slane %v3314_v20, %v11268_v14 }
 0x306   :  { %v10399_v19 = vpop.eup %10398  ;;  %10418 = vrcp.f32 %v3194_v45  ;;  %v3197_v63 = vadd.f32 1.0, %v10397_v27  ;;  %v11876_v6 = vrot.slane %v3252_v23, %v11268_v14  ;;  %v3419_v33 = vcombine.high %v11861_v57, %v11861_v57 }
 0x307   :  { %v10401_v1 = vpop.eup %10400  ;;  %10420 = vrcp.f32 %v3196_v30  ;;  %v11882_v26 = vrot.slane %v3349_v44, %v11268_v14  ;;  %v3258_v51 = vmul.f32 %v10399_v19, %v11799_v9  ;;  %v11894_v42 = vrot.slane %v11861_v57, %v11268_v14 }
 0x308   :  { %v10403_v54 = vpop.eup %10402  ;;  %v3241_v61 = vmul.f32 %v10401_v1, %v11809_v38  ;;  %10422 = vrcp.f32 %v3197_v63 }
 0x309   :  { %v10405_v8 = vpop.eup %10404  ;;  %v3242_v58 = vmul.f32 %v10403_v54, %v11812_v62  ;;  %v3454_v1 = vcombine.high %v3258_v51, %v3258_v51 }
 0x30a   :  { %v10407_v48 = vpop.eup %10406  ;;  %v3244_v32 = vmul.f32 %v10405_v8, %v11816_v12  ;;  %v11885_v12 = vrot.slane %v3384_v22, %v11268_v14 }
 0x30b   :  { %v10409_v38 = vpop.eup %10408  ;;  %v3277_v62 = vcombine.low %v3241_v61, %v3242_v58  ;;  %v3278_v17 = vcombine.high %v3241_v61, %v3242_v58  ;;  %v3245_v39 = vmul.f32 %v10407_v48, %v11820_v50 }
 0x30c   :  { %v10411_v11 = vpop.eup %10410  ;;  %v3199_v49 = vadd.f32 1.0, %v10409_v38 }
 0x30d   :  { %v10413_v47 = vpop.eup %10412  ;;  %v11888_v3 = vrot.slane %v3277_v62, %v11268_v14  ;;  %v3293_v13 = vrot.slane %v3278_v17, %v11268_v14  ;;  %v3312_v15 = vcombine.low %v3244_v32, %v3245_v39  ;;  %v3313_v29 = vcombine.high %v3244_v32, %v3245_v39 }
 0x30e   :  { %v10415_v50 = vpop.eup %10414  ;;  %10424 = vrcp.f32 %v3199_v49  ;;  %v3200_v37 = vadd.f32 1.0, %v10411_v11  ;;  %v3202_v16 = vadd.f32 1.0, %v10413_v47 }
 0x30f   :  { %v10417_v4 = vpop.eup %10416  ;;  %v3321_v18 = vrot.slane %v3312_v15, %v11268_v14  ;;  %v3203_v55 = vadd.f32 1.0, %v10415_v50  ;;  %v3309_v31 = vcombine.high %v11888_v3, %v11866_v60  ;;  %v3310_v27 = vcombine.low %v3293_v13, %v3307_v36 }
 0x310   :  { %v10419_v23 = vpop.eup %10418  ;;  %v3247_v45 = vmul.f32 %v10417_v4, %v11825_v43  ;;  %10426 = vrcp.f32 %v3200_v37  ;;  %v3311_v9 = vcombine.high %v3293_v13, %v3307_v36  ;;  %v3328_v44 = vrot.slane %v3313_v29, %v11268_v14 }
 0x311   :  { %v10421_v30 = vpop.eup %10420  ;;  %v3248_v19 = vmul.f32 %v10419_v23, %v11828_v59  ;;  %10428 = vrcp.f32 %v3202_v16  ;;  %v3343_v35 = vcombine.low %v3321_v18, %v3335_v40  ;;  %v8628_v20 = vrot.slane %v3309_v31, 9 }
 0x312   :  { %v10423_v63 = vpop.eup %10422  ;;  %v3250_v54 = vmul.f32 %v10421_v30, %v11832_v34  ;;  %10430 = vrcp.f32 %v3203_v55  ;;  %v8629_v58 = vrot.slane %v3310_v27, 9  ;;  %v8630_v48 = vrot.slane %v3311_v9, 9 }
 0x313   :  { %v3347_v22 = vcombine.low %v3247_v45, %v3248_v19  ;;  %v3348_v57 = vcombine.high %v3247_v45, %v3248_v19  ;;  %v3251_v43 = vmul.f32 %v10423_v63, %v11836_v25  ;;  %v8631_v61 = vrot.slane %v3343_v35, 9 }
 0x314   :  { %v11904_v8 = vmax.f32 %v3309_v31, %v8628_v20  ;;  %v3344_v59 = vcombine.high %v3321_v18, %v3335_v40  ;;  %v11912_v39 = vcombine.low %v3328_v44, %v3342_v2  ;;  %v11914_v11 = vcombine.high %v3328_v44, %v3342_v2 }
 0x315   :  { %v3356_v32 = vrot.slane %v3347_v22, %v11268_v14  ;;  %v11908_v36 = vrot.slane %v3348_v57, %v11268_v14  ;;  %v3382_v38 = vcombine.low %v3250_v54, %v3251_v43  ;;  %v3383_v62 = vcombine.high %v3250_v54, %v3251_v43 }
 0x316   :  { %v11910_v17 = vmax.f32 %v3343_v35, %v8631_v61  ;;  %v8632_v34 = vrot.slane %v3344_v59, 9  ;;  %v11924_v15 = vrot.slane %v3258_v51, %v11268_v14  ;;  %v3447_v2 = vrot.slane %v3419_v33, %v11268_v14 }
 0x317   :  { %v11917_v25 = vrot.slane %v3382_v38, %v11268_v14  ;;  %v3398_v49 = vrot.slane %v3383_v62, %v11268_v14  ;;  %v3380_v40 = vcombine.low %v11908_v36, %v11882_v26  ;;  %v3379_v47 = vcombine.high %v3356_v32, %v11870_v46 }
 0x318   :  { %v10425_v13 = vpop.eup %10424  ;;  %v9642_v29 = vpack.i.bf16 %v11910_v17, %v11904_v8  ;;  %v11930_v50 = vrot.slane %v3454_v1, %v11268_v14  ;;  %v11933_v4 = vmax.f32 %v3310_v27, %v8629_v58  ;;  %v11939_v23 = vmax.f32 %v3311_v9, %v8630_v48  ;;  %v9892_v9 = vld [vmem:[%s13909_s5 + $0x1e0] ss:$8 sps:$4 sm:$0xff]  }
 0x319   :  { %v3253_v37 = vmul.f32 %v10425_v13, %v11841_v10  ;;  %v8637_v16 = vrot.slane %v3380_v40, 9  ;;  %v3415_v18 = vcombine.low %v3398_v49, %v11885_v12  ;;  %v8636_v51 = vrot.slane %v3379_v47, 9 }
 0x31a   :  { %v10427_v55 = vpop.eup %10426  ;;  %9643 = vrot.lane.b32.xlu1 %v9642_v29, %s10530_s4  ;;  %v3414_v31 = vcombine.high %v11917_v25, %v11876_v6  ;;  %v3416_v33 = vcombine.high %v3398_v49, %v11885_v12  ;;  %v11945_v19 = vmax.f32 %v3344_v59, %v8632_v34  ;;  %v3378_v44 = vcombine.low %v3356_v32, %v11870_v46 }
 0x31b   :  { %v10429_v45 = vpop.eup %10428  ;;  %v3254_v10 = vmul.f32 %v10427_v55, %v11844_v21  ;;  %v11943_v30 = vmax.f32 %v3380_v40, %v8637_v16  ;;  %v8641_v27 = vrot.slane %v3415_v18, 9  ;;  %v9894_v21 = vld [vmem:[%s13909_s5 + $0x1e4] ss:$8 sps:$4 sm:$0xff]   ;;  %v11961_v46 = vmax.f32 %v3379_v47, %v8636_v51  ;;  %v9895_v40 = vld [vmem:[%s13909_s5 + $0x1f0] ss:$8 sps:$4 sm:$0xff]  }
 0x31c   :  { %v10431_v35 = vpop.eup %10430  ;;  %v3256_v20 = vmul.f32 %v10429_v45, %v11848_v5  ;;  %v8640_v63 = vrot.slane %v3414_v31, 9  ;;  %v8642_v1 = vrot.slane %v3416_v33, 9  ;;  %v9897_v5 = vld [vmem:[%s13909_s5 + $0x1f4] ss:$8 sps:$4 sm:$0xff]   ;;  %v8633_v58 = vrot.slane %v11912_v39, 9  ;;  %4814 = vmatprep.subr.bf16.mxu0 %v9894_v21 }
 0x31d   :  { %v3417_v12 = vcombine.low %v3253_v37, %v3254_v10  ;;  %v3418_v54 = vcombine.high %v3253_v37, %v3254_v10  ;;  %v3257_v22 = vmul.f32 %v10431_v35, %v11852_v52  ;;  %v9647_v57 = vpack.i.bf16 %v11943_v30, %v11933_v4  ;;  %4815 = vmatpush1.bf16.msra.mxu0 %v9892_v9 }
 0x31e   :  { %v11963_v43 = vmax.f32 %v3415_v18, %v8641_v27  ;;  %v11965_v61 = vmax.f32 %v3414_v31, %v8640_v63  ;;  %v11975_v34 = vmax.f32 %v3416_v33, %v8642_v1  ;;  %v8634_v49 = vrot.slane %v11914_v11, 9  ;;  %4816 = vmatprep.subr.bf16.mxu0 %v9897_v5 }
 0x31f   :  { %v3426_v48 = vrot.slane %v3417_v12, %v11268_v14  ;;  %v3433_v52 = vrot.slane %v3418_v54, %v11268_v14  ;;  %v3452_v59 = vcombine.low %v3256_v20, %v3257_v22  ;;  %v3453_v32 = vcombine.high %v3256_v20, %v3257_v22  ;;  %9648 = vrot.lane.b32.xlu0 %v9647_v57, %s10530_s4 }
 0x320   :  { %v9657_v38 = vpack.i.bf16 %v11963_v43, %v11961_v46  ;;  %v9652_v62 = vpack.i.bf16 %v11965_v61, %v11939_v23  ;;  %v3381_v55 = vcombine.high %v11908_v36, %v11882_v26  ;;  %v3308_v51 = vcombine.low %v11888_v3, %v11866_v60 }
 0x321   :  { %v3461_v47 = vrot.slane %v3452_v59, %v11268_v14  ;;  %v3468_v13 = vrot.slane %v3453_v32, %v11268_v14  ;;  %v3448_v29 = vcombine.low %v3426_v48, %v11894_v42  ;;  %v3449_v37 = vcombine.high %v3426_v48, %v11894_v42  ;;  %4817 = vmatpush1.bf16.msra.mxu0 %v9895_v40  ;;  %v9898_v48 = vld [vmem:[%s13909_s5 + $0x200] ss:$8 sps:$4 sm:$0xff]  }
 0x322   :  { %9658 = vrot.lane.b32.xlu1 %v9657_v38, %s10530_s4  ;;  %v3450_v16 = vcombine.low %v3433_v52, %v3447_v2  ;;  %v3451_v18 = vcombine.high %v3433_v52, %v3447_v2  ;;  %v11994_v42 = vmax.f32 %v11912_v39, %v8633_v58  ;;  %v8635_v27 = vrot.slane %v3378_v44, 9 }
 0x323   :  { %9653 = vrot.lane.b32.xlu0 %v9652_v62, %s10530_s4  ;;  %v8643_v31 = vrot.slane %v3448_v29, 9  ;;  %v8644_v33 = vrot.slane %v3449_v37, 9  ;;  %v3485_v45 = vcombine.low %v3468_v13, %v11930_v50  ;;  %v3483_v10 = vcombine.low %v3461_v47, %v11924_v15 }
 0x324   :  { %v8645_v35 = vrot.slane %v3450_v16, 9  ;;  %v3484_v2 = vcombine.high %v3461_v47, %v11924_v15  ;;  %v9662_v26 = vpack.i.bf16 %v11975_v34, %v11945_v19  ;;  %v12007_v63 = vmax.f32 %v11914_v11, %v8634_v49  ;;  %v9903_v49 = vld [vmem:[%s13909_s5 + $0x214] ss:$8 sps:$4 sm:$0xff]  }
 0x325   :  { %v11999_v60 = vmax.f32 %v3448_v29, %v8643_v31  ;;  %v12001_v3 = vmax.f32 %v3449_v37, %v8644_v33  ;;  %v8647_v36 = vrot.slane %v3483_v10, 9  ;;  %v8649_v15 = vrot.slane %v3485_v45, 9  ;;  %v9912_v31 = vld [vmem:[%s13909_s5 + $0x244] ss:$8 sps:$4 sm:$0xff]   ;;  %v9910_v33 = vld [vmem:[%s13909_s5 + $0x240] ss:$8 sps:$4 sm:$0xff]  }
 0x326   :  { %v8648_v20 = vrot.slane %v3484_v2, 9  ;;  %v12009_v1 = vmax.f32 %v3450_v16, %v8645_v35  ;;  %v12011_v9 = vmax.f32 %v3378_v44, %v8635_v27  ;;  %v8646_v21 = vrot.slane %v3451_v18, 9  ;;  %v9900_v44 = vld [vmem:[%s13909_s5 + $0x204] ss:$8 sps:$4 sm:$0xff]   ;;  %v9916_v35 = vld [vmem:[%s13909_s5 + $0x260] ss:$8 sps:$4 sm:$0xff]  }
 0x327   :  { %9663 = vrot.lane.b32.xlu0 %v9662_v26, %s10530_s4  ;;  %v9667_v39 = vpack.i.bf16 %v11999_v60, %v11994_v42  ;;  %v3413_v12 = vcombine.low %v11917_v25, %v11876_v6  ;;  %v9672_v54 = vpack.i.bf16 %v12001_v3, %v12007_v63  ;;  %v12018_v22 = vmax.f32 %v3483_v10, %v8647_v36  ;;  %v9906_v16 = vld [vmem:[%s13909_s5 + $0x224] ss:$8 sps:$4 sm:$0xff]   ;;  %v9913_v10 = vld [vmem:[%s13909_s5 + $0x250] ss:$8 sps:$4 sm:$0xff]  }
 0x328   :  { %v12020_v57 = vmax.f32 %v3484_v2, %v8648_v20  ;;  %v3486_v11 = vcombine.high %v3468_v13, %v11930_v50  ;;  %v9677_v6 = vpack.i.bf16 %v12009_v1, %v12011_v9  ;;  %v12029_v25 = vmax.f32 %v3485_v45, %v8649_v15  ;;  %4818 = vmatprep.subr.bf16.mxu0 %v9900_v44  ;;  %v9901_v13 = vld [vmem:[%s13909_s5 + $0x210] ss:$8 sps:$4 sm:$0xff]   ;;  %v9915_v45 = vld [vmem:[%s13909_s5 + $0x254] ss:$8 sps:$4 sm:$0xff]   ;;  %v9918_v27 = vld [vmem:[%s13909_s5 + $0x264] ss:$8 sps:$4 sm:$0xff]  }
 0x329   :  { %9668 = vrot.lane.b32.xlu1 %v9667_v39, %s10530_s4  ;;  %v8639_v5 = vrot.slane %v3413_v12, 9  ;;  %v8627_v58 = vrot.slane %v3308_v51, 9  ;;  %v12035_v50 = vmax.f32 %v3451_v18, %v8646_v21  ;;  %4819 = vmatpush1.bf16.msra.mxu0 %v9898_v48  ;;  %v8638_v38 = vrot.slane %v3381_v55, 9  ;;  %v9904_v18 = vld [vmem:[%s13909_s5 + $0x220] ss:$8 sps:$4 sm:$0xff]  }
 0x32a   :  { %v9682_v52 = vpack.i.bf16 %v12020_v57, %v12018_v22  ;;  %v8650_v47 = vrot.slane %v3486_v11, 9  ;;  %4820 = vmatprep.subr.bf16.mxu0 %v9903_v49  ;;  %v9921_v20 = vld [vmem:[%s13909_s5 + $0x274] ss:$8 sps:$4 sm:$0xff]  }
 0x32b   :  { %9673 = vrot.lane.b32.xlu0 %v9672_v54, %s10530_s4  ;;  %v12039_v59 = vmax.f32 %v3413_v12, %v8639_v5  ;;  %v9687_v32 = vpack.i.bf16 %v12029_v25, %v12035_v50  ;;  %v12044_v62 = vmax.f32 %v3308_v51, %v8627_v58  ;;  %v12055_v29 = vmax.f32 %v3381_v55, %v8638_v38  ;;  %v9909_v55 = vld [vmem:[%s13909_s5 + $0x234] ss:$8 sps:$4 sm:$0xff]   ;;  %v9907_v51 = vld [vmem:[%s13909_s5 + $0x230] ss:$8 sps:$4 sm:$0xff]  }
 0x32c   :  { %v12060_v37 = vmax.f32 %v3486_v11, %v8650_v47 }
 0x32d   :  { %9678 = vrot.lane.b32.xlu1 %v9677_v6, %s10530_s4  ;;  %v9692_v40 = vpack.i.bf16 %v12044_v62, %v12039_v59  ;;  %4821 = vmatpush1.bf16.msra.mxu0 %v9901_v13  ;;  %v12101_v6 = vsub.s32 4, %v10624_v7 }
 0x32e   :  { %13986 = vst [vmem:[#allocation14_spill] sm:$0xff] %v12060_v37  ;;  %4822 = vmatprep.subr.bf16.mxu0 %v9906_v16 }
 0x32f   :  { %9683 = vrot.lane.b32.xlu0 %v9682_v52, %s10530_s4  ;;  %13987 = vst [vmem:[#allocation15_spill] sm:$0xff] %v12101_v6 }
 0x331   :  { %9688 = vrot.lane.b32.xlu1 %v9687_v32, %s10530_s4  ;;  %4823 = vmatpush1.bf16.msra.mxu0 %v9904_v18 }
 0x332   :  { %4824 = vmatprep.subr.bf16.mxu0 %v9909_v55 }
 0x333   :  { %9693 = vrot.lane.b32.xlu0 %v9692_v40, %s10530_s4 }
 0x335   :  { %3653 = vrot.lane.b32.xlu1 %v12055_v29, %s10530_s4  ;;  %4825 = vmatpush1.bf16.msra.mxu0 %v9907_v51 }
 0x336   :  { %4826 = vmatprep.subr.bf16.mxu0 %v9912_v31 }
 0x337   :  { %3677 = vrot.lane.b32.xlu0 %v12060_v37, %s10530_s4 }
 0x339   :  { %4827 = vmatpush1.bf16.msra.mxu0 %v9910_v33 }
 0x33a   :  { %4828 = vmatprep.subr.bf16.mxu0 %v9915_v45 }
 0x33d   :  { %4829 = vmatpush1.bf16.msra.mxu0 %v9913_v10 }
 0x33e   :  { %4830 = vmatprep.subr.bf16.mxu0 %v9918_v27 }
 0x341   :  { %4831 = vmatpush1.bf16.msra.mxu0 %v9916_v35 }
 0x342   :  { %4851 = vmatprep.subr.bf16.mxu0 %v9921_v20 }
 0x38c   :  { %v9644_v2 = vpop.permute.xlu1 %9643 }
 0x38d   :  { %v9646_v26 = vunpack.i.h.bf16 %v9644_v2  ;;  %v9645_v36 = vunpack.i.l.bf16 %v9644_v2 }
 0x38f   :  { %v3683_v39 = vrot.slane %v9646_v26, 2  ;;  %v3680_v15 = vrot.slane %v9645_v36, 2 }
 0x391   :  { %v3708_v21 = vsel %vm3703_vm8, %v9646_v26, %v3683_v39  ;;  %v9649_v12 = vpop.permute.xlu0 %9648  ;;  %v3705_v11 = vsel %vm3703_vm8, %v9645_v36, %v3680_v15 }
 0x392   :  { %v3756_v54 = vmax.f32 %v11910_v17, %v3708_v21  ;;  %v9651_v5 = vunpack.i.h.bf16 %v9649_v12  ;;  %v9650_v44 = vunpack.i.l.bf16 %v9649_v12  ;;  %v3753_v58 = vmax.f32 %v11904_v8, %v3705_v11 }
 0x394   :  { %v3689_v48 = vrot.slane %v9651_v5, 2  ;;  %v3851_v52 = vrot.slane %v3756_v54, %v11186_v24  ;;  %v3681_v32 = vrot.slane %v9650_v44, 2  ;;  %v3855_v38 = vrot.slane %v3756_v54, %v11775_v56  ;;  %v9659_v18 = vpop.permute.xlu1 %9658 }
 0x395   :  { %v3859_v49 = vrot.slane %v3756_v54, %v12101_v6  ;;  %v3815_v17 = vrot.slane %v3753_v58, %v11186_v24  ;;  %v3819_v47 = vrot.slane %v3753_v58, %v11775_v56  ;;  %v3823_v13 = vrot.slane %v3753_v58, %v12101_v6 }
 0x396   :  { %v3714_v40 = vsel %vm3703_vm8, %v9651_v5, %v3689_v48  ;;  %v4172_v7 = vpack.c.bf16 %v3851_v52, %v3851_v52  ;;  %v3706_v8 = vsel %vm3703_vm8, %v9650_v44, %v3681_v32  ;;  %v4173_v55 = vpack.c.bf16 %v3855_v38, %v3855_v38  ;;  %v9654_v44 = vpop.permute.xlu0 %9653 }
 0x397   :  { %v3762_v16 = vmax.f32 %v11943_v30, %v3714_v40  ;;  %v4174_v51 = vpack.c.bf16 %v3859_v49, %v3859_v49  ;;  %v4163_v31 = vpack.c.bf16 %v3815_v17, %v3815_v17  ;;  %v4164_v33 = vpack.c.bf16 %v3819_v47, %v3819_v47 }
 0x398   :  { %v4165_v45 = vpack.c.bf16 %v3823_v13, %v3823_v13  ;;  %v12113_v10 = vunpack.c.l.b16 %v4172_v7  ;;  %v3754_v27 = vmax.f32 %v11933_v4, %v3706_v8  ;;  %v9661_v35 = vunpack.i.h.bf16 %v9659_v18 }
 0x399   :  { %v9660_v2 = vunpack.i.l.bf16 %v9659_v18  ;;  %v3923_v26 = vrot.slane %v3762_v16, %v11186_v24  ;;  %v12117_v36 = vunpack.c.l.b16 %v4173_v55  ;;  %v12119_v20 = vunpack.c.l.b16 %v4174_v51 }
 0x39a   :  { %13988 = vst [vmem:[#allocation16_spill] sm:$0xff] %v12113_v10  ;;  %v3927_v30 = vrot.slane %v3762_v16, %v11775_v56  ;;  %v3693_v39 = vrot.slane %v9661_v35, 2  ;;  %v12122_v15 = vunpack.c.l.b16 %v4163_v31  ;;  %v3931_v21 = vrot.slane %v3762_v16, %v12101_v6 }
 0x39b   :  { %v3688_v12 = vrot.slane %v9660_v2, 2  ;;  %v12126_v11 = vunpack.c.l.b16 %v4164_v33  ;;  %v12128_v4 = vunpack.c.l.b16 %v4165_v45  ;;  %v3827_v5 = vrot.slane %v3754_v27, %v11186_v24  ;;  %v9669_v37 = vpop.permute.xlu1 %9668 }
 0x39c   :  { %v4190_v58 = vpack.c.bf16 %v3923_v26, %v3923_v26  ;;  %v3831_v48 = vrot.slane %v3754_v27, %v11775_v56  ;;  %v3835_v52 = vrot.slane %v3754_v27, %v12101_v6  ;;  %v3718_v32 = vsel %vm3703_vm8, %v9661_v35, %v3693_v39 }
 0x39d   :  { %v4191_v17 = vpack.c.bf16 %v3927_v30, %v3927_v30  ;;  %v4192_v13 = vpack.c.bf16 %v3931_v21, %v3931_v21  ;;  %v3713_v7 = vsel %vm3703_vm8, %v9660_v2, %v3688_v12  ;;  %v9656_v16 = vunpack.i.h.bf16 %v9654_v44 }
 0x39e   :  { %v3766_v55 = vmax.f32 %v11963_v43, %v3718_v32  ;;  %v9655_v51 = vunpack.i.l.bf16 %v9654_v44  ;;  %v12142_v31 = vunpack.c.l.b16 %v4190_v58  ;;  %v4166_v33 = vpack.c.bf16 %v3827_v5, %v3827_v5 }
 0x39f   :  { %v4167_v45 = vpack.c.bf16 %v3831_v48, %v3831_v48  ;;  %v4168_v27 = vpack.c.bf16 %v3835_v52, %v3835_v52  ;;  %v12144_v35 = vunpack.c.l.b16 %v4191_v17  ;;  %v3761_v26 = vmax.f32 %v11961_v46, %v3713_v7  ;;  %v12163_v7 = vpop.permute.xlu0 %9663 }
 0x3a0   :  { %v3692_v30 = vrot.slane %v9656_v16, 2  ;;  %v3682_v39 = vrot.slane %v9655_v51, 2  ;;  %v12150_v43 = vunpack.c.l.b16 %v4192_v13  ;;  %v3971_v44 = vrot.slane %v3766_v55, %v11186_v24 }
 0x3a1   :  { %13989 = vst [vmem:[#allocation17_spill] sm:$0xff] %v12144_v35  ;;  %v3975_v5 = vrot.slane %v3766_v55, %v11775_v56  ;;  %v12156_v46 = vunpack.c.l.b16 %v4166_v33  ;;  %v12158_v52 = vunpack.c.l.b16 %v4167_v45  ;;  %v12160_v32 = vunpack.c.l.b16 %v4168_v27 }
 0x3a2   :  { %v3717_v58 = vsel %vm3703_vm8, %v9656_v16, %v3692_v30  ;;  %v3707_v48 = vsel %vm3703_vm8, %v9655_v51, %v3682_v39  ;;  %v3979_v17 = vrot.slane %v3766_v55, %v12101_v6  ;;  %v4494_v18 = vrot.slane %v12142_v31, 7 }
 0x3a3   :  { %v4508_v0 = vrot.slane %v12144_v35, 7  ;;  %v3911_v16 = vrot.slane %v3761_v26, %v11186_v24  ;;  %v3915_v51 = vrot.slane %v3761_v26, %v11775_v56  ;;  %v3919_v33 = vrot.slane %v3761_v26, %v12101_v6 }
 0x3a4   :  { %v3765_v45 = vmax.f32 %v11965_v61, %v3717_v58  ;;  %v3755_v27 = vmax.f32 %v11939_v23, %v3707_v48  ;;  %v4522_v55 = vrot.slane %v12150_v43, 7  ;;  %v4202_v30 = vpack.c.bf16 %v3971_v44, %v3971_v44 }
 0x3a5   :  { %v4203_v39 = vpack.c.bf16 %v3975_v5, %v3975_v5  ;;  %v9665_v40 = vunpack.i.l.bf16 %v12163_v7  ;;  %v4445_v12 = vrot.slane %v12156_v46, 7  ;;  %v4480_v38 = vrot.slane %v12160_v32, 7 }
 0x3a6   :  { %v4204_v47 = vpack.c.bf16 %v3979_v17, %v3979_v17  ;;  %v4187_v61 = vpack.c.bf16 %v3911_v16, %v3911_v16  ;;  %v9666_v23 = vunpack.i.h.bf16 %v12163_v7  ;;  %v4188_v58 = vpack.c.bf16 %v3915_v51, %v3915_v51 }
 0x3a7   :  { %v4189_v48 = vpack.c.bf16 %v3919_v33, %v3919_v33  ;;  %v3959_v44 = vrot.slane %v3765_v45, %v11186_v24  ;;  %v3839_v5 = vrot.slane %v3755_v27, %v11186_v24  ;;  %v12183_v21 = vunpack.c.l.b16 %v4202_v30 }
 0x3a8   :  { %v12185_v49 = vunpack.c.l.b16 %v4203_v39  ;;  %v3847_v54 = vrot.slane %v3755_v27, %v12101_v6  ;;  %v3684_v17 = vrot.slane %v9665_v40, 2  ;;  %v12189_v2 = vunpack.c.l.b16 %v4204_v47 }
 0x3a9   :  { %v3967_v16 = vrot.slane %v3765_v45, %v12101_v6  ;;  %v4169_v7 = vpack.c.bf16 %v3839_v5, %v3839_v5  ;;  %v12194_v51 = vsel %vm4446_vm9, %v4445_v12, %v12122_v15  ;;  %v3963_v33 = vrot.slane %v3765_v45, %v11775_v56 }
 0x3aa   :  { %13990 = vst [vmem:[#allocation18_spill] sm:$0xff] %v12185_v49  ;;  %v4199_v30 = vpack.c.bf16 %v3959_v44, %v3959_v44  ;;  %v4171_v26 = vpack.c.bf16 %v3847_v54, %v3847_v54  ;;  %v12199_v39 = vsel %vm4446_vm9, %v4480_v38, %v12128_v4  ;;  %v12201_v8 = vunpack.c.l.b16 %v4187_v61 }
 0x3ab   :  { %v12203_v13 = vunpack.c.l.b16 %v4188_v58  ;;  %v12205_v47 = vunpack.c.l.b16 %v4189_v48  ;;  %v4498_v5 = vrot.slane %v12183_v21, 5  ;;  %v3694_v41 = vrot.slane %v9666_v23, 2 }
 0x3ac   :  { %13991 = vst [vmem:[#allocation19_spill] sm:$0xff] %v12201_v8  ;;  %v3709_v45 = vsel %vm3703_vm8, %v9665_v40, %v3684_v17  ;;  %v4201_v44 = vpack.c.bf16 %v3967_v16, %v3967_v16  ;;  %v3843_v38 = vrot.slane %v3755_v27, %v11775_v56  ;;  %v12212_v53 = vunpack.c.l.b16 %v4169_v7 }
 0x3ad   :  { %13992 = vst [vmem:[#allocation20_spill] sm:$0xff] %v12203_v13  ;;  %13993 = vst [vmem:[#allocation21_spill] sm:$0xff] %v12205_v47  ;;  %v4200_v58 = vpack.c.bf16 %v3963_v33, %v3963_v33  ;;  %v12215_v48 = vunpack.c.l.b16 %v4199_v30  ;;  %v12217_v14 = vunpack.c.l.b16 %v4171_v26  ;;  %v3757_v17 = vmax.f32 %v11945_v19, %v3709_v45 }
 0x3ae   :  { %v4495_v16 = vsel %vm4446_vm9, %v4494_v18, %v12201_v8  ;;  %v12228_v7 = vsel %vm4446_vm9, %v4508_v0, %v12203_v13  ;;  %v3719_v26 = vsel %vm3703_vm8, %v9666_v23, %v3694_v41  ;;  %v4523_v33 = vsel %vm4446_vm9, %v4522_v55, %v12205_v47  ;;  %v9674_v13 = vpop.permute.xlu0 %9673 }
 0x3af   :  { %13994 = vst [vmem:[#allocation22_spill] sm:$0xff] %v12228_v7  ;;  %v12233_v30 = vunpack.c.l.b16 %v4201_v44  ;;  %v4170_v61 = vpack.c.bf16 %v3843_v38, %v3843_v38  ;;  %v5423_v40 = vrot.slane %v12212_v53, 7  ;;  %v12237_v45 = vunpack.c.l.b16 %v4200_v58 }
 0x3b0   :  { %v4496_v18 = vrot.slane %v12215_v48, 6  ;;  %v5451_v28 = vrot.slane %v12217_v14, 7  ;;  %v3767_v41 = vmax.f32 %v11975_v34, %v3719_v26  ;;  %v3863_v55 = vrot.slane %v3757_v17, %v11186_v24 }
 0x3b1   :  { %13995 = vst [vmem:[#allocation23_spill] sm:$0xff] %v12233_v30  ;;  %13996 = vst [vmem:[#allocation24_spill] sm:$0xff] %v12237_v45  ;;  %v5424_v0 = vsel %vm4446_vm9, %v5423_v40, %v12156_v46  ;;  %v3871_v23 = vrot.slane %v3757_v17, %v12101_v6  ;;  %v4524_v12 = vrot.slane %v12233_v30, 6  ;;  %v12252_v19 = vunpack.c.l.b16 %v4170_v61 }
 0x3b2   :  { %v5452_v27 = vsel %vm4446_vm9, %v5451_v28, %v12160_v32  ;;  %v4175_v40 = vpack.c.bf16 %v3863_v55, %v3863_v55  ;;  %v4497_v26 = vsel %vm4449_vm10, %v4496_v18, %v4495_v16  ;;  %v13997_v44 = vrot.slane %v12113_v10, 6 }
 0x3b3   :  { %v4177_v54 = vpack.c.bf16 %v3871_v23, %v3871_v23  ;;  %v3983_v58 = vrot.slane %v3767_v41, %v11186_v24  ;;  %v14000_v61 = vrot.slane %v12119_v20, 6  ;;  %v3987_v18 = vrot.slane %v3767_v41, %v11775_v56 }
 0x3b4   :  { %v5426_v38 = vsel %vm4449_vm10, %v13997_v44, %v5424_v0  ;;  %v12261_v35 = vunpack.c.l.b16 %v4175_v40  ;;  %v3991_v34 = vrot.slane %v3767_v41, %v12101_v6  ;;  %v4525_v0 = vsel %vm4449_vm10, %v4524_v12, %v4523_v33 }
 0x3b5   :  { %v12263_v28 = vunpack.c.l.b16 %v4177_v54  ;;  %v5454_v55 = vsel %vm4449_vm10, %v14000_v61, %v5452_v27  ;;  %v4448_v54 = vrot.slane %v12212_v53, 6  ;;  %v12277_v27 = vsel %vm4452_vm11, %v4498_v5, %v4497_v26 }
 0x3b6   :  { %13998 = vst [vmem:[#allocation25_spill] sm:$0xff] %v12261_v35  ;;  %14001 = vst [vmem:[#allocation27_spill] sm:$0xff] %v12277_v27  ;;  %v4482_v61 = vrot.slane %v12217_v14, 6  ;;  %v3867_v23 = vrot.slane %v3757_v17, %v11775_v56  ;;  %v4205_v41 = vpack.c.bf16 %v3983_v58, %v3983_v58  ;;  %v5427_v10 = vrot.slane %v12261_v35, 5 }
 0x3b7   :  { %13999 = vst [vmem:[#allocation26_spill] sm:$0xff] %v12263_v28  ;;  %v5455_v12 = vrot.slane %v12263_v28, 5  ;;  %v9671_v33 = vunpack.i.h.bf16 %v9669_v37  ;;  %v4206_v44 = vpack.c.bf16 %v3987_v18, %v3987_v18  ;;  %v4207_v49 = vpack.c.bf16 %v3991_v34, %v3991_v34 }
 0x3b8   :  { %v9670_v45 = vunpack.i.l.bf16 %v9669_v37  ;;  %v9676_v40 = vunpack.i.h.bf16 %v9674_v13  ;;  %v12285_v7 = vsel %vm4452_vm11, %v5427_v10, %v5426_v38  ;;  %v9675_v16 = vunpack.i.l.bf16 %v9674_v13  ;;  %v12302_v13 = vpop.permute.xlu1 %9678 }
 0x3b9   :  { %14002 = vst [vmem:[#allocation28_spill] sm:$0xff] %v12285_v7  ;;  %v12288_v5 = vsel %vm4452_vm11, %v5455_v12, %v5454_v55  ;;  %v3695_v26 = vrot.slane %v9671_v33, 2  ;;  %v14003_v17 = vrot.slane %v12189_v2, 5  ;;  %v12295_v27 = vsel %vm4449_vm10, %v4448_v54, %v12194_v51 }
 0x3ba   :  { %14004 = vst [vmem:[#allocation29_spill] sm:$0xff] %v12295_v27  ;;  %v4176_v34 = vpack.c.bf16 %v3867_v23, %v3867_v23  ;;  %v3685_v37 = vrot.slane %v9670_v45, 2  ;;  %v4483_v10 = vsel %vm4449_vm10, %v4482_v61, %v12199_v39  ;;  %v12299_v38 = vunpack.c.l.b16 %v4205_v41 }
 0x3bb   :  { %v4527_v58 = vsel %vm4452_vm11, %v14003_v17, %v4525_v0  ;;  %v3720_v55 = vsel %vm3703_vm8, %v9671_v33, %v3695_v26  ;;  %v3696_v18 = vrot.slane %v9676_v40, 2  ;;  %v12305_v0 = vunpack.c.l.b16 %v4207_v49 }
 0x3bc   :  { %v3768_v51 = vmax.f32 %v11999_v60, %v3720_v55  ;;  %v3710_v54 = vsel %vm3703_vm8, %v9670_v45, %v3685_v37  ;;  %v12310_v17 = vunpack.c.l.b16 %v4206_v44  ;;  %v3686_v61 = vrot.slane %v9675_v16, 2  ;;  %v12347_v55 = vpop.permute.xlu1 %9688 }
 0x3bd   :  { %v3758_v39 = vmax.f32 %v11994_v42, %v3710_v54  ;;  %v12314_v33 = vunpack.c.l.b16 %v4176_v34  ;;  %v14006_v26 = vrot.slane %v12119_v20, 5  ;;  %v9681_v12 = vunpack.i.h.bf16 %v12302_v13 }
 0x3be   :  { %14005 = vst [vmem:[#allocation30_spill] sm:$0xff] %v12310_v17  ;;  %v4003_v45 = vrot.slane %v3768_v51, %v12101_v6  ;;  %v3721_v37 = vsel %vm3703_vm8, %v9676_v40, %v3696_v18  ;;  %v4528_v42 = vrot.slane %v12305_v0, 4  ;;  %v3995_v54 = vrot.slane %v3768_v51, %v11186_v24 }
 0x3bf   :  { %v4485_v49 = vsel %vm4452_vm11, %v14006_v26, %v4483_v10  ;;  %v3883_v44 = vrot.slane %v3758_v39, %v12101_v6  ;;  %v3711_v60 = vsel %vm3703_vm8, %v9675_v16, %v3686_v61  ;;  %v3999_v23 = vrot.slane %v3768_v51, %v11775_v56 }
 0x3c0   :  { %v3875_v7 = vrot.slane %v3758_v39, %v11186_v24  ;;  %v3769_v40 = vmax.f32 %v12001_v3, %v3721_v37  ;;  %v3697_v18 = vrot.slane %v9681_v12, 2  ;;  %v4210_v27 = vpack.c.bf16 %v4003_v45, %v4003_v45 }
 0x3c1   :  { %v4180_v41 = vpack.c.bf16 %v3883_v44, %v3883_v44  ;;  %v3879_v34 = vrot.slane %v3758_v39, %v11775_v56  ;;  %v4486_v44 = vrot.slane %v12263_v28, 4  ;;  %v4208_v16 = vpack.c.bf16 %v3995_v54, %v3995_v54 }
 0x3c2   :  { %v3759_v51 = vmax.f32 %v12007_v63, %v3711_v60  ;;  %v4529_v61 = vsel %vm4455_vm12, %v4528_v42, %v4527_v58  ;;  %v4209_v26 = vpack.c.bf16 %v3999_v23, %v3999_v23  ;;  %v4178_v39 = vpack.c.bf16 %v3875_v7, %v3875_v7 }
 0x3c3   :  { %v12336_v30 = vunpack.c.l.b16 %v4180_v41  ;;  %v4007_v41 = vrot.slane %v3769_v40, %v11186_v24  ;;  %v3722_v10 = vsel %vm3703_vm8, %v9681_v12, %v3697_v18  ;;  %v12349_v17 = vunpack.c.l.b16 %v4210_v27 }
 0x3c4   :  { %v4179_v54 = vpack.c.bf16 %v3879_v34, %v3879_v34  ;;  %v4011_v58 = vrot.slane %v3769_v40, %v11775_v56  ;;  %v4487_v60 = vsel %vm4455_vm12, %v4486_v44, %v4485_v49  ;;  %v12354_v42 = vunpack.c.l.b16 %v4208_v16 }
 0x3c5   :  { %14007 = vst [vmem:[#allocation31_spill] sm:$0xff] %v12336_v30  ;;  %v5457_v63 = vrot.slane %v12336_v30, 4  ;;  %v3895_v23 = vrot.slane %v3759_v51, %v12101_v6  ;;  %v9680_v7 = vunpack.i.l.bf16 %v12302_v13  ;;  %v4015_v18 = vrot.slane %v3769_v40, %v12101_v6 }
 0x3c6   :  { %14008 = vst [vmem:[#allocation32_spill] sm:$0xff] %v12354_v42  ;;  %v9691_v27 = vunpack.i.h.bf16 %v12347_v55  ;;  %v9690_v34 = vunpack.i.l.bf16 %v12347_v55  ;;  %v12363_v45 = vunpack.c.l.b16 %v4178_v39  ;;  %v4211_v37 = vpack.c.bf16 %v4007_v41, %v4007_v41  ;;  %v3654_v41 = vpop.permute.xlu1 %3653 }
 0x3c7   :  { %v5458_v12 = vsel %vm4455_vm12, %v5457_v63, %v12288_v5  ;;  %v4183_v3 = vpack.c.bf16 %v3895_v23, %v3895_v23  ;;  %v3770_v49 = vmax.f32 %v12009_v1, %v3722_v10  ;;  %v12366_v44 = vunpack.c.l.b16 %v4209_v26 }
 0x3c8   :  { %14009 = vst [vmem:[#allocation33_spill] sm:$0xff] %v12363_v45  ;;  %v4530_v16 = vrot.slane %v12349_v17, 3  ;;  %v12369_v13 = vunpack.c.l.b16 %v4179_v54  ;;  %v4212_v28 = vpack.c.bf16 %v4011_v58, %v4011_v58  ;;  %v3887_v63 = vrot.slane %v3759_v51, %v11186_v24 }
 0x3c9   :  { %14010 = vst [vmem:[#allocation34_spill] sm:$0xff] %v12366_v44  ;;  %v12374_v55 = vunpack.c.l.b16 %v4183_v3  ;;  %v4213_v1 = vpack.c.bf16 %v4015_v18, %v4015_v18  ;;  %v3687_v10 = vrot.slane %v9680_v7, 2  ;;  %v4488_v58 = vrot.slane %v12336_v30, 3 }
 0x3ca   :  { %v12381_v23 = vunpack.c.l.b16 %v4211_v37  ;;  %v12384_v40 = vsel %vm4458_vm13, %v4530_v16, %v4529_v61  ;;  %v3701_v39 = vrot.slane %v9691_v27, 2  ;;  %v3891_v18 = vrot.slane %v3759_v51, %v11775_v56 }
 0x3cb   :  { %14011 = vst [vmem:[#allocation35_spill] sm:$0xff] %v12374_v55  ;;  %14013 = vst [vmem:[#allocation37_spill] sm:$0xff] %v12384_v40  ;;  %v5459_v5 = vrot.slane %v12374_v55, 3  ;;  %v4181_v42 = vpack.c.bf16 %v3887_v63, %v3887_v63  ;;  %v3712_v26 = vsel %vm3703_vm8, %v9680_v7, %v3687_v10  ;;  %v12392_v35 = vunpack.c.l.b16 %v4213_v1  ;;  %v12404_v63 = vpop.permute.xlu0 %9683 }
 0x3cc   :  { %14012 = vst [vmem:[#allocation36_spill] sm:$0xff] %v12381_v23  ;;  %v3760_v61 = vmax.f32 %v12011_v9, %v3712_v26  ;;  %v12399_v16 = vsel %vm4458_vm13, %v4488_v58, %v4487_v60  ;;  %v12401_v3 = vunpack.c.l.b16 %v4212_v28  ;;  %v3698_v51 = vrot.slane %v9690_v34, 2 }
 0x3cd   :  { %v12395_v37 = vsel %vm4458_vm13, %v5459_v5, %v5458_v12  ;;  %14015 = vst [vmem:[#allocation39_spill] sm:$0xff] %v12399_v16  ;;  %v4019_v1 = vrot.slane %v3770_v49, %v11186_v24  ;;  %v3726_v12 = vsel %vm3703_vm8, %v9691_v27, %v3701_v39  ;;  %v4182_v5 = vpack.c.bf16 %v3891_v18, %v3891_v18 }
 0x3ce   :  { %14014 = vst [vmem:[#allocation38_spill] sm:$0xff] %v12395_v37  ;;  %14016 = vst [vmem:[#allocation40_spill] sm:$0xff] %v12401_v3  ;;  %v3899_v10 = vrot.slane %v3760_v61, %v11186_v24  ;;  %v12411_v60 = vunpack.c.l.b16 %v4181_v42  ;;  %v3907_v28 = vrot.slane %v3760_v61, %v12101_v6  ;;  %v4027_v58 = vrot.slane %v3770_v49, %v12101_v6 }
 0x3cf   :  { %v9686_v7 = vunpack.i.h.bf16 %v12404_v63  ;;  %v4023_v37 = vrot.slane %v3770_v49, %v11775_v56  ;;  %v12419_v27 = vmax.f32 %v12029_v25, %v3726_v12  ;;  %v3723_v39 = vsel %vm3703_vm8, %v9690_v34, %v3698_v51 }
 0x3d0   :  { %14017 = vst [vmem:[#allocation41_spill] sm:$0xff] %v12411_v60  ;;  %v4184_v54 = vpack.c.bf16 %v3899_v10, %v3899_v10  ;;  %v4186_v30 = vpack.c.bf16 %v3907_v28, %v3907_v28  ;;  %v4214_v9 = vpack.c.bf16 %v4019_v1, %v4019_v1  ;;  %v12426_v40 = vunpack.c.l.b16 %v4182_v5  ;;  %v9694_v1 = vpop.permute.xlu0 %9693 }
 0x3d1   :  { %14018 = vst [vmem:[#allocation42_spill] sm:$0xff] %v12419_v27  ;;  %v3690_v49 = vrot.slane %v3654_v41, 2  ;;  %v4216_v28 = vpack.c.bf16 %v4027_v58, %v4027_v58  ;;  %v14020_v25 = vrot.slane %v12201_v8, 7  ;;  %v3771_v51 = vmax.f32 %v12035_v50, %v3723_v39 }
 0x3d2   :  { %v12424_v26 = vunpack.c.l.b16 %v4184_v54  ;;  %14019 = vst [vmem:[#allocation43_spill] sm:$0xff] %v12426_v40  ;;  %v12429_v16 = vunpack.c.l.b16 %v4186_v30  ;;  %v3700_v12 = vrot.slane %v9686_v7, 2  ;;  %v4215_v54 = vpack.c.bf16 %v4023_v37, %v4023_v37 }
 0x3d3   :  { %v3903_v5 = vrot.slane %v3760_v61, %v11775_v56  ;;  %v14021_v42 = vrot.slane %v12205_v47, 7  ;;  %v4075_v58 = vrot.slane %v12419_v27, %v12101_v6  ;;  %v12449_v18 = vunpack.c.l.b16 %v4214_v9 }
 0x3d4   :  { %v12435_v34 = vsel %vm4446_vm9, %v14020_v25, %v12424_v26  ;;  %v9685_v50 = vunpack.i.l.bf16 %v12404_v63  ;;  %v3715_v39 = vsel %vm3703_vm8, %v3654_v41, %v3690_v49  ;;  %v9696_v47 = vunpack.i.h.bf16 %v9694_v1 }
 0x3d5   :  { %v12443_v30 = vsel %vm4446_vm9, %v14021_v42, %v12429_v16  ;;  %v12455_v42 = vunpack.c.l.b16 %v4216_v28  ;;  %v4031_v8 = vrot.slane %v3771_v51, %v11186_v24  ;;  %v3725_v23 = vsel %vm3703_vm8, %v9686_v7, %v3700_v12 }
 0x3d6   :  { %v3763_v10 = vmax.f32 %v12055_v29, %v3715_v39  ;;  %v12460_v25 = vunpack.c.l.b16 %v4215_v54  ;;  %v4185_v9 = vpack.c.bf16 %v3903_v5, %v3903_v5  ;;  %v4228_v45 = vpack.c.bf16 %v4075_v58, %v4075_v58 }
 0x3d7   :  { %v4035_v63 = vrot.slane %v3771_v51, %v11775_v56  ;;  %v3699_v61 = vrot.slane %v9685_v50, 2  ;;  %v3773_v55 = vmax.f32 %v12020_v57, %v3725_v23  ;;  %v3679_v7 = vrot.slane %v9696_v47, 2 }
 0x3d8   :  { %v3935_v41 = vrot.slane %v3763_v10, %v11186_v24  ;;  %v3943_v49 = vrot.slane %v3763_v10, %v12101_v6  ;;  %v9695_v12 = vunpack.i.l.bf16 %v9694_v1  ;;  %v12470_v54 = vrot.slane %v3771_v51, %v12101_v6 }
 0x3d9   :  { %v4217_v5 = vpack.c.bf16 %v4031_v8, %v4031_v8  ;;  %v12473_v37 = vunpack.c.l.b16 %v4185_v9  ;;  %v12475_v60 = vunpack.c.l.b16 %v4228_v45  ;;  %v4218_v27 = vpack.c.bf16 %v4035_v63, %v4035_v63 }
 0x3da   :  { %v4193_v58 = vpack.c.bf16 %v3935_v41, %v3935_v41  ;;  %v3724_v23 = vsel %vm3703_vm8, %v9685_v50, %v3699_v61  ;;  %v4195_v1 = vpack.c.bf16 %v3943_v49, %v3943_v49  ;;  %v4055_v29 = vrot.slane %v3773_v55, %v11186_v24 }
 0x3db   :  { %v3704_v8 = vsel %vm3703_vm8, %v9696_v47, %v3679_v7  ;;  %v3691_v41 = vrot.slane %v9695_v12, 2  ;;  %v12484_v39 = vunpack.c.l.b16 %v4217_v5  ;;  %v4059_v45 = vrot.slane %v3773_v55, %v11775_v56 }
 0x3dc   :  { %v5417_v51 = vunpack.c.l.b16 %v4193_v58  ;;  %v5419_v63 = vunpack.c.l.b16 %v4195_v1  ;;  %v12488_v28 = vrot.slane %v3773_v55, %v12101_v6  ;;  %v3752_v50 = vmax.f32 %v12044_v62, %v3704_v8 }
 0x3dd   :  { %v3716_v61 = vsel %vm3703_vm8, %v9695_v12, %v3691_v41  ;;  %v12492_v49 = vunpack.c.l.b16 %v4218_v27  ;;  %v3772_v47 = vmax.f32 %v12018_v22, %v3724_v23  ;;  %v4223_v5 = vpack.c.bf16 %v4055_v29, %v4055_v29 }
 0x3de   :  { %v5465_v57 = vrot.slane %v5417_v51, 7  ;;  %v5493_v7 = vrot.slane %v5419_v63, 7  ;;  %v12496_v58 = vmax.f32 %v12039_v59, %v3716_v61  ;;  %v3939_v9 = vrot.slane %v3763_v10, %v11775_v56 }
 0x3df   :  { %v3803_v1 = vrot.slane %v3752_v50, %v11186_v24  ;;  %v4224_v51 = vpack.c.bf16 %v4059_v45, %v4059_v45  ;;  %v14022_v62 = vrot.slane %v12183_v21, 6  ;;  %v3811_v12 = vrot.slane %v3752_v50, %v12101_v6 }
 0x3e0   :  { %v5466_v55 = vsel %vm4446_vm9, %v5465_v57, %v12142_v31  ;;  %v5494_v22 = vsel %vm4446_vm9, %v5493_v7, %v12150_v43  ;;  %v14023_v10 = vrot.slane %v12299_v38, 5  ;;  %v14025_v31 = vrot.slane %v12189_v2, 6 }
 0x3e1   :  { %v5468_v27 = vsel %vm4449_vm10, %v14022_v62, %v5466_v55  ;;  %v4160_v23 = vpack.c.bf16 %v3803_v1, %v3803_v1  ;;  %v4043_v8 = vrot.slane %v3772_v47, %v11186_v24  ;;  %v14026_v41 = vrot.slane %v12305_v0, 5 }
 0x3e2   :  { %v12513_v29 = vsel %vm4452_vm11, %v14023_v10, %v5468_v27  ;;  %v5496_v57 = vsel %vm4449_vm10, %v14025_v31, %v5494_v22  ;;  %v4162_v45 = vpack.c.bf16 %v3811_v12, %v3811_v12  ;;  %v3947_v63 = vrot.slane %v12496_v58, %v11186_v24 }
 0x3e3   :  { %14024 = vst [vmem:[#allocation44_spill] sm:$0xff] %v12513_v29  ;;  %v5498_v43 = vsel %vm4452_vm11, %v14026_v41, %v5496_v57  ;;  %v4047_v61 = vrot.slane %v3772_v47, %v11775_v56  ;;  %v14027_v7 = vrot.slane %v12349_v17, 4  ;;  %v4908_v62 = vunpack.c.l.b16 %v4160_v23  ;;  %v14060_v29 = vld [vmem:[#allocation33_spill] sm:$0xff] }
 0x3e4   :  { %v3955_v1 = vrot.slane %v12496_v58, %v12101_v6  ;;  %v4051_v27 = vrot.slane %v3772_v47, %v12101_v6  ;;  %v14028_v22 = vrot.slane %v12392_v35, 3  ;;  %v4910_v12 = vunpack.c.l.b16 %v4162_v45 }
 0x3e5   :  { %v5500_v55 = vsel %vm4455_vm12, %v14027_v7, %v5498_v43  ;;  %v4196_v31 = vpack.c.bf16 %v3947_v63, %v3947_v63  ;;  %v12536_v57 = vunpack.c.l.b16 %v4223_v5  ;;  %v4194_v41 = vpack.c.bf16 %v3939_v9, %v3939_v9 }
 0x3e6   :  { %v12534_v10 = vsel %vm4458_vm13, %v14028_v22, %v5500_v55  ;;  %v14030_v59 = vrot.slane %v12122_v15, 7  ;;  %v4198_v43 = vpack.c.bf16 %v3955_v1, %v3955_v1  ;;  %v14031_v7 = vrot.slane %v12156_v46, 6 }
 0x3e7   :  { %14029 = vst [vmem:[#allocation45_spill] sm:$0xff] %v12534_v10  ;;  %v14032_v6 = vrot.slane %v12128_v4, 7  ;;  %v4911_v45 = vunpack.c.l.b16 %v4196_v31  ;;  %v14033_v5 = vrot.slane %v12158_v52, 7  ;;  %v3807_v15 = vrot.slane %v3752_v50, %v11775_v56 }
 0x3e8   :  { %v4915_v23 = vsel %vm4446_vm9, %v14030_v59, %v4908_v62  ;;  %v14034_v59 = vrot.slane %v12212_v53, 5  ;;  %v14035_v46 = vrot.slane %v12160_v32, 6  ;;  %v4913_v4 = vunpack.c.l.b16 %v4198_v43 }
 0x3e9   :  { %v4917_v47 = vsel %vm4449_vm10, %v14031_v7, %v4915_v23  ;;  %v4943_v55 = vsel %vm4446_vm9, %v14032_v6, %v4910_v12  ;;  %v4467_v9 = vsel %vm4446_vm9, %v14033_v5, %v12126_v11  ;;  %v4220_v1 = vpack.c.bf16 %v4043_v8, %v4043_v8 }
 0x3ea   :  { %v12555_v63 = vsel %vm4452_vm11, %v14034_v59, %v4917_v47  ;;  %v4945_v62 = vsel %vm4449_vm10, %v14035_v46, %v4943_v55  ;;  %v14036_v6 = vrot.slane %v12217_v14, 5  ;;  %v4958_v12 = vrot.slane %v4911_v45, 6 }
 0x3eb   :  { %v14037_v31 = vrot.slane %v12252_v19, 6  ;;  %v4221_v23 = vpack.c.bf16 %v4047_v61, %v4047_v61  ;;  %v4222_v53 = vpack.c.bf16 %v4051_v27, %v4051_v27  ;;  %v14038_v7 = vrot.slane %v12119_v20, 4 }
 0x3ec   :  { %v4947_v22 = vsel %vm4452_vm11, %v14036_v6, %v4945_v62  ;;  %v4986_v32 = vrot.slane %v4913_v4, 6  ;;  %v12571_v55 = vunpack.c.l.b16 %v4224_v51  ;;  %v12573_v8 = vunpack.c.l.b16 %v4194_v41 }
 0x3ed   :  { %v4469_v50 = vsel %vm4449_vm10, %v14037_v31, %v4467_v9  ;;  %v12569_v47 = vsel %vm4455_vm12, %v14038_v7, %v4947_v22  ;;  %v4959_v14 = vsel %vm4449_vm10, %v4958_v12, %v12435_v34  ;;  %v4472_v43 = vrot.slane %v12314_v33, 4  ;;  %v14041_v9 = vld [vmem:[#allocation23_spill] sm:$0xff]  ;;  %v14044_v31 = vld [vmem:[#allocation22_spill] sm:$0xff] }
 0x3ee   :  { %v4161_v45 = vpack.c.bf16 %v3807_v15, %v3807_v15  ;;  %v14039_v5 = vrot.slane %v12215_v48, 5  ;;  %v4987_v20 = vsel %vm4449_vm10, %v4986_v32, %v12443_v30  ;;  %v14040_v27 = vrot.slane %v12117_v36, 5  ;;  %v14047_v32 = vld [vmem:[#allocation30_spill] sm:$0xff] }
 0x3ef   :  { %v12588_v41 = vunpack.c.l.b16 %v4220_v1  ;;  %v14042_v59 = vrot.slane %v14041_v9, 5  ;;  %v4474_v48 = vrot.slane %v12369_v13, 3  ;;  %v12595_v46 = vunpack.c.l.b16 %v4221_v23 }
 0x3f0   :  { %v12581_v61 = vsel %vm4452_vm11, %v14039_v5, %v4959_v14  ;;  %v4471_v51 = vsel %vm4452_vm11, %v14040_v27, %v4469_v50  ;;  %v12597_v62 = vunpack.c.l.b16 %v4222_v53  ;;  %v14043_v30 = vrot.slane %v12189_v2, 4  ;;  %v14045_v50 = vld [vmem:[#allocation24_spill] sm:$0xff] }
 0x3f1   :  { %v4989_v34 = vsel %vm4452_vm11, %v14042_v59, %v4987_v20  ;;  %v4473_v15 = vsel %vm4455_vm12, %v4472_v43, %v4471_v51  ;;  %v4476_v1 = vrot.slane %v12426_v40, 2  ;;  %v3951_v6 = vrot.slane %v12496_v58, %v11775_v56  ;;  %v14048_v20 = vld [vmem:[#allocation18_spill] sm:$0xff] }
 0x3f2   :  { %v12602_v4 = vsel %vm4455_vm12, %v14043_v30, %v4989_v34  ;;  %v4475_v22 = vsel %vm4458_vm13, %v4474_v48, %v4473_v15  ;;  %v4478_v12 = vrot.slane %v12473_v37, 1  ;;  %v14046_v23 = vrot.slane %v14045_v50, 6  ;;  %v14050_v34 = vld [vmem:[#allocation29_spill] sm:$0xff]  ;;  %v14053_v30 = vld [vmem:[#allocation27_spill] sm:$0xff] }
 0x3f3   :  { %v4909_v7 = vunpack.c.l.b16 %v4161_v45  ;;  %v4477_v2 = vsel %vm4461_vm14, %v4476_v1, %v4475_v22  ;;  %v4514_v14 = vrot.slane %v14047_v32, 4  ;;  %v4516_v43 = vrot.slane %v12366_v44, 3  ;;  %v14051_v45 = vld [vmem:[#allocation16_spill] sm:$0xff] }
 0x3f4   :  { %v4511_v53 = vsel %vm4449_vm10, %v14046_v23, %v14044_v31  ;;  %v4479_v5 = vsel %vm4464_vm15, %v4478_v12, %v4477_v2  ;;  %v14049_v58 = vrot.slane %v14048_v20, 5  ;;  %v4518_v51 = vrot.slane %v12401_v3, 2  ;;  %v14055_v12 = vld [vmem:[#allocation42_spill] sm:$0xff] }
 0x3f5   :  { %v4520_v9 = vrot.slane %v12460_v25, 1  ;;  %v14052_v15 = vrot.slane %v14051_v45, 5  ;;  %v14054_v1 = vrot.slane %v12299_v38, 4  ;;  %v4071_v31 = vrot.slane %v14055_v12, %v11775_v56 }
 0x3f6   :  { %v4513_v27 = vsel %vm4452_vm11, %v14049_v58, %v4511_v53  ;;  %v14056_v53 = vld [vmem:[#allocation25_spill] sm:$0xff]  ;;  %v14061_v3 = vrot.slane %v14060_v29, 3 }
 0x3f7   :  { %v4515_v59 = vsel %vm4455_vm12, %v4514_v14, %v4513_v27  ;;  %v4453_v48 = vsel %vm4452_vm11, %v14052_v15, %v14050_v34  ;;  %v4501_v22 = vsel %vm4455_vm12, %v14054_v1, %v14053_v30  ;;  %v14057_v2 = vrot.slane %v14056_v53, 4  ;;  %v14058_v14 = vld [vmem:[#allocation32_spill] sm:$0xff] }
 0x3f8   :  { %v4517_v23 = vsel %vm4458_vm13, %v4516_v43, %v4515_v59  ;;  %v14059_v27 = vrot.slane %v14058_v14, 3  ;;  %v4542_v34 = vrot.slane %v12595_v46, 7  ;;  %v14062_v1 = vld [vmem:[#allocation36_spill] sm:$0xff]  ;;  %v4227_v59 = vpack.c.bf16 %v4071_v31, %v4071_v31 }
 0x3f9   :  { %v4456_v58 = vsel %vm4455_vm12, %v14057_v2, %v4453_v48  ;;  %v4519_v15 = vsel %vm4461_vm14, %v4518_v51, %v4517_v23  ;;  %v14063_v56 = vrot.slane %v14062_v1, 2  ;;  %v14064_v48 = vld [vmem:[#allocation41_spill] sm:$0xff]  ;;  %v4544_v31 = vrot.slane %v12571_v55, 6 }
 0x3fa   :  { %v4503_v10 = vsel %vm4458_vm13, %v14059_v27, %v4501_v22  ;;  %v4459_v30 = vsel %vm4458_vm13, %v14061_v3, %v4456_v58  ;;  %v4521_v44 = vsel %vm4464_vm15, %v4520_v9, %v4519_v15  ;;  %v14065_v2 = vrot.slane %v14064_v48, 2  ;;  %v9919_v3 = vld [vmem:[%s13909_s5 + $0x270] ss:$8 sps:$4 sm:$0xff]  }
 0x3fb   :  { %v4505_v43 = vsel %vm4461_vm14, %v14063_v56, %v4503_v10  ;;  %v14066_v22 = vrot.slane %v12449_v18, 1  ;;  %v4543_v51 = vsel %vm4446_vm9, %v4542_v34, %v12492_v49  ;;  %v4555_v23 = vpack.c.b16 %v4521_v44, %v4479_v5 }
 0x3fc   :  { %v4462_v40 = vsel %vm4461_vm14, %v14065_v2, %v4459_v30  ;;  %v14067_v56 = vrot.slane %v12424_v26, 1  ;;  %v12663_v9 = vunpack.c.l.b16 %v4227_v59  ;;  %v4197_v58 = vpack.c.bf16 %v3951_v6, %v3951_v6  ;;  %v9924_v30 = vld [vmem:[%s13909_s5 + $0x284] ss:$8 sps:$4 sm:$0xff]  }
 0x3fd   :  { %v4507_v27 = vsel %vm4464_vm15, %v14066_v22, %v4505_v43  ;;  %v4067_v44 = vrot.slane %v14055_v12, %v11186_v24  ;;  %v4536_v5 = vrot.slane %v12588_v41, 7  ;;  %v5479_v34 = vrot.slane %v12573_v8, 7  ;;  %4832 = vmatprep.mubr.bf16.mxu0 %v4555_v23 }
 0x3fe   :  { %v4465_v10 = vsel %vm4464_vm15, %v14067_v56, %v4462_v40  ;;  %14068 = vst [vmem:[#allocation23_spill] sm:$0xff] %v12663_v9  ;;  %v4545_v40 = vsel %vm4449_vm10, %v4544_v31, %v4543_v51  ;;  %v4546_v43 = vrot.slane %v12663_v9, 5  ;;  %v4538_v59 = vrot.slane %v12536_v57, 6  ;;  %v9922_v51 = vld [vmem:[%s13909_s5 + $0x280] ss:$8 sps:$4 sm:$0xff]  }
 0x3ff   :  { %v4554_v15 = vpack.c.b16 %v4507_v27, %v4465_v10  ;;  %v14069_v6 = vpack.c.bf16 %v12488_v28, %v12488_v28  ;;  %v14070_v22 = vrot.slane %v12126_v11, 7  ;;  %v4226_v27 = vpack.c.bf16 %v4067_v44, %v4067_v44  ;;  %v14071_v56 = vld [vmem:[#allocation39_spill] sm:$0xff]  ;;  %v14074_v11 = vld [vmem:[#allocation37_spill] sm:$0xff] }
 0x400   :  { %v4537_v8 = vsel %vm4446_vm9, %v4536_v5, %v12484_v39  ;;  %v4547_v23 = vsel %vm4452_vm11, %v4546_v43, %v4545_v40  ;;  %v14072_v28 = vld [vmem:[#allocation35_spill] sm:$0xff]  ;;  %v4548_v44 = vrot.slane %v12597_v62, 7  ;;  %v14082_v9 = vrot.slane %v12455_v42, 1 }
 0x401   :  { %v12679_v2 = vunpack.c.l.b16 %v14069_v6  ;;  %v4929_v12 = vsel %vm4446_vm9, %v14070_v22, %v4909_v7  ;;  %4833 = vmatmul.mubr.bf16.vlgmr.msra.gmra.mrb[44].mxu0 %v4554_v15  ;;  %v14073_v10 = vrot.slane %v14072_v28, 2  ;;  %v14075_v7 = vrot.slane %v12392_v35, 2  ;;  %v9927_v43 = vld [vmem:[%s13909_s5 + $0x294] ss:$8 sps:$4 sm:$0xff]  }
 0x402   :  { %4852 = vmatpush1.bf16.msra.mxu0 %v9919_v3  ;;  %v14076_v3 = vpack.c.bf16 %v12470_v54, %v12470_v54  ;;  %v4912_v6 = vunpack.c.l.b16 %v4197_v58  ;;  %v4558_v40 = vpack.c.b16 %v4547_v23, %v4547_v23  ;;  %v12707_v22 = vunpack.c.l.b16 %v4226_v27 }
 0x403   :  { %v4491_v31 = vsel %vm4461_vm14, %v14073_v10, %v14071_v56  ;;  %v4533_v15 = vsel %vm4461_vm14, %v14075_v7, %v14074_v11  ;;  %4853 = vmatprep.subr.bf16.mxu0 %v9924_v30  ;;  %v14077_v56 = vld [vmem:[#allocation20_spill] sm:$0xff]  ;;  %v14079_v7 = vld [vmem:[#allocation17_spill] sm:$0xff]  ;;  %v4539_v54 = vsel %vm4449_vm10, %v4538_v59, %v4537_v8  ;;  %v14080_v58 = vrot.slane %v12158_v52, 6 }
 0x404   :  { %v12702_v5 = vunpack.c.l.b16 %v14076_v3  ;;  %v14078_v10 = vrot.slane %v14077_v56, 7  ;;  %v5480_v24 = vsel %vm4446_vm9, %v5479_v34, %v14079_v7  ;;  %4842 = vmatprep.mubr.bf16.mxu0 %v4558_v40  ;;  %v4540_v23 = vrot.slane %v12707_v22, 5 }
 0x405   :  { %v4931_v30 = vsel %vm4449_vm10, %v14080_v58, %v4929_v12  ;;  %v14081_v27 = vrot.slane %v12429_v16, 1  ;;  %v4550_v34 = vrot.slane %v12679_v2, 6  ;;  %v5433_v59 = vrot.slane %v12424_v26, 2  ;;  %v9940_v26 = vld [vmem:[%s13909_s5] ss:$8 sps:$4 sm:$0xff]  }
 0x406   :  { %v4971_v11 = vsel %vm4446_vm9, %v14078_v10, %v12473_v37  ;;  %v12728_v10 = vsel %vm4464_vm15, %v14082_v9, %v4533_v15  ;;  %v5477_v12 = vrot.slane %v12484_v39, 1  ;;  %4854 = vmatpush1.bf16.msra.mxu0 %v9922_v51  ;;  %v4549_v40 = vsel %vm4446_vm9, %v4548_v44, %v12702_v5  ;;  %v9925_v9 = vld [vmem:[%s13909_s5 + $0x290] ss:$8 sps:$4 sm:$0xff]  }
 0x407   :  { %v12723_v3 = vsel %vm4464_vm15, %v14081_v27, %v4491_v31  ;;  %v4972_v7 = vrot.slane %v4912_v6, 6  ;;  %4855 = vmatprep.subr.bf16.mxu0 %v9927_v43  ;;  %v4541_v15 = vsel %vm4452_vm11, %v4540_v23, %v4539_v54  ;;  %v14083_v58 = vrot.slane %v12252_v19, 5  ;;  %v9930_v6 = vld [vmem:[%s13909_s5 + $0x2a4] ss:$8 sps:$4 sm:$0xff]  }
 0x408   :  { %v14084_v8 = vrot.slane %v14048_v20, 6  ;;  %v4557_v44 = vpack.c.b16 %v4541_v15, %v4541_v15  ;;  %v4934_v43 = vrot.slane %v12117_v36, 4  ;;  %v12756_v54 = vsel %vm4449_vm10, %v4550_v34, %v4549_v40 }
 0x409   :  { %v4933_v27 = vsel %vm4452_vm11, %v14083_v58, %v4931_v30  ;;  %v4936_v23 = vrot.slane %v12314_v33, 3  ;;  %v14086_v58 = vrot.slane %v14056_v53, 3  ;;  %v14087_v34 = vrot.slane %v12183_v21, 4 }
 0x40a   :  { %v12747_v51 = vsel %vm4449_vm10, %v14084_v8, %v5480_v24  ;;  %v14085_v24 = vrot.slane %v14051_v45, 4  ;;  %4843 = vmatmul.mubr.bf16.gmra.mrb[48].mxu0 %v4557_v44  ;;  %v4935_v15 = vsel %vm4455_vm12, %v4934_v43, %v4933_v27  ;;  %v5004_v30 = vrot.slane %v12492_v49, 7  ;;  %v9928_v45 = vld [vmem:[%s13909_s5 + $0x2a0] ss:$8 sps:$4 sm:$0xff]  }
 0x40b   :  { %v4963_v40 = vsel %vm4455_vm12, %v14087_v34, %v12581_v61  ;;  %4856 = vmatpush1.bf16.msra.mxu0 %v9925_v9  ;;  %v4973_v27 = vsel %vm4449_vm10, %v4972_v7, %v4971_v11  ;;  %v14089_v53 = vrot.slane %v14060_v29, 2  ;;  %v14090_v43 = vrot.slane %v12299_v38, 3  ;;  %v9933_v9 = vld [vmem:[%s13909_s5 + $0x2b4] ss:$8 sps:$4 sm:$0xff]  }
 0x40c   :  { %v4921_v8 = vsel %vm4455_vm12, %v14085_v24, %v12555_v63  ;;  %v14088_v63 = vmov 0   ;;  %v5006_v61 = vrot.slane %v12595_v46, 6  ;;  %4857 = vmatprep.subr.bf16.mxu0 %v9930_v6  ;;  %v4938_v24 = vrot.slane %v12369_v13, 2 }
 0x40d   :  { %v4923_v31 = vsel %vm4458_vm13, %v14086_v58, %v4921_v8  ;;  %4883 = vmatprep.mubr.bf16.mxu0 %v14088_v63  ;;  %v4965_v21 = vsel %vm4458_vm13, %v14090_v43, %v4963_v40  ;;  %v14091_v8 = vrot.slane %v14064_v48, 1  ;;  %v5005_v7 = vsel %vm4446_vm9, %v5004_v30, %v12460_v25 }
 0x40e   :  { %v4925_v44 = vsel %vm4461_vm14, %v14089_v53, %v4923_v31  ;;  %v14092_v31 = vrot.slane %v14058_v14, 2  ;;  %v12800_v6 = vsel %vm4458_vm13, %v4936_v23, %v4935_v15  ;;  %v14093_v58 = vrot.slane %v14062_v1, 1  ;;  %v9931_v15 = vld [vmem:[%s13909_s5 + $0x2b0] ss:$8 sps:$4 sm:$0xff]  }
 0x40f   :  { %v12792_v11 = vsel %vm4464_vm15, %v14091_v8, %v4925_v44  ;;  %v5007_v40 = vsel %vm4449_vm10, %v5006_v61, %v5005_v7  ;;  %v5008_v53 = vrot.slane %v12571_v55, 5  ;;  %v14094_v44 = vrot.slane %v14045_v50, 5  ;;  %4858 = vmatpush1.bf16.msra.mxu0 %v9928_v45  ;;  %v14095_v50 = vld [vmem:[#allocation26_spill] sm:$0xff]  ;;  %v9936_v45 = vld [vmem:[%s13909_s5 + $0x2c4] ss:$8 sps:$4 sm:$0xff]  }
 0x410   :  { %v4967_v38 = vsel %vm4461_vm14, %v14092_v31, %v4965_v21  ;;  %v4998_v30 = vrot.slane %v12484_v39, 7  ;;  %v5000_v23 = vrot.slane %v12588_v41, 6  ;;  %v4976_v61 = vrot.slane %v14048_v20, 4  ;;  %4859 = vmatprep.subr.bf16.mxu0 %v9933_v9 }
 0x411   :  { %v12805_v34 = vsel %vm4464_vm15, %v14093_v58, %v4967_v38  ;;  %v4975_v43 = vsel %vm4452_vm11, %v14094_v44, %v4973_v27  ;;  %v12821_v8 = vsel %vm4452_vm11, %v5008_v53, %v5007_v40  ;;  %v14096_v27 = vrot.slane %v14095_v50, 3  ;;  %v14098_v40 = vld [vmem:[#allocation31_spill] sm:$0xff] }
 0x412   :  { %v5016_v21 = vpack.c.b16 %v12805_v34, %v12792_v11  ;;  %v14097_v38 = vrot.slane %v12305_v0, 3  ;;  %v4999_v20 = vsel %vm4446_vm9, %v4998_v30, %v12449_v18  ;;  %v5002_v58 = vrot.slane %v12536_v57, 5  ;;  %v9999_v34 = vld [vmem:[%s13909_s5 + $0x134] ss:$8 sps:$4 sm:$0xff]  }
 0x413   :  { %v4951_v31 = vsel %vm4458_vm13, %v14096_v27, %v12569_v47  ;;  %v14099_v53 = vrot.slane %v14098_v40, 2  ;;  %v14100_v47 = vrot.slane %v12349_v17, 2  ;;  %v14101_v9 = vrot.slane %v14072_v28, 1  ;;  %4860 = vmatpush1.bf16.msra.mxu0 %v9931_v15  ;;  %v9939_v15 = vld [vmem:[%s13909_s5 + $0x2d4] ss:$8 sps:$4 sm:$0xff]  }
 0x414   :  { %v4993_v7 = vsel %vm4458_vm13, %v14097_v38, %v12602_v4  ;;  %v5001_v4 = vsel %vm4449_vm10, %v5000_v23, %v4999_v20  ;;  %v14102_v27 = vrot.slane %v12392_v35, 1  ;;  %v5010_v38 = vrot.slane %v12702_v5, 7  ;;  %v9934_v35 = vld [vmem:[%s13909_s5 + $0x2c0] ss:$8 sps:$4 sm:$0xff]   ;;  %4861 = vmatprep.subr.bf16.mxu0 %v9936_v45 }
 0x415   :  { %v4953_v44 = vsel %vm4461_vm14, %v14099_v53, %v4951_v31  ;;  %v4995_v0 = vsel %vm4461_vm14, %v14100_v47, %v4993_v7  ;;  %v4978_v31 = vrot.slane %v14047_v32, 3  ;;  %v12857_v17 = vsel %vm4452_vm11, %v5002_v58, %v5001_v4  ;;  %v14105_v4 = vld [vmem:[#allocation43_spill] sm:$0xff] }
 0x416   :  { %v12847_v50 = vsel %vm4464_vm15, %v14101_v9, %v4953_v44  ;;  %v12852_v30 = vsel %vm4464_vm15, %v14102_v27, %v4995_v0  ;;  %v5012_v28 = vrot.slane %v12597_v62, 6  ;;  %v5011_v7 = vsel %vm4446_vm9, %v5010_v38, %v12455_v42 }
 0x417   :  { %v5018_v23 = vpack.c.b16 %v12852_v30, %v12847_v50  ;;  %v5014_v20 = vrot.slane %v12679_v2, 5  ;;  %v14103_v40 = vrot.slane %v12252_v19, 7  ;;  %v5443_v53 = vrot.slane %v12369_v13, 4  ;;  %4862 = vmatpush1.bf16.msra.mxu0 %v9934_v35  ;;  %v9942_v35 = vld [vmem:[%s13909_s5 + $0x4] ss:$8 sps:$4 sm:$0xff]  }
 0x418   :  { %v5013_v44 = vsel %vm4449_vm10, %v5012_v28, %v5011_v7  ;;  %v14104_v47 = vrot.slane %v12117_v36, 6  ;;  %v5445_v9 = vrot.slane %v14105_v4, 3  ;;  %v5447_v27 = vrot.slane %v12473_v37, 2  ;;  %4863 = vmatprep.subr.bf16.mxu0 %v9939_v15  ;;  %v9943_v13 = vld [vmem:[%s13909_s5 + $0x10] ss:$8 sps:$4 sm:$0xff]  }
 0x419   :  { %v5438_v58 = vsel %vm4446_vm9, %v14103_v40, %v12158_v52  ;;  %v4977_v19 = vsel %vm4455_vm12, %v4976_v61, %v4975_v43  ;;  %v12884_v52 = vsel %vm4452_vm11, %v5014_v20, %v5013_v44  ;;  %v14106_v45 = vrot.slane %v12314_v33, 5  ;;  %v9937_v33 = vld [vmem:[%s13909_s5 + $0x2d0] ss:$8 sps:$4 sm:$0xff]   ;;  %v10020_v30 = vld [vmem:[%s13909_s5 + $0x314] ss:$8 sps:$4 sm:$0xff]  }
 0x41a   :  { %v5440_v0 = vsel %vm4449_vm10, %v14104_v47, %v5438_v58  ;;  %v14107_v28 = vrot.slane %v14047_v32, 5  ;;  %v5449_v40 = vrot.slane %v14077_v56, 1  ;;  %v14108_v58 = vld [vmem:[#allocation34_spill] sm:$0xff]  ;;  %v14109_v47 = vld [vmem:[#allocation40_spill] sm:$0xff]  ;;  %v5489_v20 = vrot.slane %v12460_v25, 2 }
 0x41b   :  { %v5442_v38 = vsel %vm4452_vm11, %v14106_v45, %v5440_v0  ;;  %v5485_v37 = vrot.slane %v14108_v58, 4  ;;  %v5487_v43 = vrot.slane %v14109_v47, 3  ;;  %v5491_v32 = vrot.slane %v12492_v49, 1  ;;  %v14113_v45 = vld [vmem:[#allocation44_spill] sm:$0xff]  ;;  %4864 = vmatpush1.bf16.msra.mxu0 %v9937_v33 }
 0x41c   :  { %v5484_v36 = vsel %vm4452_vm11, %v14107_v28, %v12747_v51  ;;  %v5444_v7 = vsel %vm4455_vm12, %v5443_v53, %v5442_v38  ;;  %v14110_v51 = vld [vmem:[#allocation28_spill] sm:$0xff]  ;;  %v14111_v53 = vrot.slane %v14060_v29, 4  ;;  %v14114_v49 = vrot.slane %v14058_v14, 4  ;;  %5262 = vmatprep.subr.bf16.mxu0 %v9942_v35 }
 0x41d   :  { %v5446_v61 = vsel %vm4458_vm13, %v5445_v9, %v5444_v7  ;;  %v5486_v0 = vsel %vm4455_vm12, %v5485_v37, %v5484_v36  ;;  %v14112_v9 = vrot.slane %v14064_v48, 3  ;;  %v14115_v28 = vrot.slane %v14062_v1, 3  ;;  %v14116_v7 = vld [vmem:[#allocation19_spill] sm:$0xff] }
 0x41e   :  { %v5430_v56 = vsel %vm4455_vm12, %v14111_v53, %v14110_v51  ;;  %v5448_v44 = vsel %vm4461_vm14, %v5447_v27, %v5446_v61  ;;  %v5472_v29 = vsel %vm4455_vm12, %v14114_v49, %v14113_v45  ;;  %v5488_v15 = vsel %vm4458_vm13, %v5487_v43, %v5486_v0  ;;  %v9948_v45 = vld [vmem:[%s13909_s5 + $0x24] ss:$8 sps:$4 sm:$0xff]  }
 0x41f   :  { %v5432_v25 = vsel %vm4458_vm13, %v14112_v9, %v5430_v56  ;;  %v12920_v38 = vsel %vm4464_vm15, %v5449_v40, %v5448_v44  ;;  %v5474_v48 = vsel %vm4458_vm13, %v14115_v28, %v5472_v29  ;;  %v5490_v36 = vsel %vm4461_vm14, %v5489_v20, %v5488_v15  ;;  %v14120_v56 = vld [vmem:[#allocation38_spill] sm:$0xff] }
 0x420   :  { %v5434_v27 = vsel %vm4461_vm14, %v5433_v59, %v5432_v25  ;;  %v14117_v37 = vrot.slane %v14116_v7, 1  ;;  %v14118_v40 = vrot.slane %v12449_v18, 2  ;;  %v5513_v43 = vrot.slane %v12571_v55, 7  ;;  %v14119_v18 = vld [vmem:[#allocation23_spill] sm:$0xff] }
 0x421   :  { %v4979_v1 = vsel %vm4458_vm13, %v4978_v31, %v4977_v19  ;;  %v12944_v59 = vsel %vm4464_vm15, %v5491_v32, %v5490_v36  ;;  %v5515_v51 = vrot.slane %v14119_v18, 6  ;;  %v9945_v55 = vld [vmem:[%s13909_s5 + $0x14] ss:$8 sps:$4 sm:$0xff]   ;;  %v5507_v39 = vrot.slane %v12536_v57, 7 }
 0x422   :  { %v12933_v14 = vsel %vm4464_vm15, %v14117_v37, %v5434_v27  ;;  %v5476_v61 = vsel %vm4461_vm14, %v14118_v40, %v5474_v48  ;;  %v5526_v33 = vpack.c.b16 %v12944_v59, %v12920_v38  ;;  %v5514_v19 = vsel %vm4446_vm9, %v5513_v43, %v12595_v46  ;;  %v9954_v37 = vld [vmem:[%s13909_s5 + $0x44] ss:$8 sps:$4 sm:$0xff]   ;;  %v9952_v40 = vld [vmem:[%s13909_s5 + $0x40] ss:$8 sps:$4 sm:$0xff]   ;;  %v9955_v43 = vld [vmem:[%s13909_s5 + $0x50] ss:$8 sps:$4 sm:$0xff]  }
 0x423   :  { %v12949_v20 = vsel %vm4464_vm15, %v5477_v12, %v5476_v61  ;;  %v4980_v12 = vrot.slane %v14108_v58, 2  ;;  %v12964_v32 = vsel %vm4449_vm10, %v5515_v51, %v5514_v19  ;;  %v5509_v53 = vrot.slane %v12707_v22, 6  ;;  %v14123_v58 = vld [vmem:[#allocation21_spill] sm:$0xff]  ;;  %v9957_v61 = vld [vmem:[%s13909_s5 + $0x54] ss:$8 sps:$4 sm:$0xff]  }
 0x424   :  { %v5525_v31 = vpack.c.b16 %v12949_v20, %v12933_v14  ;;  %v14121_v35 = vrot.slane %v12429_v16, 2  ;;  %v14122_v0 = vpack.c.b16 %v12728_v10, %v12723_v3  ;;  %v4939_v57 = vsel %vm4461_vm14, %v4938_v24, %v12800_v6  ;;  %v14125_v16 = vld [vmem:[#allocation45_spill] sm:$0xff]  ;;  %v9963_v18 = vld [vmem:[%s13909_s5 + $0x74] ss:$8 sps:$4 sm:$0xff]  }
 0x425   :  { %v5508_v46 = vsel %vm4446_vm9, %v5507_v39, %v12588_v41  ;;  %v14124_v22 = vrot.slane %v14123_v58, 1  ;;  %v14126_v25 = vrot.slane %v12455_v42, 2  ;;  %v4981_v10 = vsel %vm4461_vm14, %v4980_v12, %v4979_v1  ;;  %v9958_v1 = vld [vmem:[%s13909_s5 + $0x60] ss:$8 sps:$4 sm:$0xff]   ;;  %v9961_v51 = vld [vmem:[%s13909_s5 + $0x70] ss:$8 sps:$4 sm:$0xff]  }
 0x426   :  { %v5462_v44 = vsel %vm4461_vm14, %v14121_v35, %v14120_v56  ;;  %8743 = vmatmul.mubr.msk.bf16.vlgmr.msra.gmra.mrb[44].mxu0 %vm3703_vm8, %v14122_v0  ;;  %v12996_v41 = vsel %vm4449_vm10, %v5509_v53, %v5508_v46  ;;  %v14127_v24 = vrot.slane %v12702_v5, 1  ;;  %v5519_v42 = vrot.slane %v12679_v2, 7  ;;  %v9964_v19 = vld [vmem:[%s13909_s5 + $0x80] ss:$8 sps:$4 sm:$0xff]   ;;  %v9969_v39 = vld [vmem:[%s13909_s5 + $0x94] ss:$8 sps:$4 sm:$0xff]  }
 0x427   :  { %v12984_v9 = vsel %vm4464_vm15, %v14124_v22, %v5462_v44  ;;  %v5504_v3 = vsel %vm4461_vm14, %v14126_v25, %v14125_v16  ;;  %5263 = vmatpush1.bf16.msra.mxu0 %v9940_v26  ;;  %4893 = vmatprep.mubr.bf16.mxu0 %v14088_v63  ;;  %v4940_v49 = vrot.slane %v14105_v4, 1  ;;  %v4982_v29 = vrot.slane %v14109_v47, 1  ;;  %v9946_v47 = vld [vmem:[%s13909_s5 + $0x20] ss:$8 sps:$4 sm:$0xff]   ;;  %v9960_v26 = vld [vmem:[%s13909_s5 + $0x64] ss:$8 sps:$4 sm:$0xff]  }
 0x428   :  { %v13001_v6 = vsel %vm4464_vm15, %v14127_v24, %v5504_v3  ;;  %5264 = vmatprep.subr.bf16.mxu0 %v9945_v55  ;;  %v5521_v27 = vrot.slane %v12475_v60, 6  ;;  %v14128_v5 = vrot.slane %v12475_v60, 5  ;;  %v5520_v2 = vsel %vm4446_vm9, %v5519_v42, %v12597_v62  ;;  %v9951_v60 = vld [vmem:[%s13909_s5 + $0x34] ss:$8 sps:$4 sm:$0xff]   ;;  %v9949_v62 = vld [vmem:[%s13909_s5 + $0x30] ss:$8 sps:$4 sm:$0xff]  }
 0x429   :  { %v5527_v15 = vpack.c.b16 %v13001_v6, %v12984_v9  ;;  %v4941_v48 = vsel %vm4464_vm15, %v4940_v49, %v4939_v57  ;;  %v4983_v36 = vsel %vm4464_vm15, %v4982_v29, %v4981_v10  ;;  %v9966_v55 = vld [vmem:[%s13909_s5 + $0x84] ss:$8 sps:$4 sm:$0xff]   ;;  %v9967_v12 = vld [vmem:[%s13909_s5 + $0x90] ss:$8 sps:$4 sm:$0xff]   ;;  %v9970_v56 = vld [vmem:[%s13909_s5 + $0xa0] ss:$8 sps:$4 sm:$0xff]   ;;  %v5020_v42 = vpack.c.b16 %v12821_v8, %v12821_v8 }
 0x42a   :  { %v4553_v28 = vsel %vm4452_vm11, %v14128_v5, %v12756_v54  ;;  %v13021_v4 = vsel %vm4449_vm10, %v5521_v27, %v5520_v2  ;;  %v5017_v54 = vpack.c.b16 %v4983_v36, %v4941_v48  ;;  %v9972_v53 = vld [vmem:[%s13909_s5 + $0xa4] ss:$8 sps:$4 sm:$0xff]   ;;  %v9975_v35 = vld [vmem:[%s13909_s5 + $0xb4] ss:$8 sps:$4 sm:$0xff]   ;;  %v9973_v44 = vld [vmem:[%s13909_s5 + $0xb0] ss:$8 sps:$4 sm:$0xff]   ;;  %v5019_v11 = vpack.c.b16 %v12857_v17, %v12857_v17 }
 0x42b   :  { %5265 = vmatpush1.bf16.msra.mxu0 %v9943_v13  ;;  %v4559_v7 = vpack.c.b16 %v4553_v28, %v4553_v28  ;;  %v9978_v0 = vld [vmem:[%s13909_s5 + $0xc4] ss:$8 sps:$4 sm:$0xff]   ;;  %v9976_v57 = vld [vmem:[%s13909_s5 + $0xc0] ss:$8 sps:$4 sm:$0xff]   ;;  %v9981_v46 = vld [vmem:[%s13909_s5 + $0xd4] ss:$8 sps:$4 sm:$0xff]   ;;  %v5021_v50 = vpack.c.b16 %v12884_v52, %v12884_v52 }
 0x42c   :  { %5266 = vmatprep.subr.bf16.mxu0 %v9948_v45  ;;  %v9979_v58 = vld [vmem:[%s13909_s5 + $0xd0] ss:$8 sps:$4 sm:$0xff]   ;;  %v9984_v22 = vld [vmem:[%s13909_s5 + $0xe4] ss:$8 sps:$4 sm:$0xff]   ;;  %v9982_v16 = vld [vmem:[%s13909_s5 + $0xe0] ss:$8 sps:$4 sm:$0xff]  }
 0x42d   :  { %v9987_v25 = vld [vmem:[%s13909_s5 + $0xf4] ss:$8 sps:$4 sm:$0xff]   ;;  %v9985_v3 = vld [vmem:[%s13909_s5 + $0xf0] ss:$8 sps:$4 sm:$0xff]   ;;  %v9990_v13 = vld [vmem:[%s13909_s5 + $0x104] ss:$8 sps:$4 sm:$0xff]  }
 0x42e   :  { %8744 = vmatmul.mubr.msk.bf16.gmra.mrb[52].mxu0 %vm3703_vm8, %v4559_v7  ;;  %v9988_v10 = vld [vmem:[%s13909_s5 + $0x100] ss:$8 sps:$4 sm:$0xff]   ;;  %v9993_v24 = vld [vmem:[%s13909_s5 + $0x114] ss:$8 sps:$4 sm:$0xff]   ;;  %v9991_v45 = vld [vmem:[%s13909_s5 + $0x110] ss:$8 sps:$4 sm:$0xff]  }
 0x42f   :  { %5267 = vmatpush1.bf16.msra.mxu0 %v9946_v47  ;;  %5294 = vmatprep.mubr.bf16.mxu0 %v5017_v54  ;;  %v9996_v49 = vld [vmem:[%s13909_s5 + $0x124] ss:$8 sps:$4 sm:$0xff]   ;;  %v9994_v8 = vld [vmem:[%s13909_s5 + $0x120] ss:$8 sps:$4 sm:$0xff]   ;;  %v10005_v27 = vld [vmem:[%s13909_s5 + $0x154] ss:$8 sps:$4 sm:$0xff]  }
 0x430   :  { %5268 = vmatprep.subr.bf16.mxu0 %v9951_v60  ;;  %v10002_v29 = vld [vmem:[%s13909_s5 + $0x144] ss:$8 sps:$4 sm:$0xff]   ;;  %v10000_v17 = vld [vmem:[%s13909_s5 + $0x140] ss:$8 sps:$4 sm:$0xff]   ;;  %v10003_v5 = vld [vmem:[%s13909_s5 + $0x150] ss:$8 sps:$4 sm:$0xff]  }
 0x431   :  { %v10008_v28 = vld [vmem:[%s13909_s5 + $0x164] ss:$8 sps:$4 sm:$0xff]   ;;  %v10006_v2 = vld [vmem:[%s13909_s5 + $0x160] ss:$8 sps:$4 sm:$0xff]   ;;  %v10014_v47 = vld [vmem:[%s13909_s5 + $0x2f4] ss:$8 sps:$4 sm:$0xff]  }
 0x432   :  { %v10011_v48 = vld [vmem:[%s13909_s5 + $0x2e4] ss:$8 sps:$4 sm:$0xff]   ;;  %v10009_v36 = vld [vmem:[%s13909_s5 + $0x2e0] ss:$8 sps:$4 sm:$0xff]   ;;  %v10012_v7 = vld [vmem:[%s13909_s5 + $0x2f0] ss:$8 sps:$4 sm:$0xff]  }
 0x433   :  { %5269 = vmatpush1.bf16.msra.mxu0 %v9949_v62  ;;  %v10017_v60 = vld [vmem:[%s13909_s5 + $0x304] ss:$8 sps:$4 sm:$0xff]   ;;  %v10015_v54 = vld [vmem:[%s13909_s5 + $0x300] ss:$8 sps:$4 sm:$0xff]   ;;  %v10026_v38 = vld [vmem:[%s13909_s5 + $0x334] ss:$8 sps:$4 sm:$0xff]  }
 0x434   :  { %5270 = vmatprep.subr.bf16.mxu0 %v9954_v37  ;;  %v10023_v52 = vld [vmem:[%s13909_s5 + $0x324] ss:$8 sps:$4 sm:$0xff]   ;;  %v10021_v62 = vld [vmem:[%s13909_s5 + $0x320] ss:$8 sps:$4 sm:$0xff]   ;;  %v10024_v59 = vld [vmem:[%s13909_s5 + $0x330] ss:$8 sps:$4 sm:$0xff]  }
 0x435   :  { %v10027_v37 = vld [vmem:[%s13909_s5 + $0x340] ss:$8 sps:$4 sm:$0xff]  }
 0x436   :  { %v10063_v14 = vld [vmem:[%s13909_s5 + $0x400] ss:$8 sps:$4 sm:$0xff]  }
 0x437   :  { %5271 = vmatpush1.bf16.msra.mxu0 %v9952_v40  ;;  %v10032_v40 = vld [vmem:[%s13909_s5 + $0x354] ss:$8 sps:$4 sm:$0xff]  }
 0x438   :  { %5272 = vmatprep.subr.bf16.mxu0 %v9957_v61  ;;  %v10030_v61 = vld [vmem:[%s13909_s5 + $0x350] ss:$8 sps:$4 sm:$0xff]  }
 0x43b   :  { %5273 = vmatpush1.bf16.msra.mxu0 %v9955_v43  ;;  %v10035_v43 = vld [vmem:[%s13909_s5 + $0x364] ss:$8 sps:$4 sm:$0xff]  }
 0x43c   :  { %5274 = vmatprep.subr.bf16.mxu0 %v9960_v26  ;;  %v10033_v26 = vld [vmem:[%s13909_s5 + $0x360] ss:$8 sps:$4 sm:$0xff]  }
 0x43f   :  { %5275 = vmatpush1.bf16.msra.mxu0 %v9958_v1  ;;  %v3678_v1 = vpop.permute.xlu0 %3677 }
 0x440   :  { %5276 = vmatprep.subr.bf16.mxu0 %v9963_v18  ;;  %v10038_v18 = vld [vmem:[%s13909_s5 + $0x374] ss:$8 sps:$4 sm:$0xff]  }
 0x443   :  { %5277 = vmatpush1.bf16.msra.mxu0 %v9961_v51  ;;  %v3702_v51 = vrot.slane %v3678_v1, 2 }
 0x444   :  { %5278 = vmatprep.subr.bf16.mxu0 %v9966_v55  ;;  %v10036_v55 = vld [vmem:[%s13909_s5 + $0x370] ss:$8 sps:$4 sm:$0xff]  }
 0x447   :  { %5279 = vmatpush1.bf16.msra.mxu0 %v9964_v19  ;;  %v10041_v19 = vld [vmem:[%s13909_s5 + $0x384] ss:$8 sps:$4 sm:$0xff]  }
 0x448   :  { %5280 = vmatprep.subr.bf16.mxu0 %v9969_v39  ;;  %v3727_v39 = vsel %vm3703_vm8, %v3678_v1, %v3702_v51 }
 0x44b   :  { %5281 = vmatpush1.bf16.msra.mxu0 %v9967_v12  ;;  %v10039_v12 = vld [vmem:[%s13909_s5 + $0x380] ss:$8 sps:$4 sm:$0xff]  }
 0x44c   :  { %5282 = vmatprep.subr.bf16.mxu0 %v9972_v53  ;;  %v10044_v53 = vld [vmem:[%s13909_s5 + $0x394] ss:$8 sps:$4 sm:$0xff]  }
 0x44f   :  { %5283 = vmatpush1.bf16.msra.mxu0 %v9970_v56  ;;  %v14129_v56 = vld [vmem:[#allocation14_spill] sm:$0xff] }
 0x450   :  { %5284 = vmatprep.subr.bf16.mxu0 %v9975_v35  ;;  %v3775_v35 = vmax.f32 %v14129_v56, %v3727_v39 }
 0x453   :  { %5285 = vmatpush1.bf16.msra.mxu0 %v9973_v44  ;;  %v10042_v44 = vld [vmem:[%s13909_s5 + $0x390] ss:$8 sps:$4 sm:$0xff]  }
 0x454   :  { %5286 = vmatprep.subr.bf16.mxu0 %v9978_v0  ;;  %v10047_v0 = vld [vmem:[%s13909_s5 + $0x3a4] ss:$8 sps:$4 sm:$0xff]  }
 0x457   :  { %5287 = vmatpush1.bf16.msra.mxu0 %v9976_v57  ;;  %v14130_v57 = vld [vmem:[#allocation13_spill] sm:$0xff] }
 0x458   :  { %5288 = vmatprep.subr.bf16.mxu0 %v9981_v46  ;;  %v4083_v46 = vrot.slane %v3775_v35, %v14130_v57  ;;  %v10078_v57 = vld [vmem:[#allocation2 + $0xa0] ss:$8 sps:$4 sm:$0xff]  }
 0x45b   :  { %5289 = vmatpush1.bf16.msra.mxu0 %v9979_v58  ;;  %v10045_v58 = vld [vmem:[%s13909_s5 + $0x3a0] ss:$8 sps:$4 sm:$0xff]  }
 0x45c   :  { %5290 = vmatprep.subr.bf16.mxu0 %v9984_v22  ;;  %v10050_v22 = vld [vmem:[%s13909_s5 + $0x3b4] ss:$8 sps:$4 sm:$0xff]  }
 0x45f   :  { %5291 = vmatpush1.bf16.msra.mxu0 %v9982_v16  ;;  %v4230_v16 = vpack.c.bf16 %v4083_v46, %v4083_v46  ;;  %v10080_v46 = vld [vmem:[#allocation2 + $0xa4] ss:$8 sps:$4 sm:$0xff]  }
 0x460   :  { %5292 = vmatprep.subr.bf16.mxu0 %v9987_v25  ;;  %v10048_v25 = vld [vmem:[%s13909_s5 + $0x3b0] ss:$8 sps:$4 sm:$0xff]   ;;  %6250 = vmatprep.subr.bf16.mxu1 %v10080_v46 }
 0x461   :  { %6251 = vmatpush1.bf16.msra.mxu1 %v10078_v57 }
 0x463   :  { %5293 = vmatpush1.bf16.msra.mxu0 %v9985_v3  ;;  %v10053_v3 = vld [vmem:[%s13909_s5 + $0x3c4] ss:$8 sps:$4 sm:$0xff]  }
 0x464   :  { %5313 = vmatprep.subr.bf16.mxu0 %v9990_v13  ;;  %v14131_v13 = vld [vmem:[#allocation8_spill] sm:$0xff] }
 0x466   :  { %5295 = vmatmul.mubr.bf16.vlgmr.msra.gmra.mrb[44].mxu0 %v5016_v21  ;;  %v9997_v21 = vld [vmem:[%s13909_s5 + $0x130] ss:$8 sps:$4 sm:$0xff]  }
 0x467   :  { %5304 = vmatprep.mubr.bf16.mxu0 %v5020_v42  ;;  %5314 = vmatpush1.bf16.msra.mxu0 %v9988_v10  ;;  %v4079_v10 = vrot.slane %v3775_v35, %v14131_v13  ;;  %v10051_v42 = vld [vmem:[%s13909_s5 + $0x3c0] ss:$8 sps:$4 sm:$0xff]  }
 0x468   :  { %5315 = vmatprep.subr.bf16.mxu0 %v9993_v24  ;;  %v5421_v24 = vunpack.c.l.b16 %v4230_v16  ;;  %v10086_v16 = vld [vmem:[#allocation2 + $0xc4] ss:$8 sps:$4 sm:$0xff]  }
 0x46b   :  { %5316 = vmatpush1.bf16.msra.mxu0 %v9991_v45  ;;  %v10056_v45 = vld [vmem:[%s13909_s5 + $0x3d4] ss:$8 sps:$4 sm:$0xff]  }
 0x46c   :  { %5317 = vmatprep.subr.bf16.mxu0 %v9996_v49  ;;  %v4229_v49 = vpack.c.bf16 %v4079_v10, %v4079_v10  ;;  %v10087_v10 = vld [vmem:[#allocation2 + $0xd0] ss:$8 sps:$4 sm:$0xff]  }
 0x46e   :  { %5305 = vmatmul.mubr.bf16.gmra.mrb[56].mxu0 %v5019_v11  ;;  %v10054_v11 = vld [vmem:[%s13909_s5 + $0x3d0] ss:$8 sps:$4 sm:$0xff]  }
 0x46f   :  { %5318 = vmatpush1.bf16.msra.mxu0 %v9994_v8  ;;  %5345 = vmatprep.mubr.bf16.mxu0 %v14088_v63  ;;  %v5517_v8 = vrot.slane %v5421_v24, 5  ;;  %v10092_v24 = vld [vmem:[#allocation2 + $0xe4] ss:$8 sps:$4 sm:$0xff]  }
 0x470   :  { %5319 = vmatprep.subr.bf16.mxu0 %v9999_v34  ;;  %v10059_v34 = vld [vmem:[%s13909_s5 + $0x3e4] ss:$8 sps:$4 sm:$0xff]  }
 0x473   :  { %5320 = vmatpush1.bf16.msra.mxu0 %v9997_v21  ;;  %v5420_v21 = vunpack.c.l.b16 %v4229_v49  ;;  %v10093_v49 = vld [vmem:[#allocation2 + $0xf0] ss:$8 sps:$4 sm:$0xff]  }
 0x474   :  { %5321 = vmatprep.subr.bf16.mxu0 %v10002_v29  ;;  %v5518_v29 = vsel %vm4452_vm11, %v5517_v8, %v12964_v32  ;;  %v10060_v32 = vld [vmem:[%s13909_s5 + $0x3f0] ss:$8 sps:$4 sm:$0xff]   ;;  %v10098_v8 = vld [vmem:[#allocation2 + $0x104] ss:$8 sps:$4 sm:$0xff]  }
 0x477   :  { %5322 = vmatpush1.bf16.msra.mxu0 %v10000_v17  ;;  %v10057_v17 = vld [vmem:[%s13909_s5 + $0x3e0] ss:$8 sps:$4 sm:$0xff]  }
 0x478   :  { %5323 = vmatprep.subr.bf16.mxu0 %v10005_v27  ;;  %v10062_v27 = vld [vmem:[%s13909_s5 + $0x3f4] ss:$8 sps:$4 sm:$0xff]  }
 0x47b   :  { %5324 = vmatpush1.bf16.msra.mxu0 %v10003_v5  ;;  %v5529_v5 = vpack.c.b16 %v5518_v29, %v5518_v29  ;;  %v10104_v29 = vld [vmem:[#allocation2 + $0x124] ss:$8 sps:$4 sm:$0xff]  }
 0x47c   :  { %5325 = vmatprep.subr.bf16.mxu0 %v10008_v28  ;;  %v5511_v28 = vrot.slane %v5420_v21, 5  ;;  %v10099_v21 = vld [vmem:[#allocation2 + $0x110] ss:$8 sps:$4 sm:$0xff]  }
 0x47f   :  { %5326 = vmatpush1.bf16.msra.mxu0 %v10006_v2  ;;  %v10065_v2 = vld [vmem:[%s13909_s5 + $0x404] ss:$8 sps:$4 sm:$0xff]  }
 0x480   :  { %5771 = vmatprep.subr.bf16.mxu0 %v10011_v48  ;;  %v5512_v48 = vsel %vm4452_vm11, %v5511_v28, %v12996_v41  ;;  %v10071_v41 = vld [vmem:[%s13909_s5 + $0x424] ss:$8 sps:$4 sm:$0xff]  }
 0x481   :  { %v5528_v20 = vpack.c.b16 %v5512_v48, %v5512_v48  ;;  %v10110_v28 = vld [vmem:[#allocation2 + $0x4] ss:$8 sps:$4 sm:$0xff]  }
 0x482   :  { %8791 = vmatmul.mubr.msk.bf16.vlgmr.msra.gmra.mrb[44].mxu0 %vm3703_vm8, %v5018_v23  ;;  %v10018_v23 = vld [vmem:[%s13909_s5 + $0x310] ss:$8 sps:$4 sm:$0xff]  }
 0x483   :  { %5772 = vmatpush1.bf16.msra.mxu0 %v10009_v36  ;;  %5355 = vmatprep.mubr.bf16.mxu0 %v14088_v63  ;;  %v10066_v36 = vld [vmem:[%s13909_s5 + $0x410] ss:$8 sps:$4 sm:$0xff]  }
 0x484   :  { %5773 = vmatprep.subr.bf16.mxu0 %v10014_v47  ;;  %v10069_v47 = vld [vmem:[%s13909_s5 + $0x420] ss:$8 sps:$4 sm:$0xff]  }
 0x487   :  { %5774 = vmatpush1.bf16.msra.mxu0 %v10012_v7  ;;  %v10074_v7 = vld [vmem:[%s13909_s5 + $0x434] ss:$8 sps:$4 sm:$0xff]  }
 0x488   :  { %5775 = vmatprep.subr.bf16.mxu0 %v10017_v60  ;;  %v14132_v60 = vld [vmem:[#allocation15_spill] sm:$0xff] }
 0x48a   :  { %8792 = vmatmul.mubr.msk.bf16.gmra.mrb[60].mxu0 %vm3703_vm8, %v5021_v50  ;;  %v10072_v50 = vld [vmem:[%s13909_s5 + $0x430] ss:$8 sps:$4 sm:$0xff]  }
 0x48b   :  { %5776 = vmatpush1.bf16.msra.mxu0 %v10015_v54  ;;  %5803 = vmatprep.mubr.bf16.mxu0 %v5526_v33  ;;  %v10029_v33 = vld [vmem:[%s13909_s5 + $0x344] ss:$8 sps:$4 sm:$0xff]   ;;  %v4087_v54 = vrot.slane %v3775_v35, %v14132_v60 }
 0x48c   :  { %5777 = vmatprep.subr.bf16.mxu0 %v10020_v30  ;;  %v10077_v30 = vld [vmem:[%s13909_s5 + $0x444] ss:$8 sps:$4 sm:$0xff]  }
 0x48f   :  { %5778 = vmatpush1.bf16.msra.mxu0 %v10018_v23  ;;  %v4231_v23 = vpack.c.bf16 %v4087_v54, %v4087_v54 }
 0x490   :  { %5779 = vmatprep.subr.bf16.mxu0 %v10023_v52  ;;  %v10075_v52 = vld [vmem:[%s13909_s5 + $0x440] ss:$8 sps:$4 sm:$0xff]  }
 0x493   :  { %5780 = vmatpush1.bf16.msra.mxu0 %v10021_v62  ;;  %v5422_v62 = vunpack.c.l.b16 %v4231_v23 }
 0x494   :  { %5781 = vmatprep.subr.bf16.mxu0 %v10026_v38 }
 0x495   :  { %v5523_v38 = vrot.slane %v5422_v62, 5 }
 0x497   :  { %5782 = vmatpush1.bf16.msra.mxu0 %v10024_v59  ;;  %v5524_v59 = vsel %vm4452_vm11, %v5523_v38, %v13021_v4 }
 0x498   :  { %5783 = vmatprep.subr.bf16.mxu0 %v10029_v33  ;;  %v5530_v33 = vpack.c.b16 %v5524_v59, %v5524_v59 }
 0x49b   :  { %5784 = vmatpush1.bf16.msra.mxu0 %v10027_v37 }
 0x49c   :  { %5785 = vmatprep.subr.bf16.mxu0 %v10032_v40 }
 0x49f   :  { %5786 = vmatpush1.bf16.msra.mxu0 %v10030_v61 }
 0x4a0   :  { %5787 = vmatprep.subr.bf16.mxu0 %v10035_v43 }
 0x4a3   :  { %5788 = vmatpush1.bf16.msra.mxu0 %v10033_v26 }
 0x4a4   :  { %5789 = vmatprep.subr.bf16.mxu0 %v10038_v18 }
 0x4a7   :  { %5790 = vmatpush1.bf16.msra.mxu0 %v10036_v55 }
 0x4a8   :  { %5791 = vmatprep.subr.bf16.mxu0 %v10041_v19 }
 0x4ab   :  { %5792 = vmatpush1.bf16.msra.mxu0 %v10039_v12 }
 0x4ac   :  { %5793 = vmatprep.subr.bf16.mxu0 %v10044_v53 }
 0x4af   :  { %5794 = vmatpush1.bf16.msra.mxu0 %v10042_v44 }
 0x4b0   :  { %5795 = vmatprep.subr.bf16.mxu0 %v10047_v0 }
 0x4b3   :  { %5796 = vmatpush1.bf16.msra.mxu0 %v10045_v58  ;;  %v10083_v58 = vld [vmem:[#allocation2 + $0xb4] ss:$8 sps:$4 sm:$0xff]  }
 0x4b4   :  { %5797 = vmatprep.subr.bf16.mxu0 %v10050_v22  ;;  %v10081_v22 = vld [vmem:[#allocation2 + $0xb0] ss:$8 sps:$4 sm:$0xff]   ;;  %6252 = vmatprep.subr.bf16.mxu1 %v10083_v58 }
 0x4b5   :  { %6253 = vmatpush1.bf16.msra.mxu1 %v10081_v22 }
 0x4b6   :  { %6254 = vmatprep.subr.bf16.mxu1 %v10086_v16 }
 0x4b7   :  { %5798 = vmatpush1.bf16.msra.mxu0 %v10048_v25  ;;  %v10084_v25 = vld [vmem:[#allocation2 + $0xc0] ss:$8 sps:$4 sm:$0xff]  }
 0x4b8   :  { %5799 = vmatprep.subr.bf16.mxu0 %v10053_v3  ;;  %v10089_v3 = vld [vmem:[#allocation2 + $0xd4] ss:$8 sps:$4 sm:$0xff]  }
 0x4b9   :  { %6255 = vmatpush1.bf16.msra.mxu1 %v10084_v25 }
 0x4ba   :  { %6256 = vmatprep.subr.bf16.mxu1 %v10089_v3 }
 0x4bb   :  { %5800 = vmatpush1.bf16.msra.mxu0 %v10051_v42  ;;  %v10090_v42 = vld [vmem:[#allocation2 + $0xe0] ss:$8 sps:$4 sm:$0xff]  }
 0x4bc   :  { %5801 = vmatprep.subr.bf16.mxu0 %v10056_v45  ;;  %v10095_v45 = vld [vmem:[#allocation2 + $0xf4] ss:$8 sps:$4 sm:$0xff]  }
 0x4bd   :  { %6257 = vmatpush1.bf16.msra.mxu1 %v10087_v10 }
 0x4be   :  { %6258 = vmatprep.subr.bf16.mxu1 %v10092_v24 }
 0x4bf   :  { %5802 = vmatpush1.bf16.msra.mxu0 %v10054_v11  ;;  %v10096_v11 = vld [vmem:[#allocation2 + $0x100] ss:$8 sps:$4 sm:$0xff]  }
 0x4c0   :  { %5822 = vmatprep.subr.bf16.mxu0 %v10059_v34  ;;  %v10101_v34 = vld [vmem:[#allocation2 + $0x114] ss:$8 sps:$4 sm:$0xff]  }
 0x4c1   :  { %6259 = vmatpush1.bf16.msra.mxu1 %v10090_v42 }
 0x4c2   :  { %5804 = vmatmul.mubr.bf16.vlgmr.msra.gmra.mrb[44].mxu0 %v5525_v31  ;;  %v10068_v31 = vld [vmem:[%s13909_s5 + $0x414] ss:$8 sps:$4 sm:$0xff]   ;;  %6260 = vmatprep.subr.bf16.mxu1 %v10095_v45 }
 0x4c3   :  { %5813 = vmatprep.mubr.bf16.mxu0 %v5529_v5  ;;  %5823 = vmatpush1.bf16.msra.mxu0 %v10057_v17  ;;  %v10102_v17 = vld [vmem:[#allocation2 + $0x120] ss:$8 sps:$4 sm:$0xff]   ;;  %v10105_v5 = vld [vmem:[#allocation2 + $0x130] ss:$8 sps:$4 sm:$0xff]  }
 0x4c4   :  { %5824 = vmatprep.subr.bf16.mxu0 %v10062_v27  ;;  %v10107_v27 = vld [vmem:[#allocation2 + $0x134] ss:$8 sps:$4 sm:$0xff]  }
 0x4c5   :  { %6261 = vmatpush1.bf16.msra.mxu1 %v10093_v49 }
 0x4c6   :  { %6262 = vmatprep.subr.bf16.mxu1 %v10098_v8  ;;  %v14134_v8 = vld [vmem:[#allocation10_spill] sm:$0xff] }
 0x4c7   :  { %5825 = vmatpush1.bf16.msra.mxu0 %v10060_v32 }
 0x4c8   :  { %5826 = vmatprep.subr.bf16.mxu0 %v10065_v2 }
 0x4c9   :  { %6263 = vmatpush1.bf16.msra.mxu1 %v10096_v11 }
 0x4ca   :  { %5814 = vmatmul.mubr.bf16.gmra.mrb[64].mxu0 %v5528_v20  ;;  %6264 = vmatprep.subr.bf16.mxu1 %v10101_v34  ;;  %v5879_v20 = vld [vmem:[%s13910_s6] sm:$0x3] }
 0x4cb   :  { %5827 = vmatpush1.bf16.msra.mxu0 %v10063_v14  ;;  %5854 = vmatprep.mubr.bf16.mxu0 %v14088_v63 }
 0x4cc   :  { %5828 = vmatprep.subr.bf16.mxu0 %v10068_v31  ;;  %v5884_v31 = vrot.slane %v5879_v20, %v14131_v13 }
 0x4cd   :  { %6265 = vmatpush1.bf16.msra.mxu1 %v10099_v21 }
 0x4ce   :  { %6266 = vmatprep.subr.bf16.mxu1 %v10104_v29 }
 0x4cf   :  { %5829 = vmatpush1.bf16.msra.mxu0 %v10066_v36  ;;  %v14133_v36 = vld [vmem:[#allocation9_spill] sm:$0xff] }
 0x4d0   :  { %5830 = vmatprep.subr.bf16.mxu0 %v10071_v41  ;;  %v5888_v41 = vrot.slane %v5879_v20, %v14133_v36 }
 0x4d1   :  { %6267 = vmatpush1.bf16.msra.mxu1 %v10102_v17 }
 0x4d2   :  { %6268 = vmatprep.subr.bf16.mxu1 %v10107_v27 }
 0x4d3   :  { %5831 = vmatpush1.bf16.msra.mxu0 %v10069_v47 }
 0x4d4   :  { %5832 = vmatprep.subr.bf16.mxu0 %v10074_v7 }
 0x4d5   :  { %6269 = vmatpush1.bf16.msra.mxu1 %v10105_v5 }
 0x4d6   :  { %6399 = vmatprep.subr.bf16.mxu1 %v10110_v28 }
 0x4d7   :  { %5833 = vmatpush1.bf16.msra.mxu0 %v10072_v50 }
 0x4d8   :  { %5834 = vmatprep.subr.bf16.mxu0 %v10077_v30 }
 0x4db   :  { %5835 = vmatpush1.bf16.msra.mxu0 %v10075_v52 }
 0x4dd   :  { %v4844_v37 = vpop.f32.mrb[48].mxu0 }
 0x4de   :  { %8885 = vmatmul.mubr.msk.bf16.vlgmr.msra.gmra.mrb[44].mxu0 %vm3703_vm8, %v5527_v15  ;;  %v4846_v40 = vpop.f32.mrb[49].mxu0 }
 0x4df   :  { %5864 = vmatprep.mubr.bf16.mxu0 %v14088_v63  ;;  %v4848_v61 = vpop.f32.mrb[50].mxu0 }
 0x4e0   :  { %v4849_v43 = vpop.f32.mrb[51].mxu0 }
 0x4e6   :  { %8886 = vmatmul.mubr.msk.bf16.gmra.mrb[68].mxu0 %vm3703_vm8, %v5530_v33 }
 0x501   :  { %v4895_v26 = vpop.f32.mrb[52].mxu0 }
 0x502   :  { %v4896_v1 = vadd.f32 %v4895_v26, %v4844_v37  ;;  %v4897_v18 = vpop.f32.mrb[53].mxu0 }
 0x503   :  { %v4898_v51 = vadd.f32 %v4897_v18, %v4846_v40  ;;  %v4899_v55 = vpop.f32.mrb[54].mxu0 }
 0x504   :  { %v4900_v9 = vpop.f32.mrb[55].mxu0 }
 0x541   :  { %v5306_v6 = vpop.f32.mrb[56].mxu0 }
 0x542   :  { %v5307_v15 = vadd.f32 %v5306_v6, %v4896_v1  ;;  %v5308_v19 = vpop.f32.mrb[57].mxu0 }
 0x543   :  { %v5309_v63 = vadd.f32 %v5308_v19, %v4898_v51  ;;  %v5310_v39 = vpop.f32.mrb[58].mxu0 }
 0x544   :  { %v5311_v12 = vpop.f32.mrb[59].mxu0 }
 0x55d   :  { %v5357_v4 = vpop.f32.mrb[60].mxu0 }
 0x55e   :  { %v13325_v53 = vadd.f32 %v5357_v4, %v5307_v15  ;;  %v5359_v56 = vpop.f32.mrb[61].mxu0 }
 0x55f   :  { %v13327_v35 = vadd.f32 %v5359_v56, %v5309_v63  ;;  %v5361_v44 = vpop.f32.mrb[62].mxu0 }
 0x560   :  { %v5362_v0 = vpop.f32.mrb[63].mxu0 }
 0x59d   :  { %v5815_v32 = vpop.f32.mrb[64].mxu0 }
 0x59e   :  { %v5817_v2 = vpop.f32.mrb[65].mxu0 }
 0x59f   :  { %v5819_v48 = vpop.f32.mrb[66].mxu0 }
 0x5a0   :  { %v5820_v14 = vpop.f32.mrb[67].mxu0 }
 0x5b1   :  { %v5856_v47 = vpop.f32.mrb[44].mxu0 }
 0x5b2   :  { %v5891_v7 = vadd.f32 %v5884_v31, %v5856_v47  ;;  %v5858_v60 = vpop.f32.mrb[45].mxu0 }
 0x5b3   :  { %v5892_v54 = vadd.f32 %v5888_v41, %v5858_v60  ;;  %v5860_v50 = vpop.f32.mrb[46].mxu0 }
 0x5b4   :  { %v8887_v30 = vmul.f32 -1.442695, %v5891_v7  ;;  %v5893_v23 = vadd.f32 %v5884_v31, %v5860_v50  ;;  %v5862_v52 = vpop.f32.mrb[47].mxu0 }
 0x5b5   :  { %v8888_v62 = vmul.f32 -1.442695, %v5892_v54  ;;  %v5894_v38 = vadd.f32 %v5888_v41, %v5862_v52 }
 0x5b6   :  { %10432 = vpow2.f32 %v8887_v30  ;;  %v8889_v59 = vmul.f32 -1.442695, %v5893_v23 }
 0x5b7   :  { %10434 = vpow2.f32 %v8888_v62  ;;  %v8890_v33 = vmul.f32 -1.442695, %v5894_v38 }
 0x5b8   :  { %10436 = vpow2.f32 %v8889_v59 }
 0x5b9   :  { %10438 = vpow2.f32 %v8890_v33  ;;  %v5866_v37 = vpop.f32.mrb[68].mxu0 }
 0x5ba   :  { %v5867_v40 = vadd.f32 %v5866_v37, %v5815_v32  ;;  %v5868_v61 = vpop.f32.mrb[69].mxu0 }
 0x5bb   :  { %v5869_v43 = vadd.f32 %v5868_v61, %v5817_v2  ;;  %v5870_v26 = vpop.f32.mrb[70].mxu0 }
 0x5bc   :  { %v5877_v1 = vadd.f32 %v5867_v40, %v13325_v53  ;;  %v5871_v18 = vpop.f32.mrb[71].mxu0 }
 0x5bd   :  { %v5878_v51 = vadd.f32 %v5869_v43, %v13327_v35 }
 0x5be   :  { %v5895_v55 = vadd.f32 %v5884_v31, %v5877_v1  ;;  %v10149_v1 = vld [vmem:[#allocation2 + $0x174] ss:$8 sps:$4 sm:$0xff]  }
 0x5bf   :  { %v5896_v9 = vadd.f32 %v5888_v41, %v5878_v51 }
 0x5c0   :  { %v10433_v6 = vpop.eup %10432  ;;  %v8891_v15 = vmul.f32 -1.442695, %v5895_v55 }
 0x5c1   :  { %v10435_v19 = vpop.eup %10434  ;;  %v5915_v63 = vadd.f32 1.0, %v10433_v6  ;;  %v8892_v44 = vmul.f32 -1.442695, %v5896_v9 }
 0x5c2   :  { %v10437_v39 = vpop.eup %10436  ;;  %v5916_v12 = vadd.f32 1.0, %v10435_v19  ;;  %10440 = vpow2.f32 %v8891_v15 }
 0x5c3   :  { %v10439_v4 = vpop.eup %10438  ;;  %10442 = vrcp.f32 %v5915_v63  ;;  %v5917_v56 = vadd.f32 1.0, %v10437_v39 }
 0x5c4   :  { %10444 = vrcp.f32 %v5916_v12  ;;  %v5918_v0 = vadd.f32 1.0, %v10439_v4 }
 0x5c5   :  { %10446 = vrcp.f32 %v5917_v56  ;;  %v10162_v56 = vld [vmem:[#allocation2 + $0x1c0] ss:$8 sps:$4 sm:$0xff]  }
 0x5c6   :  { %10448 = vrcp.f32 %v5918_v0 }
 0x5c7   :  { %10450 = vpow2.f32 %v8892_v44 }
 0x5cc   :  { %v10441_v53 = vpop.eup %10440 }
 0x5cd   :  { %v10443_v35 = vpop.eup %10442  ;;  %v5919_v57 = vadd.f32 1.0, %v10441_v53 }
 0x5ce   :  { %v10445_v46 = vpop.eup %10444  ;;  %v5933_v58 = vmul.f32 %v10443_v35, %v5891_v7 }
 0x5cf   :  { %v10447_v22 = vpop.eup %10446  ;;  %v5934_v16 = vmul.f32 %v10445_v46, %v5892_v54  ;;  %10452 = vrcp.f32 %v5919_v57 }
 0x5d0   :  { %v10449_v25 = vpop.eup %10448  ;;  %v5935_v3 = vmul.f32 %v10447_v22, %v5893_v23 }
 0x5d1   :  { %v10451_v10 = vpop.eup %10450  ;;  %v5945_v24 = vcombine.low %v5933_v58, %v5934_v16  ;;  %v5946_v42 = vcombine.high %v5933_v58, %v5934_v16  ;;  %v5936_v45 = vmul.f32 %v10449_v25, %v5894_v38 }
 0x5d2   :  { %v5920_v49 = vadd.f32 1.0, %v10451_v10 }
 0x5d3   :  { %v5953_v11 = vrot.slane %v5945_v24, %v14134_v8  ;;  %v5960_v34 = vrot.slane %v5946_v42, %v14134_v8  ;;  %v5963_v21 = vcombine.low %v5935_v3, %v5936_v45  ;;  %v5964_v29 = vcombine.high %v5935_v3, %v5936_v45 }
 0x5d4   :  { %10454 = vrcp.f32 %v5920_v49 }
 0x5d5   :  { %v5961_v17 = vcombine.high %v5953_v11, %v5953_v11  ;;  %v5962_v27 = vcombine.high %v5960_v34, %v5960_v34  ;;  %v5971_v5 = vrot.slane %v5963_v21, %v14134_v8  ;;  %v5978_v2 = vrot.slane %v5964_v29, %v14134_v8 }
 0x5d7   :  { %v5990_v28 = vcombine.low %v5953_v11, %v5961_v17  ;;  %v5991_v32 = vcombine.low %v5960_v34, %v5962_v27  ;;  %v5979_v48 = vcombine.high %v5971_v5, %v5971_v5  ;;  %v6014_v14 = vrot.slane %v5971_v5, %v14134_v8 }
 0x5d8   :  { %v5980_v51 = vcombine.high %v5978_v2, %v5978_v2 }
 0x5d9   :  { %v5998_v20 = vrot.slane %v5990_v28, %v14134_v8  ;;  %v6005_v31 = vrot.slane %v5991_v32, %v14134_v8  ;;  %v6016_v41 = vcombine.low %v5979_v48, %v5978_v2  ;;  %v10453_v47 = vpop.eup %10452  ;;  %v6015_v7 = vcombine.high %v6014_v14, %v6014_v14  ;;  %v10108_v28 = vld [vmem:[#allocation2] ss:$8 sps:$4 sm:$0xff]   ;;  %v10113_v32 = vld [vmem:[#allocation2 + $0x14] ss:$8 sps:$4 sm:$0xff]   ;;  %v10111_v2 = vld [vmem:[#allocation2 + $0x10] ss:$8 sps:$4 sm:$0xff]  }
 0x5da   :  { %v5937_v23 = vmul.f32 %v10453_v47, %v5895_v55  ;;  %v10116_v48 = vld [vmem:[#allocation2 + $0x24] ss:$8 sps:$4 sm:$0xff]   ;;  %v10120_v47 = vld [vmem:[#allocation2 + $0x40] ss:$8 sps:$4 sm:$0xff]  }
 0x5db   :  { %v13343_v60 = vcombine.low %v5998_v20, %v6005_v31  ;;  %v6007_v54 = vcombine.high %v5998_v20, %v6005_v31  ;;  %v9346_v50 = vpack.c.bf16 %v6015_v7, %v6014_v14  ;;  %v10114_v14 = vld [vmem:[#allocation2 + $0x20] ss:$8 sps:$4 sm:$0xff]   ;;  %v10119_v20 = vld [vmem:[#allocation2 + $0x34] ss:$8 sps:$4 sm:$0xff]   ;;  %v10117_v31 = vld [vmem:[#allocation2 + $0x30] ss:$8 sps:$4 sm:$0xff]  }
 0x5dc   :  { %v10125_v7 = vld [vmem:[#allocation2 + $0x54] ss:$8 sps:$4 sm:$0xff]  }
 0x5dd   :  { %v9345_v30 = vpack.c.bf16 %v6007_v54, %v13343_v60  ;;  %v6444_v62 = vrot.slane %v9346_v50, 5  ;;  %v6100_v40 = vshll.u32 %v9346_v50, 16  ;;  %v10126_v50 = vld [vmem:[#allocation2 + $0x60] ss:$8 sps:$4 sm:$0xff]  }
 0x5de   :  { %v10455_v52 = vpop.eup %10454 }
 0x5df   :  { %v5938_v38 = vmul.f32 %v10455_v52, %v5896_v9  ;;  %v6091_v59 = vshrl.u32 %v9345_v30, 16  ;;  %v6094_v33 = vshll.u32 %v9345_v30, 16  ;;  %v8943_v37 = vrot.slane %v9345_v30, 9  ;;  %v10131_v30 = vld [vmem:[#allocation2 + $0x74] ss:$8 sps:$4 sm:$0xff]  }
 0x5e0   :  { %v6102_v39 = vrot.slane %v6100_v40, 5  ;;  %v6024_v9 = vrot.slane %v6016_v41, %v14134_v8  ;;  %v10122_v41 = vld [vmem:[#allocation2 + $0x44] ss:$8 sps:$4 sm:$0xff]   ;;  %v10143_v40 = vld [vmem:[#allocation2 + $0x154] ss:$8 sps:$4 sm:$0xff]  }
 0x5e1   :  { %v5981_v61 = vcombine.low %v5937_v23, %v5938_v38  ;;  %v6093_v43 = vrot.slane %v6091_v59, 4  ;;  %v6096_v26 = vrot.slane %v6094_v33, 5  ;;  %v13348_v18 = vsel %vm11395_vm7, %v8943_v37, %v6444_v62  ;;  %v10129_v23 = vld [vmem:[#allocation2 + $0x70] ss:$8 sps:$4 sm:$0xff]   ;;  %v10134_v52 = vld [vmem:[#allocation2 + $0x84] ss:$8 sps:$4 sm:$0xff]  }
 0x5e2   :  { %v10132_v62 = vld [vmem:[#allocation2 + $0x80] ss:$8 sps:$4 sm:$0xff]   ;;  %v10137_v38 = vld [vmem:[#allocation2 + $0x94] ss:$8 sps:$4 sm:$0xff]   ;;  %v10135_v59 = vld [vmem:[#allocation2 + $0x90] ss:$8 sps:$4 sm:$0xff]  }
 0x5e3   :  { %v5988_v6 = vrot.slane %v5981_v61, %v14134_v8  ;;  %v6097_v15 = vor.u32 %v6096_v26, %v6093_v43  ;;  %v10140_v33 = vld [vmem:[#allocation2 + $0x144] ss:$8 sps:$4 sm:$0xff]   ;;  %v10138_v37 = vld [vmem:[#allocation2 + $0x140] ss:$8 sps:$4 sm:$0xff]   ;;  %v10141_v61 = vld [vmem:[#allocation2 + $0x150] ss:$8 sps:$4 sm:$0xff]  }
 0x5e4   :  { %v10146_v43 = vld [vmem:[#allocation2 + $0x164] ss:$8 sps:$4 sm:$0xff]   ;;  %v10144_v26 = vld [vmem:[#allocation2 + $0x160] ss:$8 sps:$4 sm:$0xff]  }
 0x5e5   :  { %v5989_v19 = vcombine.high %v5988_v6, %v5988_v6  ;;  %v6017_v55 = vcombine.low %v5980_v51, %v5988_v6  ;;  %v6098_v63 = vrot.slane %v6097_v15, 4  ;;  %v10147_v51 = vld [vmem:[#allocation2 + $0x170] ss:$8 sps:$4 sm:$0xff]   ;;  %v10152_v6 = vld [vmem:[#allocation2 + $0x184] ss:$8 sps:$4 sm:$0xff]  }
 0x5e6   :  { %v10150_v15 = vld [vmem:[#allocation2 + $0x180] ss:$8 sps:$4 sm:$0xff]  }
 0x5e7   :  { %v6031_v12 = vrot.slane %v6017_v55, %v14134_v8  ;;  %v6040_v4 = vrot.slane %v5989_v19, %v14134_v8  ;;  %v6103_v44 = vsel %vm11337_vm4, %v6098_v63, %v6102_v39  ;;  %v10155_v19 = vld [vmem:[#allocation2 + $0x194] ss:$8 sps:$4 sm:$0xff]   ;;  %v10153_v55 = vld [vmem:[#allocation2 + $0x190] ss:$8 sps:$4 sm:$0xff]   ;;  %v10158_v63 = vld [vmem:[#allocation2 + $0x1a4] ss:$8 sps:$4 sm:$0xff]  }
 0x5e8   :  { %v10156_v39 = vld [vmem:[#allocation2 + $0x1a0] ss:$8 sps:$4 sm:$0xff]  }
 0x5e9   :  { %v13356_v0 = vcombine.low %v6024_v9, %v6031_v12  ;;  %v6033_v53 = vcombine.high %v6024_v9, %v6031_v12  ;;  %v6041_v35 = vcombine.high %v6040_v4, %v6040_v4  ;;  %v10161_v9 = vld [vmem:[#allocation2 + $0x1b4] ss:$8 sps:$4 sm:$0xff]   ;;  %v10159_v12 = vld [vmem:[#allocation2 + $0x1b0] ss:$8 sps:$4 sm:$0xff]  }
 0x5eb   :  { %v9347_v57 = vpack.c.bf16 %v6033_v53, %v13356_v0  ;;  %v9348_v46 = vpack.c.bf16 %v6041_v35, %v6040_v4  ;;  %v9350_v58 = vpack.c.bf16 %v6033_v53, %v6007_v54  ;;  %v9349_v22 = vpack.c.bf16 %v13356_v0, %v13343_v60  ;;  %v10123_v60 = vld [vmem:[#allocation2 + $0x50] ss:$8 sps:$4 sm:$0xff]   ;;  %v10128_v54 = vld [vmem:[#allocation2 + $0x64] ss:$8 sps:$4 sm:$0xff]  }
 0x5ec   :  { %v10164_v4 = vld [vmem:[#allocation2 + $0x1c4] ss:$8 sps:$4 sm:$0xff]   ;;  %v10165_v0 = vld [vmem:[#allocation2 + $0x1d0] ss:$8 sps:$4 sm:$0xff]  }
 0x5ed   :  { %v6105_v16 = vshrl.u32 %v9347_v57, 16  ;;  %v6108_v25 = vshll.u32 %v9347_v57, 16  ;;  %v8944_v3 = vrot.slane %v9347_v57, 9  ;;  %v6448_v10 = vrot.slane %v9348_v46, 5  ;;  %v10168_v53 = vld [vmem:[%s13913_s9 + $0xc0] sm:$0xff]  }
 0x5ee   :  { %v6114_v45 = vshll.u32 %v9348_v46, 16  ;;  %v10169_v35 = vld [vmem:[%s13913_s9 + $0x80] sm:$0xff]  }
 0x5ef   :  { %v6107_v24 = vrot.slane %v6105_v16, 4  ;;  %v6110_v42 = vrot.slane %v6108_v25, 5  ;;  %v13363_v49 = vsel %vm11395_vm7, %v8944_v3, %v6448_v10  ;;  %v10170_v57 = vld [vmem:[%s13913_s9 + $0x240] sm:$0xff]   ;;  %v10175_v16 = vld [vmem:[%s13913_s9 + $0x208] sm:$0xff]   ;;  %v10176_v25 = vld [vmem:[%s13913_s9 + $0xd0] sm:$0xff]  }
 0x5f0   :  { %v8946_v11 = vcombine.high %v13348_v18, %v13363_v49  ;;  %v8945_v34 = vcombine.low %v13348_v18, %v13363_v49  ;;  %v6116_v29 = vrot.slane %v6114_v45, 5  ;;  %v10171_v46 = vld [vmem:[%s13913_s9 + $0x200] sm:$0xff]   ;;  %v10172_v18 = vld [vmem:[%s13913_s9 + $0xc8] sm:$0xff]   ;;  %9439 = vmatprep.subr.bf16.mxu0 %v10170_v57  ;;  %v10178_v3 = vld [vmem:[%s13913_s9 + $0x250] sm:$0xff]  }
 0x5f1   :  { %v6111_v8 = vor.u32 %v6110_v42, %v6107_v24  ;;  %9440 = vmatpush3.bf16.msra.mxu0 %v10171_v46  ;;  %v10177_v10 = vld [vmem:[%s13913_s9 + $0x90] sm:$0xff]   ;;  %v10180_v42 = vld [vmem:[%s13913_s9 + $0xd8] sm:$0xff]  }
 0x5f2   :  { %v10179_v24 = vld [vmem:[%s13913_s9 + $0x210] sm:$0xff]   ;;  %v10182_v45 = vld [vmem:[%s13913_s9 + $0x258] sm:$0xff]  }
 0x5f3   :  { %v6112_v21 = vrot.slane %v6111_v8, 4  ;;  %v10181_v49 = vld [vmem:[%s13913_s9 + $0x98] sm:$0xff]  }
 0x5f4   :  { %v10183_v8 = vld [vmem:[%s13913_s9 + $0x218] sm:$0xff]  }
 0x5f5   :  { %v6117_v17 = vsel %vm11337_vm4, %v6112_v21, %v6116_v29  ;;  %v10185_v21 = vld [vmem:[%s13913_s9 + $0xa0] sm:$0xff]  }
 0x5f6   :  { %v8897_v27 = vcombine.low %v6103_v44, %v6117_v17  ;;  %v8898_v5 = vcombine.high %v6103_v44, %v6117_v17  ;;  %v10167_v44 = vld [vmem:[#allocation2 + $0x1d4] ss:$8 sps:$4 sm:$0xff]   ;;  %v10187_v29 = vld [vmem:[%s13913_s9 + $0x220] sm:$0xff]   ;;  %v10188_v17 = vld [vmem:[%s13913_s9 + $0xe8] sm:$0xff]  }
 0x5f8   :  { %8919 = vmatprep.mubr.msk.bf16.mxu1 %vm6246_vm0, %v8898_v5  ;;  %v10189_v5 = vld [vmem:[%s13913_s9 + $0xa8] sm:$0xff]  }
 0x5f9   :  { %6283 = vmatmul.mubr.bf16.vlgmr.msra.gmra.mrb[40].mxu1 %v8897_v27  ;;  %v10190_v27 = vld [vmem:[%s13913_s9 + $0x268] sm:$0xff]  }
 0x5fa   :  { %6400 = vmatpush1.bf16.msra.mxu1 %v10108_v28  ;;  %8942 = vmatprep.mubr.msk.bf16.mxu1 %vm6246_vm0, %v9350_v58  ;;  %v10174_v58 = vld [vmem:[%s13913_s9 + $0x248] sm:$0xff]  }
 0x5fb   :  { %6401 = vmatprep.subr.bf16.mxu1 %v10113_v32  ;;  %9441 = vmatprep.subr.bf16.mxu0 %v10174_v58  ;;  %v10191_v28 = vld [vmem:[%s13913_s9 + $0x228] sm:$0xff]   ;;  %v10192_v32 = vld [vmem:[%s13913_s9 + $0xf0] sm:$0xff]  }
 0x5fc   :  { %9442 = vmatpush3.bf16.msra.mxu0 %v10175_v16 }
 0x5fd   :  { %9443 = vmatprep.subr.bf16.mxu0 %v10178_v3 }
 0x5fe   :  { %6402 = vmatpush1.bf16.msra.mxu1 %v10111_v2  ;;  %v10194_v2 = vld [vmem:[%s13913_s9 + $0x270] sm:$0xff]  }
 0x5ff   :  { %6403 = vmatprep.subr.bf16.mxu1 %v10116_v48  ;;  %v10193_v48 = vld [vmem:[%s13913_s9 + $0xb0] sm:$0xff]  }
 0x600   :  { %9444 = vmatpush3.bf16.msra.mxu0 %v10179_v24 }
 0x601   :  { %9445 = vmatprep.subr.bf16.mxu0 %v10182_v45 }
 0x602   :  { %6404 = vmatpush1.bf16.msra.mxu1 %v10114_v14  ;;  %v10195_v14 = vld [vmem:[%s13913_s9 + $0x230] sm:$0xff]  }
 0x603   :  { %6405 = vmatprep.subr.bf16.mxu1 %v10119_v20  ;;  %v10196_v20 = vld [vmem:[%s13913_s9 + $0xf8] sm:$0xff]  }
 0x604   :  { %9446 = vmatpush3.bf16.msra.mxu0 %v10183_v8 }
 0x606   :  { %6406 = vmatpush1.bf16.msra.mxu1 %v10117_v31  ;;  %v10198_v31 = vld [vmem:[%s13913_s9 + $0x278] sm:$0xff]  }
 0x607   :  { %6407 = vmatprep.subr.bf16.mxu1 %v10122_v41  ;;  %v10197_v41 = vld [vmem:[%s13913_s9 + $0xb8] sm:$0xff]  }
 0x60a   :  { %6408 = vmatpush1.bf16.msra.mxu1 %v10120_v47  ;;  %v10199_v47 = vld [vmem:[%s13913_s9 + $0x238] sm:$0xff]  }
 0x60b   :  { %6409 = vmatprep.subr.bf16.mxu1 %v10125_v7  ;;  %v10200_v7 = vld [vmem:[%s13913_s9 + $0x40] sm:$0xff]  }
 0x60e   :  { %6410 = vmatpush1.bf16.msra.mxu1 %v10123_v60  ;;  %v10202_v60 = vld [vmem:[%s13913_s9 + $0x340] sm:$0xff]  }
 0x60f   :  { %6411 = vmatprep.subr.bf16.mxu1 %v10128_v54  ;;  %v6628_v54 = vld [vmem:[%s13912_s8] sm:$0x3] }
 0x612   :  { %6412 = vmatpush1.bf16.msra.mxu1 %v10126_v50  ;;  %v6633_v50 = vrot.slane %v6628_v54, %v14131_v13 }
 0x613   :  { %6413 = vmatprep.subr.bf16.mxu1 %v10131_v30  ;;  %v6637_v30 = vrot.slane %v6628_v54, %v14133_v36 }
 0x616   :  { %6414 = vmatpush1.bf16.msra.mxu1 %v10129_v23 }
 0x617   :  { %6415 = vmatprep.subr.bf16.mxu1 %v10134_v52 }
 0x61a   :  { %6416 = vmatpush1.bf16.msra.mxu1 %v10132_v62 }
 0x61b   :  { %6417 = vmatprep.subr.bf16.mxu1 %v10137_v38 }
 0x61e   :  { %6418 = vmatpush1.bf16.msra.mxu1 %v10135_v59 }
 0x61f   :  { %6581 = vmatprep.subr.bf16.mxu1 %v10140_v33 }
 0x621   :  { %6432 = vmatmul.mubr.bf16.vlgmr.msra.gmra.mrb[40].mxu1 %v9349_v22  ;;  %v10173_v22 = vld [vmem:[%s13913_s9 + $0x88] sm:$0xff]  }
 0x622   :  { %6582 = vmatpush1.bf16.msra.mxu1 %v10138_v37  ;;  %8967 = vmatprep.mubr.msk.bf16.mxu1 %vm6246_vm0, %v8946_v11  ;;  %v10184_v11 = vld [vmem:[%s13913_s9 + $0xe0] sm:$0xff]  }
 0x623   :  { %6583 = vmatprep.subr.bf16.mxu1 %v10143_v40 }
 0x626   :  { %6584 = vmatpush1.bf16.msra.mxu1 %v10141_v61 }
 0x627   :  { %6585 = vmatprep.subr.bf16.mxu1 %v10146_v43 }
 0x62a   :  { %6586 = vmatpush1.bf16.msra.mxu1 %v10144_v26 }
 0x62b   :  { %6587 = vmatprep.subr.bf16.mxu1 %v10149_v1 }
 0x62e   :  { %6588 = vmatpush1.bf16.msra.mxu1 %v10147_v51 }
 0x62f   :  { %6589 = vmatprep.subr.bf16.mxu1 %v10152_v6 }
 0x632   :  { %6590 = vmatpush1.bf16.msra.mxu1 %v10150_v15 }
 0x633   :  { %6591 = vmatprep.subr.bf16.mxu1 %v10155_v19 }
 0x636   :  { %6592 = vmatpush1.bf16.msra.mxu1 %v10153_v55 }
 0x637   :  { %6593 = vmatprep.subr.bf16.mxu1 %v10158_v63 }
 0x63a   :  { %6594 = vmatpush1.bf16.msra.mxu1 %v10156_v39 }
 0x63b   :  { %6595 = vmatprep.subr.bf16.mxu1 %v10161_v9 }
 0x63e   :  { %6596 = vmatpush1.bf16.msra.mxu1 %v10159_v12 }
 0x63f   :  { %6597 = vmatprep.subr.bf16.mxu1 %v10164_v4 }
 0x642   :  { %6598 = vmatpush1.bf16.msra.mxu1 %v10162_v56 }
 0x643   :  { %6599 = vmatprep.subr.bf16.mxu1 %v10167_v44 }
 0x646   :  { %6600 = vmatpush1.bf16.msra.mxu1 %v10165_v0 }
 0x647   :  { %9351 = vmatprep.subr.bf16.mxu1 %v10168_v53 }
 0x649   :  { %6614 = vmatmul.mubr.bf16.vlgmr.msra.gmra.mrb[40].mxu1 %v8945_v34  ;;  %v10186_v34 = vld [vmem:[%s13913_s9 + $0x260] sm:$0xff]  }
 0x64a   :  { %9352 = vmatpush3.bf16.msra.mxu1 %v10169_v35  ;;  %9447 = vmatprep.subr.bf16.mxu0 %v10186_v34 }
 0x64b   :  { %9353 = vmatprep.subr.bf16.mxu1 %v10172_v18  ;;  %9448 = vmatpush3.bf16.msra.mxu0 %v10187_v29 }
 0x64c   :  { %9449 = vmatprep.subr.bf16.mxu0 %v10190_v27 }
 0x64e   :  { %9354 = vmatpush3.bf16.msra.mxu1 %v10173_v22 }
 0x64f   :  { %9355 = vmatprep.subr.bf16.mxu1 %v10176_v25  ;;  %9450 = vmatpush3.bf16.msra.mxu0 %v10191_v28 }
 0x650   :  { %9451 = vmatprep.subr.bf16.mxu0 %v10194_v2 }
 0x652   :  { %9356 = vmatpush3.bf16.msra.mxu1 %v10177_v10 }
 0x653   :  { %9357 = vmatprep.subr.bf16.mxu1 %v10180_v42  ;;  %9452 = vmatpush3.bf16.msra.mxu0 %v10195_v14 }
 0x654   :  { %9453 = vmatprep.subr.bf16.mxu0 %v10198_v31  ;;  %v10204_v31 = vld [vmem:[%s13913_s9 + $0x48] sm:$0xff]  }
 0x656   :  { %9358 = vmatpush3.bf16.msra.mxu1 %v10181_v49 }
 0x657   :  { %9359 = vmatprep.subr.bf16.mxu1 %v10184_v11  ;;  %9454 = vmatpush3.bf16.msra.mxu0 %v10199_v47 }
 0x658   :  { %9483 = vmatprep.subr.bf16.mxu0 %v10202_v60 }
 0x65a   :  { %9360 = vmatpush3.bf16.msra.mxu1 %v10185_v21 }
 0x65b   :  { %9361 = vmatprep.subr.bf16.mxu1 %v10188_v17 }
 0x65e   :  { %9362 = vmatpush3.bf16.msra.mxu1 %v10189_v5  ;;  %v10201_v5 = vld [vmem:[%s13913_s9] sm:$0xff]  }
 0x65f   :  { %9363 = vmatprep.subr.bf16.mxu1 %v10192_v32 }
 0x662   :  { %9364 = vmatpush3.bf16.msra.mxu1 %v10193_v48 }
 0x663   :  { %9365 = vmatprep.subr.bf16.mxu1 %v10196_v20 }
 0x666   :  { %9366 = vmatpush3.bf16.msra.mxu1 %v10197_v41 }
 0x667   :  { %9373 = vmatprep.subr.bf16.mxu1 %v10200_v7 }
 0x71c   :  { %v6615_v23 = vpop.f32.mrb[40].mxu1 }
 0x71d   :  { %v6640_v52 = vadd.f32 %v6633_v50, %v6615_v23  ;;  %v6617_v62 = vpop.f32.mrb[41].mxu1 }
 0x71e   :  { %v6641_v38 = vadd.f32 %v6637_v30, %v6617_v62  ;;  %v6619_v59 = vpop.f32.mrb[42].mxu1 }
 0x71f   :  { %v8968_v33 = vmul.f32 -1.442695, %v6640_v52  ;;  %v6642_v37 = vadd.f32 %v6633_v50, %v6619_v59  ;;  %v6621_v40 = vpop.f32.mrb[43].mxu1  ;;  %v10205_v59 = vld [vmem:[%s13913_s9 + $0x8] sm:$0xff]  }
 0x720   :  { %v8969_v61 = vmul.f32 -1.442695, %v6641_v38  ;;  %v6643_v43 = vadd.f32 %v6637_v30, %v6621_v40  ;;  %v10203_v30 = vld [vmem:[%s13913_s9 + $0x300] sm:$0xff]  }
 0x721   :  { %10456 = vpow2.f32 %v8968_v33  ;;  %v8970_v26 = vmul.f32 -1.442695, %v6642_v37  ;;  %v10206_v33 = vld [vmem:[%s13913_s9 + $0x348] sm:$0xff]  }
 0x722   :  { %10458 = vpow2.f32 %v8969_v61  ;;  %v8971_v1 = vmul.f32 -1.442695, %v6643_v43 }
 0x723   :  { %10460 = vpow2.f32 %v8970_v26 }
 0x724   :  { %10462 = vpow2.f32 %v8971_v1 }
 0x72b   :  { %v10457_v51 = vpop.eup %10456 }
 0x72c   :  { %v10459_v13 = vpop.eup %10458  ;;  %v6656_v6 = vadd.f32 1.0, %v10457_v51 }
 0x72d   :  { %v10461_v36 = vpop.eup %10460  ;;  %v6657_v15 = vadd.f32 1.0, %v10459_v13 }
 0x72e   :  { %v10463_v19 = vpop.eup %10462  ;;  %10464 = vrcp.f32 %v6656_v6  ;;  %v6658_v55 = vadd.f32 1.0, %v10461_v36  ;;  %v10207_v36 = vld [vmem:[%s13913_s9 + $0x308] sm:$0xff]  }
 0x72f   :  { %10466 = vrcp.f32 %v6657_v15  ;;  %v6659_v63 = vadd.f32 1.0, %v10463_v19 }
 0x730   :  { %10468 = vrcp.f32 %v6658_v55 }
 0x731   :  { %10470 = vrcp.f32 %v6659_v63  ;;  %v10209_v63 = vld [vmem:[%s13913_s9 + $0x10] sm:$0xff]  }
 0x738   :  { %v10465_v39 = vpop.eup %10464 }
 0x739   :  { %v10467_v9 = vpop.eup %10466  ;;  %v6668_v12 = vmul.f32 %v10465_v39, %v6640_v52  ;;  %v10210_v39 = vld [vmem:[%s13913_s9 + $0x350] sm:$0xff]  }
 0x73a   :  { %v10469_v4 = vpop.eup %10468  ;;  %v6669_v56 = vmul.f32 %v10467_v9, %v6641_v38 }
 0x73b   :  { %v10471_v44 = vpop.eup %10470  ;;  %v6672_v0 = vpack.c.bf16 %v6668_v12, %v6668_v12  ;;  %v6670_v53 = vmul.f32 %v10469_v4, %v6642_v37 }
 0x73c   :  { %v6673_v35 = vpack.c.bf16 %v6669_v56, %v6669_v56  ;;  %v6671_v57 = vmul.f32 %v10471_v44, %v6643_v43  ;;  %v10208_v43 = vld [vmem:[%s13913_s9 + $0x50] sm:$0xff]   ;;  %v10212_v44 = vld [vmem:[%s13913_s9 + $0x58] sm:$0xff]  }
 0x73d   :  { %v13484_v46 = vunpack.c.l.b16 %v6672_v0  ;;  %v6674_v18 = vpack.c.bf16 %v6670_v53, %v6670_v53 }
 0x73e   :  { %v13486_v58 = vunpack.c.l.b16 %v6673_v35  ;;  %v6675_v22 = vpack.c.bf16 %v6671_v57, %v6671_v57 }
 0x73f   :  { %v13488_v16 = vunpack.c.l.b16 %v6674_v18  ;;  %v6749_v25 = vrot.slane %v13484_v46, 1  ;;  %v7430_v24 = vrot.slane %v13484_v46, 4  ;;  %v7790_v42 = vrot.slane %v13484_v46, 6 }
 0x740   :  { %v13491_v3 = vunpack.c.l.b16 %v6675_v22  ;;  %v6751_v10 = vrot.slane %v13486_v58, 1  ;;  %v7433_v49 = vrot.slane %v13486_v58, 4  ;;  %v7793_v17 = vrot.slane %v13486_v58, 6 }
 0x741   :  { %v6750_v45 = vsel %vm4446_vm9, %v13488_v16, %v6749_v25  ;;  %v7431_v8 = vrot.slane %v13488_v16, 3  ;;  %v6893_v11 = vrot.slane %v13488_v16, 7  ;;  %v7073_v41 = vrot.slane %v13486_v58, 2  ;;  %v10216_v25 = vld [vmem:[%s13913_s9 + $0x60] sm:$0xff]  }
 0x742   :  { %v6752_v34 = vsel %vm4446_vm9, %v13491_v3, %v6751_v10  ;;  %v6895_v21 = vrot.slane %v13491_v3, 7  ;;  %v7434_v29 = vrot.slane %v13491_v3, 3  ;;  %v7794_v32 = vrot.slane %v13491_v3, 5  ;;  %v10217_v10 = vld [vmem:[%s13913_s9 + $0x20] sm:$0xff]  }
 0x743   :  { %v6754_v27 = vpack.c.b16 %v6752_v34, %v6752_v34  ;;  %v7432_v28 = vsel %vm4446_vm9, %v7431_v8, %v7430_v24  ;;  %v13513_v2 = vsel %vm4446_vm9, %v6893_v11, %v13484_v46  ;;  %v6753_v48 = vpack.c.b16 %v6750_v45, %v6750_v45  ;;  %v10218_v24 = vld [vmem:[%s13913_s9 + $0x360] sm:$0xff]   ;;  %v10222_v8 = vld [vmem:[%s13913_s9 + $0x368] sm:$0xff]   ;;  %v10224_v11 = vld [vmem:[%s13913_s9 + $0x70] sm:$0xff]  }
 0x744   :  { %v6896_v14 = vsel %vm4446_vm9, %v6895_v21, %v13486_v58  ;;  %v7435_v20 = vsel %vm4446_vm9, %v7434_v29, %v7433_v49  ;;  %v7795_v60 = vsel %vm4446_vm9, %v7794_v32, %v7793_v17  ;;  %v7074_v54 = vrot.slane %v13491_v3, 1  ;;  %v10219_v45 = vld [vmem:[%s13913_s9 + $0x320] sm:$0xff]   ;;  %v10221_v49 = vld [vmem:[%s13913_s9 + $0x28] sm:$0xff]   ;;  %v10225_v21 = vld [vmem:[%s13913_s9 + $0x30] sm:$0xff]  }
 0x745   :  { %6885 = vmatprep.mubr.bf16.mxu1 %v6754_v27  ;;  %v6898_v47 = vpack.c.b16 %v6896_v14, %v6896_v14  ;;  %v7437_v7 = vpack.c.b16 %v7435_v20, %v7435_v20  ;;  %v7436_v50 = vpack.c.b16 %v7432_v28, %v7432_v28  ;;  %v7791_v23 = vrot.slane %v13488_v16, 5  ;;  %v10223_v34 = vld [vmem:[%s13913_s9 + $0x328] sm:$0xff]   ;;  %v10226_v29 = vld [vmem:[%s13913_s9 + $0x370] sm:$0xff]   ;;  %v10228_v17 = vld [vmem:[%s13913_s9 + $0x78] sm:$0xff]  }
 0x746   :  { %6886 = vmatmul.mubr.bf16.vlgmr.msra.gmra.mrb[44].mxu1 %v6753_v48  ;;  %v7070_v52 = vrot.slane %v13484_v46, 2  ;;  %v7071_v62 = vrot.slane %v13488_v16, 1  ;;  %v7797_v38 = vpack.c.b16 %v7795_v60, %v7795_v60  ;;  %v13537_v37 = vsel %vm4446_vm9, %v7074_v54, %v7073_v41  ;;  %v10227_v27 = vld [vmem:[%s13913_s9 + $0x330] sm:$0xff]   ;;  %v10230_v28 = vld [vmem:[%s13913_s9 + $0x378] sm:$0xff]   ;;  %v10232_v32 = vld [vmem:[%s13913_s9 + $0x140] sm:$0xff]  }
 0x747   :  { %9374 = vmatpush3.bf16.msra.mxu1 %v10201_v5  ;;  %7029 = vmatprep.mubr.bf16.mxu1 %v6898_v47  ;;  %v7253_v40 = vrot.slane %v13486_v58, 3  ;;  %v7254_v61 = vrot.slane %v13491_v3, 2  ;;  %v13545_v26 = vsel %vm4446_vm9, %v7791_v23, %v7790_v42  ;;  %v7250_v51 = vrot.slane %v13484_v46, 3  ;;  %v10220_v42 = vld [vmem:[%s13913_s9 + $0x68] sm:$0xff]   ;;  %v10229_v5 = vld [vmem:[%s13913_s9 + $0x38] sm:$0xff]   ;;  %v10233_v14 = vld [vmem:[%s13913_s9 + $0x100] sm:$0xff]  }
 0x748   :  { %7568 = vmatprep.mubr.bf16.mxu0 %v7437_v7  ;;  %9375 = vmatprep.subr.bf16.mxu1 %v10204_v31  ;;  %v13548_v1 = vsel %vm4446_vm9, %v7071_v62, %v7070_v52  ;;  %v7251_v13 = vrot.slane %v13488_v16, 2  ;;  %v7613_v19 = vrot.slane %v13486_v58, 5  ;;  %v7614_v55 = vrot.slane %v13491_v3, 4  ;;  %v10231_v48 = vld [vmem:[%s13913_s9 + $0x338] sm:$0xff]   ;;  %v10234_v31 = vld [vmem:[%s13913_s9 + $0x148] sm:$0xff]   ;;  %v10237_v60 = vld [vmem:[%s13913_s9 + $0x110] sm:$0xff]  }
 0x749   :  { %7569 = vmatmul.mubr.bf16.vlgmr.msra.gmra.mrb[72].mxu0 %v7436_v50  ;;  %v13553_v6 = vsel %vm4446_vm9, %v7254_v61, %v7253_v40  ;;  %v7610_v9 = vrot.slane %v13484_v46, 5  ;;  %v7611_v12 = vrot.slane %v13488_v16, 4  ;;  %v7973_v4 = vrot.slane %v13486_v58, 7  ;;  %v10211_v58 = vld [vmem:[%s13913_s9 + $0x310] sm:$0xff]   ;;  %v10235_v7 = vld [vmem:[%s13913_s9 + $0x108] sm:$0xff]   ;;  %v10238_v54 = vld [vmem:[%s13913_s9 + $0x158] sm:$0xff]  }
 0x74a   :  { %9484 = vmatpush3.bf16.msra.mxu0 %v10203_v30  ;;  %7928 = vmatprep.mubr.bf16.mxu0 %v7797_v38  ;;  %v13559_v15 = vsel %vm4446_vm9, %v7251_v13, %v7250_v51  ;;  %v7974_v56 = vrot.slane %v13491_v3, 6  ;;  %v13577_v0 = vsel %vm4446_vm9, %v7614_v55, %v7613_v19  ;;  %v7970_v53 = vrot.slane %v13484_v46, 7  ;;  %v10213_v46 = vld [vmem:[%s13913_s9 + $0x18] sm:$0xff]   ;;  %v10240_v30 = vld [vmem:[%s13913_s9 + $0x160] sm:$0xff]   ;;  %v10242_v52 = vld [vmem:[%s13913_s9 + $0x168] sm:$0xff]  }
 0x74b   :  { %9376 = vmatpush3.bf16.msra.mxu1 %v10205_v59  ;;  %9485 = vmatprep.subr.bf16.mxu0 %v10206_v33  ;;  %v7971_v35 = vrot.slane %v13488_v16, 6  ;;  %v13582_v57 = vsel %vm4446_vm9, %v7611_v12, %v7610_v9  ;;  %v10214_v16 = vld [vmem:[%s13913_s9 + $0x358] sm:$0xff]   ;;  %v6897_v20 = vpack.c.b16 %v13513_v2, %v13513_v2  ;;  %v7077_v41 = vpack.c.b16 %v13537_v37, %v13537_v37  ;;  %v10236_v2 = vld [vmem:[%s13913_s9 + $0x150] sm:$0xff]   ;;  %v10241_v23 = vld [vmem:[%s13913_s9 + $0x120] sm:$0xff]  }
 0x74c   :  { %9377 = vmatprep.subr.bf16.mxu1 %v10208_v43  ;;  %v13585_v18 = vsel %vm4446_vm9, %v7974_v56, %v7973_v4  ;;  %v10215_v3 = vld [vmem:[%s13913_s9 + $0x318] sm:$0xff]   ;;  %v7796_v47 = vpack.c.b16 %v13545_v26, %v13545_v26  ;;  %v10243_v62 = vld [vmem:[%s13913_s9 + $0x128] sm:$0xff]   ;;  %v10244_v38 = vld [vmem:[%s13913_s9 + $0x170] sm:$0xff]   ;;  %v7076_v43 = vpack.c.b16 %v13548_v1, %v13548_v1  ;;  %v7257_v51 = vpack.c.b16 %v13553_v6, %v13553_v6 }
 0x74d   :  { %v13591_v22 = vsel %vm4446_vm9, %v7971_v35, %v7970_v53  ;;  %v10239_v50 = vld [vmem:[%s13913_s9 + $0x118] sm:$0xff]   ;;  %v10245_v59 = vld [vmem:[%s13913_s9 + $0x130] sm:$0xff]   ;;  %v10248_v40 = vld [vmem:[%s13913_s9 + $0x1c0] sm:$0xff]  }
 0x74e   :  { %9486 = vmatpush3.bf16.msra.mxu0 %v10207_v36  ;;  %v10246_v33 = vld [vmem:[%s13913_s9 + $0x178] sm:$0xff]   ;;  %v10249_v61 = vld [vmem:[%s13913_s9 + $0x180] sm:$0xff]   ;;  %v10250_v26 = vld [vmem:[%s13913_s9 + $0x1c8] sm:$0xff]  }
 0x74f   :  { %9378 = vmatpush3.bf16.msra.mxu1 %v10209_v63  ;;  %9487 = vmatprep.subr.bf16.mxu0 %v10210_v39  ;;  %v10247_v37 = vld [vmem:[%s13913_s9 + $0x138] sm:$0xff]   ;;  %v10251_v13 = vld [vmem:[%s13913_s9 + $0x188] sm:$0xff]   ;;  %v10252_v1 = vld [vmem:[%s13913_s9 + $0x1d0] sm:$0xff]  }
 0x750   :  { %9379 = vmatprep.subr.bf16.mxu1 %v10212_v44  ;;  %v10253_v36 = vld [vmem:[%s13913_s9 + $0x190] sm:$0xff]   ;;  %v10254_v6 = vld [vmem:[%s13913_s9 + $0x1d8] sm:$0xff]   ;;  %v10256_v55 = vld [vmem:[%s13913_s9 + $0x1e0] sm:$0xff]  }
 0x751   :  { %v10255_v19 = vld [vmem:[%s13913_s9 + $0x198] sm:$0xff]   ;;  %v10257_v63 = vld [vmem:[%s13913_s9 + $0x1a0] sm:$0xff]   ;;  %v10258_v39 = vld [vmem:[%s13913_s9 + $0x1e8] sm:$0xff]  }
 0x752   :  { %9488 = vmatpush3.bf16.msra.mxu0 %v10211_v58  ;;  %v10259_v9 = vld [vmem:[%s13913_s9 + $0x1a8] sm:$0xff]   ;;  %v10260_v12 = vld [vmem:[%s13913_s9 + $0x1f0] sm:$0xff]   ;;  %v10262_v56 = vld [vmem:[%s13913_s9 + $0x1f8] sm:$0xff]   ;;  %v7256_v58 = vpack.c.b16 %v13559_v15, %v13559_v15 }
 0x753   :  { %9380 = vmatpush3.bf16.msra.mxu1 %v10213_v46  ;;  %9489 = vmatprep.subr.bf16.mxu0 %v10214_v16  ;;  %v10261_v4 = vld [vmem:[%s13913_s9 + $0x1b0] sm:$0xff]   ;;  %v10263_v44 = vld [vmem:[%s13913_s9 + $0x1b8] sm:$0xff]   ;;  %v10264_v53 = vld [vmem:[%s13913_s9 + $0x2c0] sm:$0xff]   ;;  %v7617_v16 = vpack.c.b16 %v13577_v0, %v13577_v0 }
 0x754   :  { %9381 = vmatprep.subr.bf16.mxu1 %v10216_v25  ;;  %v10265_v35 = vld [vmem:[%s13913_s9 + $0x280] sm:$0xff]   ;;  %v10266_v46 = vld [vmem:[%s13913_s9 + $0x2c8] sm:$0xff]   ;;  %v10268_v15 = vld [vmem:[%s13913_s9 + $0x2d0] sm:$0xff]  }
 0x755   :  { %v10267_v25 = vld [vmem:[%s13913_s9 + $0x288] sm:$0xff]   ;;  %v10270_v0 = vld [vmem:[%s13913_s9 + $0x2d8] sm:$0xff]  }
 0x756   :  { %9490 = vmatpush3.bf16.msra.mxu0 %v10215_v3  ;;  %v10269_v3 = vld [vmem:[%s13913_s9 + $0x290] sm:$0xff]  }
 0x757   :  { %9382 = vmatpush3.bf16.msra.mxu1 %v10217_v10  ;;  %9491 = vmatprep.subr.bf16.mxu0 %v10218_v24  ;;  %v10271_v10 = vld [vmem:[%s13913_s9 + $0x298] sm:$0xff]   ;;  %v10272_v24 = vld [vmem:[%s13913_s9 + $0x2e0] sm:$0xff]  }
 0x758   :  { %9383 = vmatprep.subr.bf16.mxu1 %v10220_v42  ;;  %v10273_v42 = vld [vmem:[%s13913_s9 + $0x2a0] sm:$0xff]  }
 0x75a   :  { %9492 = vmatpush3.bf16.msra.mxu0 %v10219_v45  ;;  %v10274_v45 = vld [vmem:[%s13913_s9 + $0x2e8] sm:$0xff]  }
 0x75b   :  { %9384 = vmatpush3.bf16.msra.mxu1 %v10221_v49  ;;  %9493 = vmatprep.subr.bf16.mxu0 %v10222_v8  ;;  %v10275_v49 = vld [vmem:[%s13913_s9 + $0x2a8] sm:$0xff]   ;;  %v10276_v8 = vld [vmem:[%s13913_s9 + $0x2f0] sm:$0xff]  }
 0x75c   :  { %9385 = vmatprep.subr.bf16.mxu1 %v10224_v11  ;;  %v10277_v11 = vld [vmem:[%s13913_s9 + $0x2b0] sm:$0xff]  }
 0x75e   :  { %9494 = vmatpush3.bf16.msra.mxu0 %v10223_v34  ;;  %v10278_v34 = vld [vmem:[%s13913_s9 + $0x2f8] sm:$0xff]  }
 0x75f   :  { %9386 = vmatpush3.bf16.msra.mxu1 %v10225_v21  ;;  %9495 = vmatprep.subr.bf16.mxu0 %v10226_v29  ;;  %v10279_v21 = vld [vmem:[%s13913_s9 + $0x2b8] sm:$0xff]   ;;  %v10280_v29 = vld [vmem:[%s13913_s9 + $0x3c0] sm:$0xff]  }
 0x760   :  { %9387 = vmatprep.subr.bf16.mxu1 %v10228_v17  ;;  %v10281_v17 = vld [vmem:[%s13913_s9 + $0x380] sm:$0xff]  }
 0x762   :  { %9496 = vmatpush3.bf16.msra.mxu0 %v10227_v27  ;;  %v7616_v27 = vpack.c.b16 %v13582_v57, %v13582_v57  ;;  %v10284_v57 = vld [vmem:[%s13913_s9 + $0x3d0] sm:$0xff]  }
 0x763   :  { %9388 = vmatpush3.bf16.msra.mxu1 %v10229_v5  ;;  %9497 = vmatprep.subr.bf16.mxu0 %v10230_v28  ;;  %v10282_v5 = vld [vmem:[%s13913_s9 + $0x3c8] sm:$0xff]   ;;  %v7977_v28 = vpack.c.b16 %v13585_v18, %v13585_v18  ;;  %v10286_v18 = vld [vmem:[%s13913_s9 + $0x3d8] sm:$0xff]  }
 0x764   :  { %9395 = vmatprep.subr.bf16.mxu1 %v10232_v32  ;;  %v10283_v32 = vld [vmem:[%s13913_s9 + $0x388] sm:$0xff]  }
 0x766   :  { %9498 = vmatpush3.bf16.msra.mxu0 %v10231_v48  ;;  %7030 = vmatmul.mubr.bf16.vlgmr.msra.gmra.mrb[48].mxu1 %v6897_v20  ;;  %v10285_v48 = vld [vmem:[%s13913_s9 + $0x390] sm:$0xff]   ;;  %v10288_v20 = vld [vmem:[%s13913_s9 + $0x3e0] sm:$0xff]  }
 0x767   :  { %9396 = vmatpush3.bf16.msra.mxu1 %v10233_v14  ;;  %7208 = vmatprep.mubr.bf16.mxu1 %v7077_v41  ;;  %v10287_v14 = vld [vmem:[%s13913_s9 + $0x398] sm:$0xff]   ;;  %v10290_v41 = vld [vmem:[%s13913_s9 + $0x3e8] sm:$0xff]  }
 0x768   :  { %9397 = vmatprep.subr.bf16.mxu1 %v10234_v31  ;;  %v10289_v31 = vld [vmem:[%s13913_s9 + $0x3a0] sm:$0xff]  }
 0x769   :  { %7929 = vmatmul.mubr.bf16.vlgmr.msra.gmra.mrb[76].mxu0 %v7796_v47  ;;  %v10291_v47 = vld [vmem:[%s13913_s9 + $0x3a8] sm:$0xff]  }
 0x76b   :  { %9398 = vmatpush3.bf16.msra.mxu1 %v10235_v7  ;;  %v10292_v7 = vld [vmem:[%s13913_s9 + $0x3f0] sm:$0xff]  }
 0x76c   :  { %9399 = vmatprep.subr.bf16.mxu1 %v10236_v2  ;;  %v10293_v2 = vld [vmem:[%s13913_s9 + $0x3b0] sm:$0xff]  }
 0x76f   :  { %9400 = vmatpush3.bf16.msra.mxu1 %v10237_v60  ;;  %v10294_v60 = vld [vmem:[%s13913_s9 + $0x3f8] sm:$0xff]  }
 0x770   :  { %9401 = vmatprep.subr.bf16.mxu1 %v10238_v54  ;;  %v10295_v54 = vld [vmem:[%s13913_s9 + $0x3b8] sm:$0xff]  }
 0x773   :  { %9402 = vmatpush3.bf16.msra.mxu1 %v10239_v50  ;;  %v7976_v50 = vpack.c.b16 %v13591_v22, %v13591_v22 }
 0x774   :  { %9403 = vmatprep.subr.bf16.mxu1 %v10240_v30 }
 0x777   :  { %9404 = vmatpush3.bf16.msra.mxu1 %v10241_v23 }
 0x778   :  { %9405 = vmatprep.subr.bf16.mxu1 %v10242_v52 }
 0x77b   :  { %9406 = vmatpush3.bf16.msra.mxu1 %v10243_v62 }
 0x77c   :  { %9407 = vmatprep.subr.bf16.mxu1 %v10244_v38 }
 0x77f   :  { %9408 = vmatpush3.bf16.msra.mxu1 %v10245_v59 }
 0x780   :  { %9409 = vmatprep.subr.bf16.mxu1 %v10246_v33 }
 0x783   :  { %9410 = vmatpush3.bf16.msra.mxu1 %v10247_v37 }
 0x784   :  { %9417 = vmatprep.subr.bf16.mxu1 %v10248_v40 }
 0x786   :  { %7209 = vmatmul.mubr.bf16.vlgmr.msra.gmra.mrb[52].mxu1 %v7076_v43 }
 0x787   :  { %9418 = vmatpush3.bf16.msra.mxu1 %v10249_v61  ;;  %7388 = vmatprep.mubr.bf16.mxu1 %v7257_v51 }
 0x788   :  { %9419 = vmatprep.subr.bf16.mxu1 %v10250_v26 }
 0x78b   :  { %9420 = vmatpush3.bf16.msra.mxu1 %v10251_v13 }
 0x78c   :  { %9421 = vmatprep.subr.bf16.mxu1 %v10252_v1 }
 0x78f   :  { %9422 = vmatpush3.bf16.msra.mxu1 %v10253_v36 }
 0x790   :  { %9423 = vmatprep.subr.bf16.mxu1 %v10254_v6 }
 0x793   :  { %9424 = vmatpush3.bf16.msra.mxu1 %v10255_v19 }
 0x794   :  { %9425 = vmatprep.subr.bf16.mxu1 %v10256_v55 }
 0x797   :  { %9426 = vmatpush3.bf16.msra.mxu1 %v10257_v63 }
 0x798   :  { %9427 = vmatprep.subr.bf16.mxu1 %v10258_v39 }
 0x79b   :  { %9428 = vmatpush3.bf16.msra.mxu1 %v10259_v9 }
 0x79c   :  { %9429 = vmatprep.subr.bf16.mxu1 %v10260_v12 }
 0x79f   :  { %9430 = vmatpush3.bf16.msra.mxu1 %v10261_v4 }
 0x7a0   :  { %9431 = vmatprep.subr.bf16.mxu1 %v10262_v56  ;;  %v10296_v56 = vld [vmem:[%s13915_s11] sm:$0xff]  }
 0x7a3   :  { %9432 = vmatpush3.bf16.msra.mxu1 %v10263_v44 }
 0x7a4   :  { %9461 = vmatprep.subr.bf16.mxu1 %v10264_v53  ;;  %v10531_v53 = vmov 0.0  }
 0x7a5   :  { %9536 = vmatprep.subr.bf16.mxu0 %v10531_v53  ;;  %9552 = vmatprep.mubr.msk.bf16.mxu0 %vm10532_vm1, %v10531_v53 }
 0x7a6   :  { %7389 = vmatmul.mubr.bf16.vlgmr.msra.gmra.mrb[56].mxu1 %v7256_v58  ;;  %9537 = vmatpush3.bf16.msra.mxu0 %v10296_v56  ;;  %v10297_v58 = vld [vmem:[%s13915_s11 + $0x8] sm:$0xff]  }
 0x7a7   :  { %9462 = vmatpush3.bf16.msra.mxu1 %v10265_v35  ;;  %7748 = vmatprep.mubr.bf16.mxu1 %v7617_v16  ;;  %v10299_v16 = vld [vmem:[%s13915_s11 + $0x18] sm:$0xff]  }
 0x7a8   :  { %9463 = vmatprep.subr.bf16.mxu1 %v10266_v46  ;;  %9538 = vmatprep.subr.bf16.mxu0 %v10531_v53  ;;  %v10298_v46 = vld [vmem:[%s13915_s11 + $0x10] sm:$0xff]  }
 0x7aa   :  { %9539 = vmatpush3.bf16.msra.mxu0 %v10297_v58 }
 0x7ab   :  { %9464 = vmatpush3.bf16.msra.mxu1 %v10267_v25  ;;  %9540 = vmatprep.subr.bf16.mxu0 %v10531_v53  ;;  %v10300_v25 = vld [vmem:[%s13915_s11 + $0x20] sm:$0xff]  }
 0x7ac   :  { %9465 = vmatprep.subr.bf16.mxu1 %v10268_v15  ;;  %v10301_v15 = vld [vmem:[%s13915_s11 + $0x28] sm:$0xff]  }
 0x7ae   :  { %9541 = vmatpush3.bf16.msra.mxu0 %v10298_v46 }
 0x7af   :  { %9466 = vmatpush3.bf16.msra.mxu1 %v10269_v3  ;;  %9542 = vmatprep.subr.bf16.mxu0 %v10531_v53  ;;  %v10302_v3 = vld [vmem:[%s13915_s11 + $0x30] sm:$0xff]  }
 0x7b0   :  { %9467 = vmatprep.subr.bf16.mxu1 %v10270_v0  ;;  %v10303_v0 = vld [vmem:[%s13915_s11 + $0x38] sm:$0xff]  }
 0x7b2   :  { %9543 = vmatpush3.bf16.msra.mxu0 %v10299_v16 }
 0x7b3   :  { %9468 = vmatpush3.bf16.msra.mxu1 %v10271_v10  ;;  %9544 = vmatprep.subr.bf16.mxu0 %v10531_v53 }
 0x7b4   :  { %9469 = vmatprep.subr.bf16.mxu1 %v10272_v24 }
 0x7b6   :  { %9545 = vmatpush3.bf16.msra.mxu0 %v10300_v25 }
 0x7b7   :  { %9470 = vmatpush3.bf16.msra.mxu1 %v10273_v42  ;;  %9546 = vmatprep.subr.bf16.mxu0 %v10531_v53 }
 0x7b8   :  { %9471 = vmatprep.subr.bf16.mxu1 %v10274_v45 }
 0x7ba   :  { %9547 = vmatpush3.bf16.msra.mxu0 %v10301_v15 }
 0x7bb   :  { %9472 = vmatpush3.bf16.msra.mxu1 %v10275_v49  ;;  %9548 = vmatprep.subr.bf16.mxu0 %v10531_v53 }
 0x7bc   :  { %9473 = vmatprep.subr.bf16.mxu1 %v10276_v8 }
 0x7be   :  { %9549 = vmatpush3.bf16.msra.mxu0 %v10302_v3 }
 0x7bf   :  { %9474 = vmatpush3.bf16.msra.mxu1 %v10277_v11  ;;  %9550 = vmatprep.subr.bf16.mxu0 %v10531_v53 }
 0x7c0   :  { %9475 = vmatprep.subr.bf16.mxu1 %v10278_v34 }
 0x7c2   :  { %9551 = vmatpush3.bf16.msra.mxu0 %v10303_v0 }
 0x7c3   :  { %9476 = vmatpush3.bf16.msra.mxu1 %v10279_v21 }
 0x7c4   :  { %9505 = vmatprep.subr.bf16.mxu1 %v10280_v29 }
 0x7c6   :  { %7749 = vmatmul.mubr.bf16.vlgmr.msra.gmra.mrb[60].mxu1 %v7616_v27 }
 0x7c7   :  { %9506 = vmatpush3.bf16.msra.mxu1 %v10281_v17  ;;  %8108 = vmatprep.mubr.bf16.mxu1 %v7977_v28 }
 0x7c8   :  { %9507 = vmatprep.subr.bf16.mxu1 %v10282_v5 }
 0x7cb   :  { %9508 = vmatpush3.bf16.msra.mxu1 %v10283_v32 }
 0x7cc   :  { %9509 = vmatprep.subr.bf16.mxu1 %v10284_v57 }
 0x7cf   :  { %9510 = vmatpush3.bf16.msra.mxu1 %v10285_v48 }
 0x7d0   :  { %9511 = vmatprep.subr.bf16.mxu1 %v10286_v18 }
 0x7d3   :  { %9512 = vmatpush3.bf16.msra.mxu1 %v10287_v14  ;;  %v9324_v14 = vld [vmem:[%s13914_s10] ss:$0 sm:$0xff]  ;;  %s10498_s10 = scalar_lea.vmem %s8253_s3, 32 }
 0x7d4   :  { %9513 = vmatprep.subr.bf16.mxu1 %v10288_v20  ;;  %p10499_p8 = scmp.ne.s32.totalorder %s8253_s3, %s10498_s10  ;;  %p10504_p10 = scmp.lt.s32.totalorder %s10498_s10, %s10498_s10 }
 0x7d6   :  { %p10505_p11 = por %p10504_p10, %p10503_p9 }
 0x7d7   :  { %9514 = vmatpush3.bf16.msra.mxu1 %v10289_v31 }
 0x7d8   :  { %9515 = vmatprep.subr.bf16.mxu1 %v10290_v41  ;;  %p10506_p12 = pnand %p10505_p11, %p10499_p8 }
 0x7db   :  { %9516 = vmatpush3.bf16.msra.mxu1 %v10291_v47 }
 0x7dc   :  { %9517 = vmatprep.subr.bf16.mxu1 %v10292_v7 }
 0x7df   :  { %9518 = vmatpush3.bf16.msra.mxu1 %v10293_v2 }
 0x7e0   :  { %9519 = vmatprep.subr.bf16.mxu1 %v10294_v60 }
 0x7e3   :  { %9520 = vmatpush3.bf16.msra.mxu1 %v10295_v54 }
 0x7e6   :  { %8109 = vmatmul.mubr.bf16.vlgmr.msra.gmra.mrb[64].mxu1 %v7976_v50 }
 0x819   :  { %v9367_v30 = vpop.f32.mrb[44].mxu1 }
 0x81a   :  { %v9368_v23 = vpop.f32.mrb[45].mxu1 }
 0x81b   :  { %v9369_v52 = vadd.f32 %v9368_v23, %v9367_v30  ;;  %v9370_v62 = vpop.f32.mrb[46].mxu1  ;;  %v9326_v30 = vld [vmem:[%s13916_s12] ss:$0 sm:$0xff] }
 0x81c   :  { %v9455_v38 = vpop.f32.mrb[72].mxu0  ;;  %v9371_v59 = vpop.f32.mrb[47].mxu1 }
 0x81d   :  { %v9456_v33 = vpop.f32.mrb[73].mxu0 }
 0x81e   :  { %v9457_v37 = vadd.f32 %v9456_v33, %v9455_v38  ;;  %v9458_v40 = vpop.f32.mrb[74].mxu0 }
 0x81f   :  { %v9459_v61 = vpop.f32.mrb[75].mxu0 }
 0x839   :  { %v9389_v43 = vpop.f32.mrb[48].mxu1 }
 0x83a   :  { %v9390_v26 = vpop.f32.mrb[49].mxu1 }
 0x83b   :  { %v9391_v51 = vadd.f32 %v9390_v26, %v9389_v43  ;;  %v9392_v13 = vpop.f32.mrb[50].mxu1 }
 0x83c   :  { %v9499_v1 = vpop.f32.mrb[76].mxu0  ;;  %v9393_v36 = vpop.f32.mrb[51].mxu1 }
 0x83d   :  { %v7032_v6 = vadd.f32 %v9391_v51, %v9369_v52  ;;  %v9500_v19 = vpop.f32.mrb[77].mxu0 }
 0x83e   :  { %v9501_v22 = vadd.f32 %v9500_v19, %v9499_v1  ;;  %v9502_v55 = vpop.f32.mrb[78].mxu0 }
 0x83f   :  { %v9503_v63 = vpop.f32.mrb[79].mxu0 }
 0x859   :  { %v9411_v39 = vpop.f32.mrb[52].mxu1 }
 0x85a   :  { %v9412_v9 = vpop.f32.mrb[53].mxu1 }
 0x85b   :  { %v9413_v12 = vadd.f32 %v9412_v9, %v9411_v39  ;;  %v9414_v4 = vpop.f32.mrb[54].mxu1 }
 0x85c   :  { %v9415_v44 = vpop.f32.mrb[55].mxu1 }
 0x85d   :  { %v7216_v35 = vadd.f32 %v9413_v12, %v7032_v6 }
 0x879   :  { %v9433_v10 = vpop.f32.mrb[56].mxu1 }
 0x87a   :  { %v9434_v24 = vpop.f32.mrb[57].mxu1 }
 0x87b   :  { %v9435_v42 = vadd.f32 %v9434_v24, %v9433_v10  ;;  %v9436_v45 = vpop.f32.mrb[58].mxu1 }
 0x87c   :  { %v9437_v49 = vpop.f32.mrb[59].mxu1 }
 0x87d   :  { %v7396_v8 = vadd.f32 %v9435_v42, %v7216_v35 }
 0x87f   :  { %v7576_v11 = vadd.f32 %v9457_v37, %v7396_v8 }
 0x899   :  { %v9477_v34 = vpop.f32.mrb[60].mxu1 }
 0x89a   :  { %v9478_v21 = vpop.f32.mrb[61].mxu1 }
 0x89b   :  { %v9479_v29 = vadd.f32 %v9478_v21, %v9477_v34  ;;  %v9480_v17 = vpop.f32.mrb[62].mxu1 }
 0x89c   :  { %v9481_v27 = vpop.f32.mrb[63].mxu1 }
 0x89d   :  { %v7756_v5 = vadd.f32 %v9479_v29, %v7576_v11 }
 0x89f   :  { %v7936_v28 = vadd.f32 %v9501_v22, %v7756_v5 }
 0x8b9   :  { %v9521_v32 = vpop.f32.mrb[64].mxu1 }
 0x8ba   :  { %v9522_v57 = vpop.f32.mrb[65].mxu1 }
 0x8bb   :  { %v9523_v48 = vadd.f32 %v9522_v57, %v9521_v32  ;;  %v9524_v18 = vpop.f32.mrb[66].mxu1 }
 0x8bc   :  { %v9525_v20 = vpop.f32.mrb[67].mxu1 }
 0x8bd   :  { %v8116_v31 = vadd.f32 %v9523_v48, %v7936_v28 }
 0x8bf   :  { %v8124_v41 = vadd.f32 %v9324_v14, %v8116_v31 }
 0x8c1   :  { %v9325_v47 = vmul.f32 -1.442695, %v8124_v41 }
 0x8c3   :  { %10472 = vpow2.f32 %v9325_v47 }
 0x8cd   :  { %v10473_v7 = vpop.eup %10472 }
 0x8ce   :  { %v8128_v2 = vadd.f32 1.0, %v10473_v7 }
 0x8d0   :  { %10474 = vrcp.f32 %v8128_v2 }
 0x8da   :  { %v10475_v60 = vpop.eup %10474 }
 0x8db   :  { %v8131_v54 = vmul.f32 %v10475_v60, %v8124_v41 }
 0x8dd   :  { %v8132_v50 = vpack.c.bf16 %v8131_v54, %v8131_v54 }
 0x8df   :  { %9553 = vmatmul.mubr.bf16.vlgmr.msra.gmra.mrb[80].mxu0 %v8132_v50 }
 0x9b2   :  { %v8238_v23 = vpop.f32.mrb[80].mxu0 }
 0x9b3   :  { %v8239_v52 = vadd.f32 %v9326_v30, %v8238_v23  ;;  %v9554_v62 = vpop.f32.mrb[81].mxu0 }
 0x9b4   :  { %v8241_v38 = vpop.f32.mrb[82].mxu0 }
 0x9b5   :  { %v9555_v59 = vpop.f32.mrb[83].mxu0  ;;  %8245 = vst.msk [vmem:[#allocation5] sm:$0x3] %vm8244_vm2, %v8239_v52 }
 0x9b6   :  { %10509 = shalt.err (!%p10506_p12)
}
 0x9b7   :  { %s10510_s12 = scalar_lea.hbm %s13917_s13, 32 }
 0x9b8   :  { %p10511_p13 = scmp.ne.s32.totalorder %s13917_s13, %s10510_s12  ;;  %p10514_p0 = scmp.lt.u32.totalorder %s10510_s12, %s13917_s13 }
 0x9ba   :  { %p10516_p1 = pnand %p10514_p0, %p10511_p13 }
 0x9bc   :  { %10519 = shalt.err (!%p10516_p1)
}
 0x9bd   :  { %8255 = dma.vmem_to_hbm [thread:$0]  %s8253_s3, 32, %s13917_s13, [#allocation4]  }
 0x9be   :  { %10522 = dma.done.wait [#allocation4], 32  }
 0x9bf   :  { %10523 = vsyncadd [#allocation4], 4294967264 }
 0x9c0   :  { %8259 = vsyncpa [#allocation3], 1 }
 0x9c1   :  { %8260 = vsyncpa [#allocation4], 1 }

</bundles_post_ra>
